<compile_context>
chip_gen: v7x
topology: tpu7x:2x2x1
jax: 0.10.0
libtpu: 0.0.40
codegen_flags: <defaults>
</compile_context>

<pallas_src>
import jax
import jax.numpy as jnp
from jax.experimental import pallas as pl
from jax.experimental.pallas import tpu as pltpu

# ---- synthetic "BERT" config (small, consistent with the forward pass) ----
VOCAB = 100
TYPE_VOCAB = 2
MAX_POS = 16
HIDDEN = 32
N_HEADS = 4
HEAD_DIM = HIDDEN // N_HEADS
INTERMEDIATE = 64
N_LAYERS = 2
NUM_LABELS = 1          # each sub-model emits one logit -> cat gives 2 features
LN_EPS = 1e-12          # HF BERT layer_norm_eps

# Fixed problem sizes for this script.
B = 2                   # batch
S = 8                   # sequence length (power of two -> shift for batch mask)
M = B * S               # rows per tower
M2 = 2 * M              # rows of the fused two-tower activation slab

# Lane-padded sizes (both towers live block-diagonally inside one 128-lane slab).
HP = 128                # padded hidden (lane width); tower0 lanes [0,32), tower1 [32,64)
IP = 128                # padded intermediate; tower0 [0,64), tower1 [64,128)
BP = 8                  # padded pooled rows (2*B real rows)
S_SHIFT = S.bit_length() - 1
assert S & (S - 1) == 0, "S must be a power of two for the shift-based batch mask"


# --------------------------- Pallas kernel ----------------------------------
def _dual_encoder_kernel(emb_ref, eg_ref, eb_ref,
                         wqkv_ref, bqkv_ref, wo_ref, bo_ref,
                         ln1g_ref, ln1b_ref,
                         w1_ref, b1_ref, w2_ref, b2_ref,
                         ln2g_ref, ln2b_ref,
                         wp_ref, bp_ref, wc_ref, bc_ref,
                         logits_ref):
    """Both BERT towers (all layers + pooler + classifier) in one invocation.

    The activation slab is (M2, HP) f32.  Tower 0 rows [0, M) hold real data in
    lanes [0, HIDDEN); tower 1 rows [M, 2M) in lanes [HIDDEN, 2*HIDDEN).  All
    other lanes are kept exactly zero (block-diagonal weights, per-row bias /
    LayerNorm-parameter slabs), so results match the unfused model.
    """
    lane = jax.lax.broadcasted_iota(jnp.int32, (M2, HP), 1)
    ri = jax.lax.broadcasted_iota(jnp.int32, (M2, M2), 0)
    ci = jax.lax.broadcasted_iota(jnp.int32, (M2, M2), 1)
    # Block-diagonal attention bias: rows may only attend within their own
    # (tower, batch) block of S rows.  Hoisted out of the per-head loop.
    # TODO(synk): attention_mask assumed all-ones (no padding masks applied).
    mask_bias = jnp.where((ri >> S_SHIFT) == (ci >> S_SHIFT), 0.0, -1e30)
    # Per-head lane selectors: head hd owns lanes hd*8..hd*8+8 of EACH tower's
    # 32-lane strip (lanes >= 64 are always zero anyway).
    head_masks = [(((lane >> 3) & (N_HEADS - 1)) == hd) & (lane < 2 * HIDDEN)
                  for hd in range(N_HEADS)]

    def layer_norm(x, g, b):
        # Padded / wrong-tower lanes of x are exactly zero, so summing over all
        # 128 lanes equals summing over the HIDDEN real lanes (torch-style
        # biased variance).  g/b are zero outside each row's real lanes, so the
        # zero-lane invariant is preserved without any select.
        mean = jnp.sum(x, axis=-1, keepdims=True) * (1.0 / HIDDEN)
        var = jnp.sum(x * x, axis=-1, keepdims=True) * (1.0 / HIDDEN) - mean * mean
        return (x - mean) * jax.lax.rsqrt(var + LN_EPS) * g + b

    # Embedding LayerNorm (no residual).
    h = layer_norm(emb_ref[...], eg_ref[...], eb_ref[...])

    for li in range(N_LAYERS):
        # ---- self-attention: one fused QKV matmul serves both towers & all heads
        qkv = jnp.dot(h.astype(jnp.bfloat16), wqkv_ref[li],
                      preferred_element_type=jnp.float32) + bqkv_ref[li]
        q = qkv[:, 0:HP]          # 1/sqrt(head_dim) already folded into W_q/b_q
        k = qkv[:, HP:2 * HP]
        v = qkv[:, 2 * HP:3 * HP]
        ctx = jnp.zeros((M2, HP), jnp.float32)
        for hd in range(N_HEADS):
            hm = head_masks[hd]
            qh = jnp.where(hm, q, 0.0)
            sc = jax.lax.dot_general(qh, k, (((1,), (1,)), ((), ())),
                                     preferred_element_type=jnp.float32)
            sc = sc + mask_bias
            mx = jnp.max(sc, axis=-1, keepdims=True)
            p = jnp.exp(sc - mx)
            p = p * pl.reciprocal(jnp.sum(p, axis=-1, keepdims=True), approx=True)
            vh = jnp.where(hm, v, 0.0)
            ctx = ctx + jnp.dot(p, vh, preferred_element_type=jnp.float32)
        attn = jnp.dot(ctx.astype(jnp.bfloat16), wo_ref[li],
                       preferred_element_type=jnp.float32) + bo_ref[li]
        h = layer_norm(attn + h, ln1g_ref[li], ln1b_ref[li])

        # ---- feed-forward (both towers' intermediates side by side in 128 lanes)
        ff = jnp.dot(h.astype(jnp.bfloat16), w1_ref[li],
                     preferred_element_type=jnp.float32) + b1_ref[li]
        # TODO(synk): HF BERT default is exact erf-gelu; tanh approximation used.
        ff = jax.nn.gelu(ff, approximate=True)
        ff = jnp.dot(ff.astype(jnp.bfloat16), w2_ref[li],
                     preferred_element_type=jnp.float32) + b2_ref[li]
        h = layer_norm(ff + h, ln2g_ref[li], ln2b_ref[li])

    # ---- pooler (CLS token of every (tower, batch)) + classifier epilogue
    row = jax.lax.broadcasted_iota(jnp.int32, (BP, M2), 0)
    col = jax.lax.broadcasted_iota(jnp.int32, (BP, M2), 1)
    sel = jnp.where((col == row * S) & (row < 2 * B), 1.0, 0.0)       # (BP, M2)
    pooled_in = jnp.dot(sel, h, preferred_element_type=jnp.float32)   # (BP, HP)
    pooled = jnp.tanh(jnp.dot(pooled_in.astype(jnp.bfloat16), wp_ref[...],
                              preferred_element_type=jnp.float32) + bp_ref[...])
    logits_ref[...] = jnp.dot(pooled.astype(jnp.bfloat16), wc_ref[...],
                              preferred_element_type=jnp.float32) + bc_ref[...]


def fused_dual_encoder(emb, pk):
    """emb: (M2, HP) fused embedding slab.  Returns (BP, HP); real logits live
    at rows [0, B) (qnli) and [B, 2B) (sts), lane 0."""
    vmem = pl.BlockSpec(memory_space=pltpu.MemorySpace.VMEM)
    args = (emb, pk["emb_ln_g"], pk["emb_ln_b"],
            pk["wqkv"], pk["bqkv"], pk["wo"], pk["bo"],
            pk["ln1_g"], pk["ln1_b"], pk["w1"], pk["b1"],
            pk["w2"], pk["b2"], pk["ln2_g"], pk["ln2_b"],
            pk["wp"], pk["bp"], pk["wc"], pk["bc"])
    return pl.pallas_call(
        _dual_encoder_kernel,
        out_shape=jax.ShapeDtypeStruct((BP, HP), jnp.float32),
        in_specs=[vmem] * len(args),
        out_specs=vmem,
    )(*args)


# -------------------------- synthetic BERT params ---------------------------
def init_bert_params(key):
    def w(k, shape):
        return jax.random.normal(k, shape, jnp.float32) * 0.02

    keys = jax.random.split(key, 6 + N_LAYERS)
    params = {
        "word_emb": w(keys[0], (VOCAB, HIDDEN)),
        "pos_emb": w(keys[1], (MAX_POS, HIDDEN)),
        "type_emb": w(keys[2], (TYPE_VOCAB, HIDDEN)),
        "emb_ln_g": jnp.ones((HIDDEN,), jnp.float32),
        "emb_ln_b": jnp.zeros((HIDDEN,), jnp.float32),
        "wp": w(keys[3], (HIDDEN, HIDDEN)),
        "bp": jnp.zeros((HIDDEN,), jnp.float32),
        "wc": w(keys[4], (HIDDEN, NUM_LABELS)),
        "bc": jnp.zeros((NUM_LABELS,), jnp.float32),
        "layers": [],
    }
    for li in range(N_LAYERS):
        lk = jax.random.split(keys[6 + li], 6)
        params["layers"].append({
            "wq": w(lk[0], (HIDDEN, HIDDEN)), "bq": jnp.zeros((HIDDEN,), jnp.float32),
            "wk": w(lk[1], (HIDDEN, HIDDEN)), "bk": jnp.zeros((HIDDEN,), jnp.float32),
            "wv": w(lk[2], (HIDDEN, HIDDEN)), "bv": jnp.zeros((HIDDEN,), jnp.float32),
            "wo": w(lk[3], (HIDDEN, HIDDEN)), "bo": jnp.zeros((HIDDEN,), jnp.float32),
            "ln1_g": jnp.ones((HIDDEN,), jnp.float32), "ln1_b": jnp.zeros((HIDDEN,), jnp.float32),
            "w1": w(lk[4], (HIDDEN, INTERMEDIATE)), "b1": jnp.zeros((INTERMEDIATE,), jnp.float32),
            "w2": w(lk[5], (INTERMEDIATE, HIDDEN)), "b2": jnp.zeros((HIDDEN,), jnp.float32),
            "ln2_g": jnp.ones((HIDDEN,), jnp.float32), "ln2_b": jnp.zeros((HIDDEN,), jnp.float32),
        })
    return params


# ----- weight packing: block-diagonal two-tower fusion, bf16 matmul weights -----
def pack_dual(p0, p1):
    """Tower 0 (qnli) occupies lanes/rows [0, H); tower 1 (sts) occupies
    [H, 2H) of every padded slab, so one weight push serves both towers."""
    scale = 1.0 / (HEAD_DIM ** 0.5)

    def fuse_w(w0, w1, out_shape):
        # Block-diagonal weight: w0 at [0:r,0:c], w1 at [r:2r,c:2c]; bf16.
        r, c = w0.shape
        out = jnp.zeros(out_shape, jnp.float32)
        out = out.at[0:r, 0:c].set(w0)
        out = out.at[r:2 * r, c:2 * c].set(w1)
        return out.astype(jnp.bfloat16)

    def fuse_rows(v0, v1, rows_each, total_rows, out_cols):
        # Per-row bias / LN-param slab: tower0 rows get v0 in lanes [0,c),
        # tower1 rows get v1 in lanes [c,2c); everything else exactly zero.
        c = v0.shape[0]
        out = jnp.zeros((total_rows, out_cols), jnp.float32)
        out = out.at[0:rows_each, 0:c].set(jnp.broadcast_to(v0, (rows_each, c)))
        out = out.at[rows_each:2 * rows_each, c:2 * c].set(
            jnp.broadcast_to(v1, (rows_each, c)))
        return out

    wqkv, bqkv, wo, bo = [], [], [], []
    ln1g, ln1b, w1, b1, w2, b2, ln2g, ln2b = ([] for _ in range(8))
    for a, c in zip(p0["layers"], p1["layers"]):
        # Fold the 1/sqrt(head_dim) score scale into Q weights and bias.
        wqkv.append(jnp.concatenate(
            [fuse_w(a["wq"] * scale, c["wq"] * scale, (HP, HP)),
             fuse_w(a["wk"], c["wk"], (HP, HP)),
             fuse_w(a["wv"], c["wv"], (HP, HP))], axis=1))           # (HP, 3*HP) bf16
        bqkv.append(jnp.concatenate(
            [fuse_rows(a["bq"] * scale, c["bq"] * scale, M, M2, HP),
             fuse_rows(a["bk"], c["bk"], M, M2, HP),
             fuse_rows(a["bv"], c["bv"], M, M2, HP)], axis=1))       # (M2, 3*HP) f32
        wo.append(fuse_w(a["wo"], c["wo"], (HP, HP)))
        bo.append(fuse_rows(a["bo"], c["bo"], M, M2, HP))
        ln1g.append(fuse_rows(a["ln1_g"], c["ln1_g"], M, M2, HP))
        ln1b.append(fuse_rows(a["ln1_b"], c["ln1_b"], M, M2, HP))
        w1.append(fuse_w(a["w1"], c["w1"], (HP, IP)))
        b1.append(fuse_rows(a["b1"], c["b1"], M, M2, IP))
        w2.append(fuse_w(a["w2"], c["w2"], (IP, HP)))
        b2.append(fuse_rows(a["b2"], c["b2"], M, M2, HP))
        ln2g.append(fuse_rows(a["ln2_g"], c["ln2_g"], M, M2, HP))
        ln2b.append(fuse_rows(a["ln2_b"], c["ln2_b"], M, M2, HP))

    # Classifier: both towers' single-logit columns map to lane 0 (their pooled
    # inputs have disjoint lane support, so there is no cross-talk).
    wc = jnp.zeros((HP, HP), jnp.float32)
    wc = wc.at[0:HIDDEN, 0:NUM_LABELS].set(p0["wc"])
    wc = wc.at[HIDDEN:2 * HIDDEN, 0:NUM_LABELS].set(p1["wc"])
    bc = jnp.zeros((BP, HP), jnp.float32)
    bc = bc.at[0:B, 0].set(p0["bc"][0])
    bc = bc.at[B:2 * B, 0].set(p1["bc"][0])

    return {
        "word_emb": jnp.stack([p0["word_emb"], p1["word_emb"]]),
        "pos_emb": jnp.stack([p0["pos_emb"], p1["pos_emb"]]),
        "type_emb": jnp.stack([p0["type_emb"], p1["type_emb"]]),
        "emb_ln_g": fuse_rows(p0["emb_ln_g"], p1["emb_ln_g"], M, M2, HP),
        "emb_ln_b": fuse_rows(p0["emb_ln_b"], p1["emb_ln_b"], M, M2, HP),
        "wqkv": jnp.stack(wqkv), "bqkv": jnp.stack(bqkv),
        "wo": jnp.stack(wo), "bo": jnp.stack(bo),
        "ln1_g": jnp.stack(ln1g), "ln1_b": jnp.stack(ln1b),
        "w1": jnp.stack(w1), "b1": jnp.stack(b1),
        "w2": jnp.stack(w2), "b2": jnp.stack(b2),
        "ln2_g": jnp.stack(ln2g), "ln2_b": jnp.stack(ln2b),
        "wp": fuse_w(p0["wp"], p1["wp"], (HP, HP)),
        "bp": fuse_rows(p0["bp"], p1["bp"], B, BP, HP),
        "wc": wc.astype(jnp.bfloat16),
        "bc": bc,
    }


# ------------------------------- DualBERT -----------------------------------
@jax.jit
def dual_bert_forward(packed, w_last, b_last, q_ids, q_tt, r_ids, r_tt):
    # Embedding gathers stay in plain JAX (glue).
    def embed(t, ids, tt):
        e = (packed["word_emb"][t][ids]
             + packed["pos_emb"][t][jnp.arange(S)][None, :, :]
             + packed["type_emb"][t][tt])
        return e.reshape(M, HIDDEN)

    e_qnli = embed(0, q_ids, q_tt)      # tower 0: qnli on question+student answer
    e_sts = embed(1, r_ids, r_tt)       # tower 1: sts on reference+student answer
    emb = jnp.zeros((M2, HP), jnp.float32)
    emb = emb.at[0:M, 0:HIDDEN].set(e_qnli)
    emb = emb.at[M:M2, HIDDEN:2 * HIDDEN].set(e_sts)

    logits = fused_dual_encoder(emb, packed)        # (BP, HP)
    qnli = logits[0:B, 0:1]                         # (B, 1)
    sts = logits[B:2 * B, 0:1]                      # (B, 1)
    # prediction = Linear(2,1)( relu( cat(qnli, sts, dim=1) ) )  — trivial, plain JAX.
    feats = jax.nn.relu(jnp.concatenate([qnli, sts], axis=1))   # (B, 2)
    return feats @ w_last + b_last                  # (B, 1)


if __name__ == "__main__":
    key = jax.random.PRNGKey(0)
    k_qnli, k_sts, k_last, k_in1, k_in2 = jax.random.split(key, 5)

    qnli_params = init_bert_params(k_qnli)
    sts_params = init_bert_params(k_sts)
    packed = pack_dual(qnli_params, sts_params)

    w_last = jax.random.normal(k_last, (2, 1), jnp.float32) * 0.5  # Linear(2,1).weight.T
    b_last = jnp.zeros((1,), jnp.float32)                          # Linear(2,1).bias

    # "question + student answer" and "reference answer + student answer" features
    qsa_ids = jax.random.randint(k_in1, (B, S), 0, VOCAB, dtype=jnp.int32)
    rsa_ids = jax.random.randint(k_in2, (B, S), 0, VOCAB, dtype=jnp.int32)
    token_type = jnp.concatenate(
        [jnp.zeros((B, S // 2), jnp.int32), jnp.ones((B, S // 2), jnp.int32)], axis=1)

    pred = dual_bert_forward(packed, w_last, b_last,
                             qsa_ids, token_type, rsa_ids, token_type)
    jax.block_until_ready(pred)
    assert pred.shape == (B, 1) and pred.dtype == jnp.float32
    assert bool(jnp.all(jnp.isfinite(pred)))
    print("KERNEL_OK")
</pallas_src>

<mosaic_0001>
module attributes {stable_mosaic.version = 11 : i64} {
  func.func @_dual_encoder_kernel(%arg0: memref<32x128xf32, #tpu.memory_space<vmem>>, %arg1: memref<32x128xf32, #tpu.memory_space<vmem>>, %arg2: memref<32x128xf32, #tpu.memory_space<vmem>>, %arg3: memref<2x128x384xbf16, #tpu.memory_space<vmem>>, %arg4: memref<2x32x384xf32, #tpu.memory_space<vmem>>, %arg5: memref<2x128x128xbf16, #tpu.memory_space<vmem>>, %arg6: memref<2x32x128xf32, #tpu.memory_space<vmem>>, %arg7: memref<2x32x128xf32, #tpu.memory_space<vmem>>, %arg8: memref<2x32x128xf32, #tpu.memory_space<vmem>>, %arg9: memref<2x128x128xbf16, #tpu.memory_space<vmem>>, %arg10: memref<2x32x128xf32, #tpu.memory_space<vmem>>, %arg11: memref<2x128x128xbf16, #tpu.memory_space<vmem>>, %arg12: memref<2x32x128xf32, #tpu.memory_space<vmem>>, %arg13: memref<2x32x128xf32, #tpu.memory_space<vmem>>, %arg14: memref<2x32x128xf32, #tpu.memory_space<vmem>>, %arg15: memref<128x128xbf16, #tpu.memory_space<vmem>>, %arg16: memref<8x128xf32, #tpu.memory_space<vmem>>, %arg17: memref<128x128xbf16, #tpu.memory_space<vmem>>, %arg18: memref<8x128xf32, #tpu.memory_space<vmem>>, %arg19: memref<8x128xf32, #tpu.memory_space<vmem>>) attributes {dimension_semantics = [], scalar_prefetch = 0 : i64, scratch_operands = 0 : i64, tpu.core_type = #tpu.core_type<tc>} {
    %0 = tpu.iota {dimensions = array<i32: 1>} : vector<32x128xi32>
    %1 = tpu.iota {dimensions = array<i32: 0>} : vector<32x32xi32>
    %2 = tpu.iota {dimensions = array<i32: 1>} : vector<32x32xi32>
    %c3_i32 = arith.constant 3 : i32
    %3 = vector.broadcast %c3_i32 : i32 to vector<32x32xi32>
    %4 = arith.shrsi %1, %3 : vector<32x32xi32>
    %c3_i32_0 = arith.constant 3 : i32
    %5 = vector.broadcast %c3_i32_0 : i32 to vector<32x32xi32>
    %6 = arith.shrsi %2, %5 : vector<32x32xi32>
    %7 = arith.cmpi eq, %4, %6 : vector<32x32xi32>
    %cst = arith.constant 0.000000e+00 : f32
    %cst_1 = arith.constant -1.000000e+30 : f32
    %8 = vector.broadcast %cst : f32 to vector<32x32xf32>
    %9 = vector.broadcast %cst_1 : f32 to vector<32x32xf32>
    %10 = arith.select %7, %8, %9 : vector<32x32xi1>, vector<32x32xf32>
    %c3_i32_2 = arith.constant 3 : i32
    %11 = vector.broadcast %c3_i32_2 : i32 to vector<32x128xi32>
    %12 = arith.shrsi %0, %11 : vector<32x128xi32>
    %c3_i32_3 = arith.constant 3 : i32
    %13 = vector.broadcast %c3_i32_3 : i32 to vector<32x128xi32>
    %14 = arith.andi %12, %13 : vector<32x128xi32>
    %c0_i32 = arith.constant 0 : i32
    %15 = vector.broadcast %c0_i32 : i32 to vector<32x128xi32>
    %16 = arith.cmpi eq, %14, %15 : vector<32x128xi32>
    %c64_i32 = arith.constant 64 : i32
    %17 = vector.broadcast %c64_i32 : i32 to vector<32x128xi32>
    %18 = arith.cmpi slt, %0, %17 : vector<32x128xi32>
    %19 = arith.andi %16, %18 : vector<32x128xi1>
    %c3_i32_4 = arith.constant 3 : i32
    %20 = vector.broadcast %c3_i32_4 : i32 to vector<32x128xi32>
    %21 = arith.shrsi %0, %20 : vector<32x128xi32>
    %c3_i32_5 = arith.constant 3 : i32
    %22 = vector.broadcast %c3_i32_5 : i32 to vector<32x128xi32>
    %23 = arith.andi %21, %22 : vector<32x128xi32>
    %c1_i32 = arith.constant 1 : i32
    %24 = vector.broadcast %c1_i32 : i32 to vector<32x128xi32>
    %25 = arith.cmpi eq, %23, %24 : vector<32x128xi32>
    %c64_i32_6 = arith.constant 64 : i32
    %26 = vector.broadcast %c64_i32_6 : i32 to vector<32x128xi32>
    %27 = arith.cmpi slt, %0, %26 : vector<32x128xi32>
    %28 = arith.andi %25, %27 : vector<32x128xi1>
    %c3_i32_7 = arith.constant 3 : i32
    %29 = vector.broadcast %c3_i32_7 : i32 to vector<32x128xi32>
    %30 = arith.shrsi %0, %29 : vector<32x128xi32>
    %c3_i32_8 = arith.constant 3 : i32
    %31 = vector.broadcast %c3_i32_8 : i32 to vector<32x128xi32>
    %32 = arith.andi %30, %31 : vector<32x128xi32>
    %c2_i32 = arith.constant 2 : i32
    %33 = vector.broadcast %c2_i32 : i32 to vector<32x128xi32>
    %34 = arith.cmpi eq, %32, %33 : vector<32x128xi32>
    %c64_i32_9 = arith.constant 64 : i32
    %35 = vector.broadcast %c64_i32_9 : i32 to vector<32x128xi32>
    %36 = arith.cmpi slt, %0, %35 : vector<32x128xi32>
    %37 = arith.andi %34, %36 : vector<32x128xi1>
    %c3_i32_10 = arith.constant 3 : i32
    %38 = vector.broadcast %c3_i32_10 : i32 to vector<32x128xi32>
    %39 = arith.shrsi %0, %38 : vector<32x128xi32>
    %c3_i32_11 = arith.constant 3 : i32
    %40 = vector.broadcast %c3_i32_11 : i32 to vector<32x128xi32>
    %41 = arith.andi %39, %40 : vector<32x128xi32>
    %c3_i32_12 = arith.constant 3 : i32
    %42 = vector.broadcast %c3_i32_12 : i32 to vector<32x128xi32>
    %43 = arith.cmpi eq, %41, %42 : vector<32x128xi32>
    %c64_i32_13 = arith.constant 64 : i32
    %44 = vector.broadcast %c64_i32_13 : i32 to vector<32x128xi32>
    %45 = arith.cmpi slt, %0, %44 : vector<32x128xi32>
    %46 = arith.andi %43, %45 : vector<32x128xi1>
    %c0 = arith.constant 0 : index
    %c0_14 = arith.constant 0 : index
    %47 = vector.load %arg0[%c0, %c0_14] : memref<32x128xf32, #tpu.memory_space<vmem>>, vector<32x128xf32>
    %c0_15 = arith.constant 0 : index
    %c0_16 = arith.constant 0 : index
    %48 = vector.load %arg1[%c0_15, %c0_16] : memref<32x128xf32, #tpu.memory_space<vmem>>, vector<32x128xf32>
    %c0_17 = arith.constant 0 : index
    %c0_18 = arith.constant 0 : index
    %49 = vector.load %arg2[%c0_17, %c0_18] : memref<32x128xf32, #tpu.memory_space<vmem>>, vector<32x128xf32>
    %cst_19 = arith.constant dense<0.000000e+00> : vector<32xf32>
    %50 = vector.multi_reduction <add>, %47, %cst_19 [1] : vector<32x128xf32> to vector<32xf32>
    %51 = vector.shape_cast %50 : vector<32xf32> to vector<32x1xf32>
    %cst_20 = arith.constant 3.125000e-02 : f32
    %52 = vector.broadcast %cst_20 : f32 to vector<32x1xf32>
    %53 = arith.mulf %51, %52 : vector<32x1xf32>
    %54 = arith.mulf %47, %47 : vector<32x128xf32>
    %cst_21 = arith.constant dense<0.000000e+00> : vector<32xf32>
    %55 = vector.multi_reduction <add>, %54, %cst_21 [1] : vector<32x128xf32> to vector<32xf32>
    %56 = vector.shape_cast %55 : vector<32xf32> to vector<32x1xf32>
    %cst_22 = arith.constant 3.125000e-02 : f32
    %57 = vector.broadcast %cst_22 : f32 to vector<32x1xf32>
    %58 = arith.mulf %56, %57 : vector<32x1xf32>
    %59 = arith.mulf %53, %53 : vector<32x1xf32>
    %60 = arith.subf %58, %59 : vector<32x1xf32>
    %61 = vector.broadcast %53 : vector<32x1xf32> to vector<32x128xf32>
    %62 = arith.subf %47, %61 : vector<32x128xf32>
    %cst_23 = arith.constant 9.99999996E-13 : f32
    %63 = vector.broadcast %cst_23 : f32 to vector<32x1xf32>
    %64 = arith.addf %60, %63 : vector<32x1xf32>
    %65 = math.rsqrt %64 : vector<32x1xf32>
    %66 = vector.broadcast %65 : vector<32x1xf32> to vector<32x128xf32>
    %67 = arith.mulf %62, %66 : vector<32x128xf32>
    %68 = arith.mulf %67, %48 : vector<32x128xf32>
    %69 = arith.addf %68, %49 : vector<32x128xf32>
    %70 = arith.truncf %69 : vector<32x128xf32> to vector<32x128xbf16>
    %c0_24 = arith.constant 0 : index
    %c0_25 = arith.constant 0 : index
    %c0_26 = arith.constant 0 : index
    %71 = vector.load %arg3[%c0_24, %c0_25, %c0_26] : memref<2x128x384xbf16, #tpu.memory_space<vmem>>, vector<1x128x384xbf16>
    %72 = vector.shape_cast %71 : vector<1x128x384xbf16> to vector<128x384xbf16>
    %cst_27 = arith.constant dense<0.000000e+00> : vector<32x384xf32>
    %73 = tpu.matmul %70, %72, %cst_27 {dimension_numbers = #tpu.dot_dimension_numbers<[1], [0], [0], [1], [0, 0, 1, 1], [], []>} : vector<32x128xbf16>, vector<128x384xbf16>, vector<32x384xf32> -> vector<32x384xf32>
    %c0_28 = arith.constant 0 : index
    %c0_29 = arith.constant 0 : index
    %c0_30 = arith.constant 0 : index
    %74 = vector.load %arg4[%c0_28, %c0_29, %c0_30] : memref<2x32x384xf32, #tpu.memory_space<vmem>>, vector<1x32x384xf32>
    %75 = vector.shape_cast %74 : vector<1x32x384xf32> to vector<32x384xf32>
    %76 = arith.addf %73, %75 : vector<32x384xf32>
    %77 = vector.extract_strided_slice %76 {offsets = [0, 0], sizes = [32, 128], strides = [1, 1]} : vector<32x384xf32> to vector<32x128xf32>
    %78 = vector.extract_strided_slice %76 {offsets = [0, 128], sizes = [32, 128], strides = [1, 1]} : vector<32x384xf32> to vector<32x128xf32>
    %79 = vector.extract_strided_slice %76 {offsets = [0, 256], sizes = [32, 128], strides = [1, 1]} : vector<32x384xf32> to vector<32x128xf32>
    %cst_31 = arith.constant 0.000000e+00 : f32
    %80 = vector.broadcast %cst_31 : f32 to vector<32x128xf32>
    %cst_32 = arith.constant 0.000000e+00 : f32
    %81 = vector.broadcast %cst_32 : f32 to vector<32x128xf32>
    %82 = arith.select %19, %77, %81 : vector<32x128xi1>, vector<32x128xf32>
    %cst_33 = arith.constant dense<0.000000e+00> : vector<32x32xf32>
    %83 = tpu.matmul %82, %78, %cst_33 {dimension_numbers = #tpu.dot_dimension_numbers<[1], [1], [0], [0], [0, 0, 1, 0], [], []>} : vector<32x128xf32>, vector<32x128xf32>, vector<32x32xf32> -> vector<32x32xf32>
    %84 = arith.addf %83, %10 : vector<32x32xf32>
    %cst_34 = arith.constant dense<0xFF800000> : vector<32xf32>
    %85 = vector.multi_reduction <maximumf>, %84, %cst_34 [1] : vector<32x32xf32> to vector<32xf32>
    %86 = vector.shape_cast %85 : vector<32xf32> to vector<32x1xf32>
    %87 = vector.broadcast %86 : vector<32x1xf32> to vector<32x32xf32>
    %88 = arith.subf %84, %87 : vector<32x32xf32>
    %89 = math.exp %88 : vector<32x32xf32>
    %cst_35 = arith.constant dense<0.000000e+00> : vector<32xf32>
    %90 = vector.multi_reduction <add>, %89, %cst_35 [1] : vector<32x32xf32> to vector<32xf32>
    %91 = vector.shape_cast %90 : vector<32xf32> to vector<32x1xf32>
    %92 = tpu.reciprocal %91 {approx = true} : vector<32x1xf32> -> vector<32x1xf32>
    %93 = vector.broadcast %92 : vector<32x1xf32> to vector<32x32xf32>
    %94 = arith.mulf %89, %93 : vector<32x32xf32>
    %cst_36 = arith.constant 0.000000e+00 : f32
    %95 = vector.broadcast %cst_36 : f32 to vector<32x128xf32>
    %96 = arith.select %19, %79, %95 : vector<32x128xi1>, vector<32x128xf32>
    %cst_37 = arith.constant dense<0.000000e+00> : vector<32x128xf32>
    %97 = tpu.matmul %94, %96, %cst_37 {dimension_numbers = #tpu.dot_dimension_numbers<[1], [0], [0], [1], [0, 0, 1, 1], [], []>} : vector<32x32xf32>, vector<32x128xf32>, vector<32x128xf32> -> vector<32x128xf32>
    %98 = arith.addf %80, %97 : vector<32x128xf32>
    %cst_38 = arith.constant 0.000000e+00 : f32
    %99 = vector.broadcast %cst_38 : f32 to vector<32x128xf32>
    %100 = arith.select %28, %77, %99 : vector<32x128xi1>, vector<32x128xf32>
    %cst_39 = arith.constant dense<0.000000e+00> : vector<32x32xf32>
    %101 = tpu.matmul %100, %78, %cst_39 {dimension_numbers = #tpu.dot_dimension_numbers<[1], [1], [0], [0], [0, 0, 1, 0], [], []>} : vector<32x128xf32>, vector<32x128xf32>, vector<32x32xf32> -> vector<32x32xf32>
    %102 = arith.addf %101, %10 : vector<32x32xf32>
    %cst_40 = arith.constant dense<0xFF800000> : vector<32xf32>
    %103 = vector.multi_reduction <maximumf>, %102, %cst_40 [1] : vector<32x32xf32> to vector<32xf32>
    %104 = vector.shape_cast %103 : vector<32xf32> to vector<32x1xf32>
    %105 = vector.broadcast %104 : vector<32x1xf32> to vector<32x32xf32>
    %106 = arith.subf %102, %105 : vector<32x32xf32>
    %107 = math.exp %106 : vector<32x32xf32>
    %cst_41 = arith.constant dense<0.000000e+00> : vector<32xf32>
    %108 = vector.multi_reduction <add>, %107, %cst_41 [1] : vector<32x32xf32> to vector<32xf32>
    %109 = vector.shape_cast %108 : vector<32xf32> to vector<32x1xf32>
    %110 = tpu.reciprocal %109 {approx = true} : vector<32x1xf32> -> vector<32x1xf32>
    %111 = vector.broadcast %110 : vector<32x1xf32> to vector<32x32xf32>
    %112 = arith.mulf %107, %111 : vector<32x32xf32>
    %cst_42 = arith.constant 0.000000e+00 : f32
    %113 = vector.broadcast %cst_42 : f32 to vector<32x128xf32>
    %114 = arith.select %28, %79, %113 : vector<32x128xi1>, vector<32x128xf32>
    %cst_43 = arith.constant dense<0.000000e+00> : vector<32x128xf32>
    %115 = tpu.matmul %112, %114, %cst_43 {dimension_numbers = #tpu.dot_dimension_numbers<[1], [0], [0], [1], [0, 0, 1, 1], [], []>} : vector<32x32xf32>, vector<32x128xf32>, vector<32x128xf32> -> vector<32x128xf32>
    %116 = arith.addf %98, %115 : vector<32x128xf32>
    %cst_44 = arith.constant 0.000000e+00 : f32
    %117 = vector.broadcast %cst_44 : f32 to vector<32x128xf32>
    %118 = arith.select %37, %77, %117 : vector<32x128xi1>, vector<32x128xf32>
    %cst_45 = arith.constant dense<0.000000e+00> : vector<32x32xf32>
    %119 = tpu.matmul %118, %78, %cst_45 {dimension_numbers = #tpu.dot_dimension_numbers<[1], [1], [0], [0], [0, 0, 1, 0], [], []>} : vector<32x128xf32>, vector<32x128xf32>, vector<32x32xf32> -> vector<32x32xf32>
    %120 = arith.addf %119, %10 : vector<32x32xf32>
    %cst_46 = arith.constant dense<0xFF800000> : vector<32xf32>
    %121 = vector.multi_reduction <maximumf>, %120, %cst_46 [1] : vector<32x32xf32> to vector<32xf32>
    %122 = vector.shape_cast %121 : vector<32xf32> to vector<32x1xf32>
    %123 = vector.broadcast %122 : vector<32x1xf32> to vector<32x32xf32>
    %124 = arith.subf %120, %123 : vector<32x32xf32>
    %125 = math.exp %124 : vector<32x32xf32>
    %cst_47 = arith.constant dense<0.000000e+00> : vector<32xf32>
    %126 = vector.multi_reduction <add>, %125, %cst_47 [1] : vector<32x32xf32> to vector<32xf32>
    %127 = vector.shape_cast %126 : vector<32xf32> to vector<32x1xf32>
    %128 = tpu.reciprocal %127 {approx = true} : vector<32x1xf32> -> vector<32x1xf32>
    %129 = vector.broadcast %128 : vector<32x1xf32> to vector<32x32xf32>
    %130 = arith.mulf %125, %129 : vector<32x32xf32>
    %cst_48 = arith.constant 0.000000e+00 : f32
    %131 = vector.broadcast %cst_48 : f32 to vector<32x128xf32>
    %132 = arith.select %37, %79, %131 : vector<32x128xi1>, vector<32x128xf32>
    %cst_49 = arith.constant dense<0.000000e+00> : vector<32x128xf32>
    %133 = tpu.matmul %130, %132, %cst_49 {dimension_numbers = #tpu.dot_dimension_numbers<[1], [0], [0], [1], [0, 0, 1, 1], [], []>} : vector<32x32xf32>, vector<32x128xf32>, vector<32x128xf32> -> vector<32x128xf32>
    %134 = arith.addf %116, %133 : vector<32x128xf32>
    %cst_50 = arith.constant 0.000000e+00 : f32
    %135 = vector.broadcast %cst_50 : f32 to vector<32x128xf32>
    %136 = arith.select %46, %77, %135 : vector<32x128xi1>, vector<32x128xf32>
    %cst_51 = arith.constant dense<0.000000e+00> : vector<32x32xf32>
    %137 = tpu.matmul %136, %78, %cst_51 {dimension_numbers = #tpu.dot_dimension_numbers<[1], [1], [0], [0], [0, 0, 1, 0], [], []>} : vector<32x128xf32>, vector<32x128xf32>, vector<32x32xf32> -> vector<32x32xf32>
    %138 = arith.addf %137, %10 : vector<32x32xf32>
    %cst_52 = arith.constant dense<0xFF800000> : vector<32xf32>
    %139 = vector.multi_reduction <maximumf>, %138, %cst_52 [1] : vector<32x32xf32> to vector<32xf32>
    %140 = vector.shape_cast %139 : vector<32xf32> to vector<32x1xf32>
    %141 = vector.broadcast %140 : vector<32x1xf32> to vector<32x32xf32>
    %142 = arith.subf %138, %141 : vector<32x32xf32>
    %143 = math.exp %142 : vector<32x32xf32>
    %cst_53 = arith.constant dense<0.000000e+00> : vector<32xf32>
    %144 = vector.multi_reduction <add>, %143, %cst_53 [1] : vector<32x32xf32> to vector<32xf32>
    %145 = vector.shape_cast %144 : vector<32xf32> to vector<32x1xf32>
    %146 = tpu.reciprocal %145 {approx = true} : vector<32x1xf32> -> vector<32x1xf32>
    %147 = vector.broadcast %146 : vector<32x1xf32> to vector<32x32xf32>
    %148 = arith.mulf %143, %147 : vector<32x32xf32>
    %cst_54 = arith.constant 0.000000e+00 : f32
    %149 = vector.broadcast %cst_54 : f32 to vector<32x128xf32>
    %150 = arith.select %46, %79, %149 : vector<32x128xi1>, vector<32x128xf32>
    %cst_55 = arith.constant dense<0.000000e+00> : vector<32x128xf32>
    %151 = tpu.matmul %148, %150, %cst_55 {dimension_numbers = #tpu.dot_dimension_numbers<[1], [0], [0], [1], [0, 0, 1, 1], [], []>} : vector<32x32xf32>, vector<32x128xf32>, vector<32x128xf32> -> vector<32x128xf32>
    %152 = arith.addf %134, %151 : vector<32x128xf32>
    %153 = arith.truncf %152 : vector<32x128xf32> to vector<32x128xbf16>
    %c0_56 = arith.constant 0 : index
    %c0_57 = arith.constant 0 : index
    %c0_58 = arith.constant 0 : index
    %154 = vector.load %arg5[%c0_56, %c0_57, %c0_58] : memref<2x128x128xbf16, #tpu.memory_space<vmem>>, vector<1x128x128xbf16>
    %155 = vector.shape_cast %154 : vector<1x128x128xbf16> to vector<128x128xbf16>
    %cst_59 = arith.constant dense<0.000000e+00> : vector<32x128xf32>
    %156 = tpu.matmul %153, %155, %cst_59 {dimension_numbers = #tpu.dot_dimension_numbers<[1], [0], [0], [1], [0, 0, 1, 1], [], []>} : vector<32x128xbf16>, vector<128x128xbf16>, vector<32x128xf32> -> vector<32x128xf32>
    %c0_60 = arith.constant 0 : index
    %c0_61 = arith.constant 0 : index
    %c0_62 = arith.constant 0 : index
    %157 = vector.load %arg6[%c0_60, %c0_61, %c0_62] : memref<2x32x128xf32, #tpu.memory_space<vmem>>, vector<1x32x128xf32>
    %158 = vector.shape_cast %157 : vector<1x32x128xf32> to vector<32x128xf32>
    %159 = arith.addf %156, %158 : vector<32x128xf32>
    %160 = arith.addf %159, %69 : vector<32x128xf32>
    %c0_63 = arith.constant 0 : index
    %c0_64 = arith.constant 0 : index
    %c0_65 = arith.constant 0 : index
    %161 = vector.load %arg7[%c0_63, %c0_64, %c0_65] : memref<2x32x128xf32, #tpu.memory_space<vmem>>, vector<1x32x128xf32>
    %162 = vector.shape_cast %161 : vector<1x32x128xf32> to vector<32x128xf32>
    %c0_66 = arith.constant 0 : index
    %c0_67 = arith.constant 0 : index
    %c0_68 = arith.constant 0 : index
    %163 = vector.load %arg8[%c0_66, %c0_67, %c0_68] : memref<2x32x128xf32, #tpu.memory_space<vmem>>, vector<1x32x128xf32>
    %164 = vector.shape_cast %163 : vector<1x32x128xf32> to vector<32x128xf32>
    %cst_69 = arith.constant dense<0.000000e+00> : vector<32xf32>
    %165 = vector.multi_reduction <add>, %160, %cst_69 [1] : vector<32x128xf32> to vector<32xf32>
    %166 = vector.shape_cast %165 : vector<32xf32> to vector<32x1xf32>
    %cst_70 = arith.constant 3.125000e-02 : f32
    %167 = vector.broadcast %cst_70 : f32 to vector<32x1xf32>
    %168 = arith.mulf %166, %167 : vector<32x1xf32>
    %169 = arith.mulf %160, %160 : vector<32x128xf32>
    %cst_71 = arith.constant dense<0.000000e+00> : vector<32xf32>
    %170 = vector.multi_reduction <add>, %169, %cst_71 [1] : vector<32x128xf32> to vector<32xf32>
    %171 = vector.shape_cast %170 : vector<32xf32> to vector<32x1xf32>
    %cst_72 = arith.constant 3.125000e-02 : f32
    %172 = vector.broadcast %cst_72 : f32 to vector<32x1xf32>
    %173 = arith.mulf %171, %172 : vector<32x1xf32>
    %174 = arith.mulf %168, %168 : vector<32x1xf32>
    %175 = arith.subf %173, %174 : vector<32x1xf32>
    %176 = vector.broadcast %168 : vector<32x1xf32> to vector<32x128xf32>
    %177 = arith.subf %160, %176 : vector<32x128xf32>
    %cst_73 = arith.constant 9.99999996E-13 : f32
    %178 = vector.broadcast %cst_73 : f32 to vector<32x1xf32>
    %179 = arith.addf %175, %178 : vector<32x1xf32>
    %180 = math.rsqrt %179 : vector<32x1xf32>
    %181 = vector.broadcast %180 : vector<32x1xf32> to vector<32x128xf32>
    %182 = arith.mulf %177, %181 : vector<32x128xf32>
    %183 = arith.mulf %182, %162 : vector<32x128xf32>
    %184 = arith.addf %183, %164 : vector<32x128xf32>
    %185 = arith.truncf %184 : vector<32x128xf32> to vector<32x128xbf16>
    %c0_74 = arith.constant 0 : index
    %c0_75 = arith.constant 0 : index
    %c0_76 = arith.constant 0 : index
    %186 = vector.load %arg9[%c0_74, %c0_75, %c0_76] : memref<2x128x128xbf16, #tpu.memory_space<vmem>>, vector<1x128x128xbf16>
    %187 = vector.shape_cast %186 : vector<1x128x128xbf16> to vector<128x128xbf16>
    %cst_77 = arith.constant dense<0.000000e+00> : vector<32x128xf32>
    %188 = tpu.matmul %185, %187, %cst_77 {dimension_numbers = #tpu.dot_dimension_numbers<[1], [0], [0], [1], [0, 0, 1, 1], [], []>} : vector<32x128xbf16>, vector<128x128xbf16>, vector<32x128xf32> -> vector<32x128xf32>
    %c0_78 = arith.constant 0 : index
    %c0_79 = arith.constant 0 : index
    %c0_80 = arith.constant 0 : index
    %189 = vector.load %arg10[%c0_78, %c0_79, %c0_80] : memref<2x32x128xf32, #tpu.memory_space<vmem>>, vector<1x32x128xf32>
    %190 = vector.shape_cast %189 : vector<1x32x128xf32> to vector<32x128xf32>
    %191 = arith.addf %188, %190 : vector<32x128xf32>
    %192 = arith.mulf %191, %191 : vector<32x128xf32>
    %193 = arith.mulf %191, %192 : vector<32x128xf32>
    %cst_81 = arith.constant 4.471500e-02 : f32
    %194 = vector.broadcast %cst_81 : f32 to vector<32x128xf32>
    %195 = arith.mulf %194, %193 : vector<32x128xf32>
    %196 = arith.addf %191, %195 : vector<32x128xf32>
    %cst_82 = arith.constant 0.797884583 : f32
    %197 = vector.broadcast %cst_82 : f32 to vector<32x128xf32>
    %198 = arith.mulf %197, %196 : vector<32x128xf32>
    %199 = math.tanh %198 : vector<32x128xf32>
    %cst_83 = arith.constant 1.000000e+00 : f32
    %200 = vector.broadcast %cst_83 : f32 to vector<32x128xf32>
    %201 = arith.addf %200, %199 : vector<32x128xf32>
    %cst_84 = arith.constant 5.000000e-01 : f32
    %202 = vector.broadcast %cst_84 : f32 to vector<32x128xf32>
    %203 = arith.mulf %202, %201 : vector<32x128xf32>
    %204 = arith.mulf %191, %203 : vector<32x128xf32>
    %205 = arith.truncf %204 : vector<32x128xf32> to vector<32x128xbf16>
    %c0_85 = arith.constant 0 : index
    %c0_86 = arith.constant 0 : index
    %c0_87 = arith.constant 0 : index
    %206 = vector.load %arg11[%c0_85, %c0_86, %c0_87] : memref<2x128x128xbf16, #tpu.memory_space<vmem>>, vector<1x128x128xbf16>
    %207 = vector.shape_cast %206 : vector<1x128x128xbf16> to vector<128x128xbf16>
    %cst_88 = arith.constant dense<0.000000e+00> : vector<32x128xf32>
    %208 = tpu.matmul %205, %207, %cst_88 {dimension_numbers = #tpu.dot_dimension_numbers<[1], [0], [0], [1], [0, 0, 1, 1], [], []>} : vector<32x128xbf16>, vector<128x128xbf16>, vector<32x128xf32> -> vector<32x128xf32>
    %c0_89 = arith.constant 0 : index
    %c0_90 = arith.constant 0 : index
    %c0_91 = arith.constant 0 : index
    %209 = vector.load %arg12[%c0_89, %c0_90, %c0_91] : memref<2x32x128xf32, #tpu.memory_space<vmem>>, vector<1x32x128xf32>
    %210 = vector.shape_cast %209 : vector<1x32x128xf32> to vector<32x128xf32>
    %211 = arith.addf %208, %210 : vector<32x128xf32>
    %212 = arith.addf %211, %184 : vector<32x128xf32>
    %c0_92 = arith.constant 0 : index
    %c0_93 = arith.constant 0 : index
    %c0_94 = arith.constant 0 : index
    %213 = vector.load %arg13[%c0_92, %c0_93, %c0_94] : memref<2x32x128xf32, #tpu.memory_space<vmem>>, vector<1x32x128xf32>
    %214 = vector.shape_cast %213 : vector<1x32x128xf32> to vector<32x128xf32>
    %c0_95 = arith.constant 0 : index
    %c0_96 = arith.constant 0 : index
    %c0_97 = arith.constant 0 : index
    %215 = vector.load %arg14[%c0_95, %c0_96, %c0_97] : memref<2x32x128xf32, #tpu.memory_space<vmem>>, vector<1x32x128xf32>
    %216 = vector.shape_cast %215 : vector<1x32x128xf32> to vector<32x128xf32>
    %cst_98 = arith.constant dense<0.000000e+00> : vector<32xf32>
    %217 = vector.multi_reduction <add>, %212, %cst_98 [1] : vector<32x128xf32> to vector<32xf32>
    %218 = vector.shape_cast %217 : vector<32xf32> to vector<32x1xf32>
    %cst_99 = arith.constant 3.125000e-02 : f32
    %219 = vector.broadcast %cst_99 : f32 to vector<32x1xf32>
    %220 = arith.mulf %218, %219 : vector<32x1xf32>
    %221 = arith.mulf %212, %212 : vector<32x128xf32>
    %cst_100 = arith.constant dense<0.000000e+00> : vector<32xf32>
    %222 = vector.multi_reduction <add>, %221, %cst_100 [1] : vector<32x128xf32> to vector<32xf32>
    %223 = vector.shape_cast %222 : vector<32xf32> to vector<32x1xf32>
    %cst_101 = arith.constant 3.125000e-02 : f32
    %224 = vector.broadcast %cst_101 : f32 to vector<32x1xf32>
    %225 = arith.mulf %223, %224 : vector<32x1xf32>
    %226 = arith.mulf %220, %220 : vector<32x1xf32>
    %227 = arith.subf %225, %226 : vector<32x1xf32>
    %228 = vector.broadcast %220 : vector<32x1xf32> to vector<32x128xf32>
    %229 = arith.subf %212, %228 : vector<32x128xf32>
    %cst_102 = arith.constant 9.99999996E-13 : f32
    %230 = vector.broadcast %cst_102 : f32 to vector<32x1xf32>
    %231 = arith.addf %227, %230 : vector<32x1xf32>
    %232 = math.rsqrt %231 : vector<32x1xf32>
    %233 = vector.broadcast %232 : vector<32x1xf32> to vector<32x128xf32>
    %234 = arith.mulf %229, %233 : vector<32x128xf32>
    %235 = arith.mulf %234, %214 : vector<32x128xf32>
    %236 = arith.addf %235, %216 : vector<32x128xf32>
    %237 = arith.truncf %236 : vector<32x128xf32> to vector<32x128xbf16>
    %c1 = arith.constant 1 : index
    %c0_103 = arith.constant 0 : index
    %c0_104 = arith.constant 0 : index
    %238 = vector.load %arg3[%c1, %c0_103, %c0_104] : memref<2x128x384xbf16, #tpu.memory_space<vmem>>, vector<1x128x384xbf16>
    %239 = vector.shape_cast %238 : vector<1x128x384xbf16> to vector<128x384xbf16>
    %cst_105 = arith.constant dense<0.000000e+00> : vector<32x384xf32>
    %240 = tpu.matmul %237, %239, %cst_105 {dimension_numbers = #tpu.dot_dimension_numbers<[1], [0], [0], [1], [0, 0, 1, 1], [], []>} : vector<32x128xbf16>, vector<128x384xbf16>, vector<32x384xf32> -> vector<32x384xf32>
    %c1_106 = arith.constant 1 : index
    %c0_107 = arith.constant 0 : index
    %c0_108 = arith.constant 0 : index
    %241 = vector.load %arg4[%c1_106, %c0_107, %c0_108] : memref<2x32x384xf32, #tpu.memory_space<vmem>>, vector<1x32x384xf32>
    %242 = vector.shape_cast %241 : vector<1x32x384xf32> to vector<32x384xf32>
    %243 = arith.addf %240, %242 : vector<32x384xf32>
    %244 = vector.extract_strided_slice %243 {offsets = [0, 0], sizes = [32, 128], strides = [1, 1]} : vector<32x384xf32> to vector<32x128xf32>
    %245 = vector.extract_strided_slice %243 {offsets = [0, 128], sizes = [32, 128], strides = [1, 1]} : vector<32x384xf32> to vector<32x128xf32>
    %246 = vector.extract_strided_slice %243 {offsets = [0, 256], sizes = [32, 128], strides = [1, 1]} : vector<32x384xf32> to vector<32x128xf32>
    %cst_109 = arith.constant 0.000000e+00 : f32
    %247 = vector.broadcast %cst_109 : f32 to vector<32x128xf32>
    %cst_110 = arith.constant 0.000000e+00 : f32
    %248 = vector.broadcast %cst_110 : f32 to vector<32x128xf32>
    %249 = arith.select %19, %244, %248 : vector<32x128xi1>, vector<32x128xf32>
    %cst_111 = arith.constant dense<0.000000e+00> : vector<32x32xf32>
    %250 = tpu.matmul %249, %245, %cst_111 {dimension_numbers = #tpu.dot_dimension_numbers<[1], [1], [0], [0], [0, 0, 1, 0], [], []>} : vector<32x128xf32>, vector<32x128xf32>, vector<32x32xf32> -> vector<32x32xf32>
    %251 = arith.addf %250, %10 : vector<32x32xf32>
    %cst_112 = arith.constant dense<0xFF800000> : vector<32xf32>
    %252 = vector.multi_reduction <maximumf>, %251, %cst_112 [1] : vector<32x32xf32> to vector<32xf32>
    %253 = vector.shape_cast %252 : vector<32xf32> to vector<32x1xf32>
    %254 = vector.broadcast %253 : vector<32x1xf32> to vector<32x32xf32>
    %255 = arith.subf %251, %254 : vector<32x32xf32>
    %256 = math.exp %255 : vector<32x32xf32>
    %cst_113 = arith.constant dense<0.000000e+00> : vector<32xf32>
    %257 = vector.multi_reduction <add>, %256, %cst_113 [1] : vector<32x32xf32> to vector<32xf32>
    %258 = vector.shape_cast %257 : vector<32xf32> to vector<32x1xf32>
    %259 = tpu.reciprocal %258 {approx = true} : vector<32x1xf32> -> vector<32x1xf32>
    %260 = vector.broadcast %259 : vector<32x1xf32> to vector<32x32xf32>
    %261 = arith.mulf %256, %260 : vector<32x32xf32>
    %cst_114 = arith.constant 0.000000e+00 : f32
    %262 = vector.broadcast %cst_114 : f32 to vector<32x128xf32>
    %263 = arith.select %19, %246, %262 : vector<32x128xi1>, vector<32x128xf32>
    %cst_115 = arith.constant dense<0.000000e+00> : vector<32x128xf32>
    %264 = tpu.matmul %261, %263, %cst_115 {dimension_numbers = #tpu.dot_dimension_numbers<[1], [0], [0], [1], [0, 0, 1, 1], [], []>} : vector<32x32xf32>, vector<32x128xf32>, vector<32x128xf32> -> vector<32x128xf32>
    %265 = arith.addf %247, %264 : vector<32x128xf32>
    %cst_116 = arith.constant 0.000000e+00 : f32
    %266 = vector.broadcast %cst_116 : f32 to vector<32x128xf32>
    %267 = arith.select %28, %244, %266 : vector<32x128xi1>, vector<32x128xf32>
    %cst_117 = arith.constant dense<0.000000e+00> : vector<32x32xf32>
    %268 = tpu.matmul %267, %245, %cst_117 {dimension_numbers = #tpu.dot_dimension_numbers<[1], [1], [0], [0], [0, 0, 1, 0], [], []>} : vector<32x128xf32>, vector<32x128xf32>, vector<32x32xf32> -> vector<32x32xf32>
    %269 = arith.addf %268, %10 : vector<32x32xf32>
    %cst_118 = arith.constant dense<0xFF800000> : vector<32xf32>
    %270 = vector.multi_reduction <maximumf>, %269, %cst_118 [1] : vector<32x32xf32> to vector<32xf32>
    %271 = vector.shape_cast %270 : vector<32xf32> to vector<32x1xf32>
    %272 = vector.broadcast %271 : vector<32x1xf32> to vector<32x32xf32>
    %273 = arith.subf %269, %272 : vector<32x32xf32>
    %274 = math.exp %273 : vector<32x32xf32>
    %cst_119 = arith.constant dense<0.000000e+00> : vector<32xf32>
    %275 = vector.multi_reduction <add>, %274, %cst_119 [1] : vector<32x32xf32> to vector<32xf32>
    %276 = vector.shape_cast %275 : vector<32xf32> to vector<32x1xf32>
    %277 = tpu.reciprocal %276 {approx = true} : vector<32x1xf32> -> vector<32x1xf32>
    %278 = vector.broadcast %277 : vector<32x1xf32> to vector<32x32xf32>
    %279 = arith.mulf %274, %278 : vector<32x32xf32>
    %cst_120 = arith.constant 0.000000e+00 : f32
    %280 = vector.broadcast %cst_120 : f32 to vector<32x128xf32>
    %281 = arith.select %28, %246, %280 : vector<32x128xi1>, vector<32x128xf32>
    %cst_121 = arith.constant dense<0.000000e+00> : vector<32x128xf32>
    %282 = tpu.matmul %279, %281, %cst_121 {dimension_numbers = #tpu.dot_dimension_numbers<[1], [0], [0], [1], [0, 0, 1, 1], [], []>} : vector<32x32xf32>, vector<32x128xf32>, vector<32x128xf32> -> vector<32x128xf32>
    %283 = arith.addf %265, %282 : vector<32x128xf32>
    %cst_122 = arith.constant 0.000000e+00 : f32
    %284 = vector.broadcast %cst_122 : f32 to vector<32x128xf32>
    %285 = arith.select %37, %244, %284 : vector<32x128xi1>, vector<32x128xf32>
    %cst_123 = arith.constant dense<0.000000e+00> : vector<32x32xf32>
    %286 = tpu.matmul %285, %245, %cst_123 {dimension_numbers = #tpu.dot_dimension_numbers<[1], [1], [0], [0], [0, 0, 1, 0], [], []>} : vector<32x128xf32>, vector<32x128xf32>, vector<32x32xf32> -> vector<32x32xf32>
    %287 = arith.addf %286, %10 : vector<32x32xf32>
    %cst_124 = arith.constant dense<0xFF800000> : vector<32xf32>
    %288 = vector.multi_reduction <maximumf>, %287, %cst_124 [1] : vector<32x32xf32> to vector<32xf32>
    %289 = vector.shape_cast %288 : vector<32xf32> to vector<32x1xf32>
    %290 = vector.broadcast %289 : vector<32x1xf32> to vector<32x32xf32>
    %291 = arith.subf %287, %290 : vector<32x32xf32>
    %292 = math.exp %291 : vector<32x32xf32>
    %cst_125 = arith.constant dense<0.000000e+00> : vector<32xf32>
    %293 = vector.multi_reduction <add>, %292, %cst_125 [1] : vector<32x32xf32> to vector<32xf32>
    %294 = vector.shape_cast %293 : vector<32xf32> to vector<32x1xf32>
    %295 = tpu.reciprocal %294 {approx = true} : vector<32x1xf32> -> vector<32x1xf32>
    %296 = vector.broadcast %295 : vector<32x1xf32> to vector<32x32xf32>
    %297 = arith.mulf %292, %296 : vector<32x32xf32>
    %cst_126 = arith.constant 0.000000e+00 : f32
    %298 = vector.broadcast %cst_126 : f32 to vector<32x128xf32>
    %299 = arith.select %37, %246, %298 : vector<32x128xi1>, vector<32x128xf32>
    %cst_127 = arith.constant dense<0.000000e+00> : vector<32x128xf32>
    %300 = tpu.matmul %297, %299, %cst_127 {dimension_numbers = #tpu.dot_dimension_numbers<[1], [0], [0], [1], [0, 0, 1, 1], [], []>} : vector<32x32xf32>, vector<32x128xf32>, vector<32x128xf32> -> vector<32x128xf32>
    %301 = arith.addf %283, %300 : vector<32x128xf32>
    %cst_128 = arith.constant 0.000000e+00 : f32
    %302 = vector.broadcast %cst_128 : f32 to vector<32x128xf32>
    %303 = arith.select %46, %244, %302 : vector<32x128xi1>, vector<32x128xf32>
    %cst_129 = arith.constant dense<0.000000e+00> : vector<32x32xf32>
    %304 = tpu.matmul %303, %245, %cst_129 {dimension_numbers = #tpu.dot_dimension_numbers<[1], [1], [0], [0], [0, 0, 1, 0], [], []>} : vector<32x128xf32>, vector<32x128xf32>, vector<32x32xf32> -> vector<32x32xf32>
    %305 = arith.addf %304, %10 : vector<32x32xf32>
    %cst_130 = arith.constant dense<0xFF800000> : vector<32xf32>
    %306 = vector.multi_reduction <maximumf>, %305, %cst_130 [1] : vector<32x32xf32> to vector<32xf32>
    %307 = vector.shape_cast %306 : vector<32xf32> to vector<32x1xf32>
    %308 = vector.broadcast %307 : vector<32x1xf32> to vector<32x32xf32>
    %309 = arith.subf %305, %308 : vector<32x32xf32>
    %310 = math.exp %309 : vector<32x32xf32>
    %cst_131 = arith.constant dense<0.000000e+00> : vector<32xf32>
    %311 = vector.multi_reduction <add>, %310, %cst_131 [1] : vector<32x32xf32> to vector<32xf32>
    %312 = vector.shape_cast %311 : vector<32xf32> to vector<32x1xf32>
    %313 = tpu.reciprocal %312 {approx = true} : vector<32x1xf32> -> vector<32x1xf32>
    %314 = vector.broadcast %313 : vector<32x1xf32> to vector<32x32xf32>
    %315 = arith.mulf %310, %314 : vector<32x32xf32>
    %cst_132 = arith.constant 0.000000e+00 : f32
    %316 = vector.broadcast %cst_132 : f32 to vector<32x128xf32>
    %317 = arith.select %46, %246, %316 : vector<32x128xi1>, vector<32x128xf32>
    %cst_133 = arith.constant dense<0.000000e+00> : vector<32x128xf32>
    %318 = tpu.matmul %315, %317, %cst_133 {dimension_numbers = #tpu.dot_dimension_numbers<[1], [0], [0], [1], [0, 0, 1, 1], [], []>} : vector<32x32xf32>, vector<32x128xf32>, vector<32x128xf32> -> vector<32x128xf32>
    %319 = arith.addf %301, %318 : vector<32x128xf32>
    %320 = arith.truncf %319 : vector<32x128xf32> to vector<32x128xbf16>
    %c1_134 = arith.constant 1 : index
    %c0_135 = arith.constant 0 : index
    %c0_136 = arith.constant 0 : index
    %321 = vector.load %arg5[%c1_134, %c0_135, %c0_136] : memref<2x128x128xbf16, #tpu.memory_space<vmem>>, vector<1x128x128xbf16>
    %322 = vector.shape_cast %321 : vector<1x128x128xbf16> to vector<128x128xbf16>
    %cst_137 = arith.constant dense<0.000000e+00> : vector<32x128xf32>
    %323 = tpu.matmul %320, %322, %cst_137 {dimension_numbers = #tpu.dot_dimension_numbers<[1], [0], [0], [1], [0, 0, 1, 1], [], []>} : vector<32x128xbf16>, vector<128x128xbf16>, vector<32x128xf32> -> vector<32x128xf32>
    %c1_138 = arith.constant 1 : index
    %c0_139 = arith.constant 0 : index
    %c0_140 = arith.constant 0 : index
    %324 = vector.load %arg6[%c1_138, %c0_139, %c0_140] : memref<2x32x128xf32, #tpu.memory_space<vmem>>, vector<1x32x128xf32>
    %325 = vector.shape_cast %324 : vector<1x32x128xf32> to vector<32x128xf32>
    %326 = arith.addf %323, %325 : vector<32x128xf32>
    %327 = arith.addf %326, %236 : vector<32x128xf32>
    %c1_141 = arith.constant 1 : index
    %c0_142 = arith.constant 0 : index
    %c0_143 = arith.constant 0 : index
    %328 = vector.load %arg7[%c1_141, %c0_142, %c0_143] : memref<2x32x128xf32, #tpu.memory_space<vmem>>, vector<1x32x128xf32>
    %329 = vector.shape_cast %328 : vector<1x32x128xf32> to vector<32x128xf32>
    %c1_144 = arith.constant 1 : index
    %c0_145 = arith.constant 0 : index
    %c0_146 = arith.constant 0 : index
    %330 = vector.load %arg8[%c1_144, %c0_145, %c0_146] : memref<2x32x128xf32, #tpu.memory_space<vmem>>, vector<1x32x128xf32>
    %331 = vector.shape_cast %330 : vector<1x32x128xf32> to vector<32x128xf32>
    %cst_147 = arith.constant dense<0.000000e+00> : vector<32xf32>
    %332 = vector.multi_reduction <add>, %327, %cst_147 [1] : vector<32x128xf32> to vector<32xf32>
    %333 = vector.shape_cast %332 : vector<32xf32> to vector<32x1xf32>
    %cst_148 = arith.constant 3.125000e-02 : f32
    %334 = vector.broadcast %cst_148 : f32 to vector<32x1xf32>
    %335 = arith.mulf %333, %334 : vector<32x1xf32>
    %336 = arith.mulf %327, %327 : vector<32x128xf32>
    %cst_149 = arith.constant dense<0.000000e+00> : vector<32xf32>
    %337 = vector.multi_reduction <add>, %336, %cst_149 [1] : vector<32x128xf32> to vector<32xf32>
    %338 = vector.shape_cast %337 : vector<32xf32> to vector<32x1xf32>
    %cst_150 = arith.constant 3.125000e-02 : f32
    %339 = vector.broadcast %cst_150 : f32 to vector<32x1xf32>
    %340 = arith.mulf %338, %339 : vector<32x1xf32>
    %341 = arith.mulf %335, %335 : vector<32x1xf32>
    %342 = arith.subf %340, %341 : vector<32x1xf32>
    %343 = vector.broadcast %335 : vector<32x1xf32> to vector<32x128xf32>
    %344 = arith.subf %327, %343 : vector<32x128xf32>
    %cst_151 = arith.constant 9.99999996E-13 : f32
    %345 = vector.broadcast %cst_151 : f32 to vector<32x1xf32>
    %346 = arith.addf %342, %345 : vector<32x1xf32>
    %347 = math.rsqrt %346 : vector<32x1xf32>
    %348 = vector.broadcast %347 : vector<32x1xf32> to vector<32x128xf32>
    %349 = arith.mulf %344, %348 : vector<32x128xf32>
    %350 = arith.mulf %349, %329 : vector<32x128xf32>
    %351 = arith.addf %350, %331 : vector<32x128xf32>
    %352 = arith.truncf %351 : vector<32x128xf32> to vector<32x128xbf16>
    %c1_152 = arith.constant 1 : index
    %c0_153 = arith.constant 0 : index
    %c0_154 = arith.constant 0 : index
    %353 = vector.load %arg9[%c1_152, %c0_153, %c0_154] : memref<2x128x128xbf16, #tpu.memory_space<vmem>>, vector<1x128x128xbf16>
    %354 = vector.shape_cast %353 : vector<1x128x128xbf16> to vector<128x128xbf16>
    %cst_155 = arith.constant dense<0.000000e+00> : vector<32x128xf32>
    %355 = tpu.matmul %352, %354, %cst_155 {dimension_numbers = #tpu.dot_dimension_numbers<[1], [0], [0], [1], [0, 0, 1, 1], [], []>} : vector<32x128xbf16>, vector<128x128xbf16>, vector<32x128xf32> -> vector<32x128xf32>
    %c1_156 = arith.constant 1 : index
    %c0_157 = arith.constant 0 : index
    %c0_158 = arith.constant 0 : index
    %356 = vector.load %arg10[%c1_156, %c0_157, %c0_158] : memref<2x32x128xf32, #tpu.memory_space<vmem>>, vector<1x32x128xf32>
    %357 = vector.shape_cast %356 : vector<1x32x128xf32> to vector<32x128xf32>
    %358 = arith.addf %355, %357 : vector<32x128xf32>
    %359 = arith.mulf %358, %358 : vector<32x128xf32>
    %360 = arith.mulf %358, %359 : vector<32x128xf32>
    %cst_159 = arith.constant 4.471500e-02 : f32
    %361 = vector.broadcast %cst_159 : f32 to vector<32x128xf32>
    %362 = arith.mulf %361, %360 : vector<32x128xf32>
    %363 = arith.addf %358, %362 : vector<32x128xf32>
    %cst_160 = arith.constant 0.797884583 : f32
    %364 = vector.broadcast %cst_160 : f32 to vector<32x128xf32>
    %365 = arith.mulf %364, %363 : vector<32x128xf32>
    %366 = math.tanh %365 : vector<32x128xf32>
    %cst_161 = arith.constant 1.000000e+00 : f32
    %367 = vector.broadcast %cst_161 : f32 to vector<32x128xf32>
    %368 = arith.addf %367, %366 : vector<32x128xf32>
    %cst_162 = arith.constant 5.000000e-01 : f32
    %369 = vector.broadcast %cst_162 : f32 to vector<32x128xf32>
    %370 = arith.mulf %369, %368 : vector<32x128xf32>
    %371 = arith.mulf %358, %370 : vector<32x128xf32>
    %372 = arith.truncf %371 : vector<32x128xf32> to vector<32x128xbf16>
    %c1_163 = arith.constant 1 : index
    %c0_164 = arith.constant 0 : index
    %c0_165 = arith.constant 0 : index
    %373 = vector.load %arg11[%c1_163, %c0_164, %c0_165] : memref<2x128x128xbf16, #tpu.memory_space<vmem>>, vector<1x128x128xbf16>
    %374 = vector.shape_cast %373 : vector<1x128x128xbf16> to vector<128x128xbf16>
    %cst_166 = arith.constant dense<0.000000e+00> : vector<32x128xf32>
    %375 = tpu.matmul %372, %374, %cst_166 {dimension_numbers = #tpu.dot_dimension_numbers<[1], [0], [0], [1], [0, 0, 1, 1], [], []>} : vector<32x128xbf16>, vector<128x128xbf16>, vector<32x128xf32> -> vector<32x128xf32>
    %c1_167 = arith.constant 1 : index
    %c0_168 = arith.constant 0 : index
    %c0_169 = arith.constant 0 : index
    %376 = vector.load %arg12[%c1_167, %c0_168, %c0_169] : memref<2x32x128xf32, #tpu.memory_space<vmem>>, vector<1x32x128xf32>
    %377 = vector.shape_cast %376 : vector<1x32x128xf32> to vector<32x128xf32>
    %378 = arith.addf %375, %377 : vector<32x128xf32>
    %379 = arith.addf %378, %351 : vector<32x128xf32>
    %c1_170 = arith.constant 1 : index
    %c0_171 = arith.constant 0 : index
    %c0_172 = arith.constant 0 : index
    %380 = vector.load %arg13[%c1_170, %c0_171, %c0_172] : memref<2x32x128xf32, #tpu.memory_space<vmem>>, vector<1x32x128xf32>
    %381 = vector.shape_cast %380 : vector<1x32x128xf32> to vector<32x128xf32>
    %c1_173 = arith.constant 1 : index
    %c0_174 = arith.constant 0 : index
    %c0_175 = arith.constant 0 : index
    %382 = vector.load %arg14[%c1_173, %c0_174, %c0_175] : memref<2x32x128xf32, #tpu.memory_space<vmem>>, vector<1x32x128xf32>
    %383 = vector.shape_cast %382 : vector<1x32x128xf32> to vector<32x128xf32>
    %cst_176 = arith.constant dense<0.000000e+00> : vector<32xf32>
    %384 = vector.multi_reduction <add>, %379, %cst_176 [1] : vector<32x128xf32> to vector<32xf32>
    %385 = vector.shape_cast %384 : vector<32xf32> to vector<32x1xf32>
    %cst_177 = arith.constant 3.125000e-02 : f32
    %386 = vector.broadcast %cst_177 : f32 to vector<32x1xf32>
    %387 = arith.mulf %385, %386 : vector<32x1xf32>
    %388 = arith.mulf %379, %379 : vector<32x128xf32>
    %cst_178 = arith.constant dense<0.000000e+00> : vector<32xf32>
    %389 = vector.multi_reduction <add>, %388, %cst_178 [1] : vector<32x128xf32> to vector<32xf32>
    %390 = vector.shape_cast %389 : vector<32xf32> to vector<32x1xf32>
    %cst_179 = arith.constant 3.125000e-02 : f32
    %391 = vector.broadcast %cst_179 : f32 to vector<32x1xf32>
    %392 = arith.mulf %390, %391 : vector<32x1xf32>
    %393 = arith.mulf %387, %387 : vector<32x1xf32>
    %394 = arith.subf %392, %393 : vector<32x1xf32>
    %395 = vector.broadcast %387 : vector<32x1xf32> to vector<32x128xf32>
    %396 = arith.subf %379, %395 : vector<32x128xf32>
    %cst_180 = arith.constant 9.99999996E-13 : f32
    %397 = vector.broadcast %cst_180 : f32 to vector<32x1xf32>
    %398 = arith.addf %394, %397 : vector<32x1xf32>
    %399 = math.rsqrt %398 : vector<32x1xf32>
    %400 = vector.broadcast %399 : vector<32x1xf32> to vector<32x128xf32>
    %401 = arith.mulf %396, %400 : vector<32x128xf32>
    %402 = arith.mulf %401, %381 : vector<32x128xf32>
    %403 = arith.addf %402, %383 : vector<32x128xf32>
    %404 = tpu.iota {dimensions = array<i32: 0>} : vector<8x32xi32>
    %405 = tpu.iota {dimensions = array<i32: 1>} : vector<8x32xi32>
    %c8_i32 = arith.constant 8 : i32
    %406 = vector.broadcast %c8_i32 : i32 to vector<8x32xi32>
    %407 = arith.muli %404, %406 : vector<8x32xi32>
    %408 = arith.cmpi eq, %405, %407 : vector<8x32xi32>
    %c4_i32 = arith.constant 4 : i32
    %409 = vector.broadcast %c4_i32 : i32 to vector<8x32xi32>
    %410 = arith.cmpi slt, %404, %409 : vector<8x32xi32>
    %411 = arith.andi %408, %410 : vector<8x32xi1>
    %cst_181 = arith.constant 1.000000e+00 : f32
    %cst_182 = arith.constant 0.000000e+00 : f32
    %412 = vector.broadcast %cst_181 : f32 to vector<8x32xf32>
    %413 = vector.broadcast %cst_182 : f32 to vector<8x32xf32>
    %414 = arith.select %411, %412, %413 : vector<8x32xi1>, vector<8x32xf32>
    %cst_183 = arith.constant dense<0.000000e+00> : vector<8x128xf32>
    %415 = tpu.matmul %414, %403, %cst_183 {dimension_numbers = #tpu.dot_dimension_numbers<[1], [0], [0], [1], [0, 0, 1, 1], [], []>} : vector<8x32xf32>, vector<32x128xf32>, vector<8x128xf32> -> vector<8x128xf32>
    %416 = arith.truncf %415 : vector<8x128xf32> to vector<8x128xbf16>
    %c0_184 = arith.constant 0 : index
    %c0_185 = arith.constant 0 : index
    %417 = vector.load %arg15[%c0_184, %c0_185] : memref<128x128xbf16, #tpu.memory_space<vmem>>, vector<128x128xbf16>
    %cst_186 = arith.constant dense<0.000000e+00> : vector<8x128xf32>
    %418 = tpu.matmul %416, %417, %cst_186 {dimension_numbers = #tpu.dot_dimension_numbers<[1], [0], [0], [1], [0, 0, 1, 1], [], []>} : vector<8x128xbf16>, vector<128x128xbf16>, vector<8x128xf32> -> vector<8x128xf32>
    %c0_187 = arith.constant 0 : index
    %c0_188 = arith.constant 0 : index
    %419 = vector.load %arg16[%c0_187, %c0_188] : memref<8x128xf32, #tpu.memory_space<vmem>>, vector<8x128xf32>
    %420 = arith.addf %418, %419 : vector<8x128xf32>
    %421 = math.tanh %420 : vector<8x128xf32>
    %422 = arith.truncf %421 : vector<8x128xf32> to vector<8x128xbf16>
    %c0_189 = arith.constant 0 : index
    %c0_190 = arith.constant 0 : index
    %423 = vector.load %arg17[%c0_189, %c0_190] : memref<128x128xbf16, #tpu.memory_space<vmem>>, vector<128x128xbf16>
    %cst_191 = arith.constant dense<0.000000e+00> : vector<8x128xf32>
    %424 = tpu.matmul %422, %423, %cst_191 {dimension_numbers = #tpu.dot_dimension_numbers<[1], [0], [0], [1], [0, 0, 1, 1], [], []>} : vector<8x128xbf16>, vector<128x128xbf16>, vector<8x128xf32> -> vector<8x128xf32>
    %c0_192 = arith.constant 0 : index
    %c0_193 = arith.constant 0 : index
    %425 = vector.load %arg18[%c0_192, %c0_193] : memref<8x128xf32, #tpu.memory_space<vmem>>, vector<8x128xf32>
    %426 = arith.addf %424, %425 : vector<8x128xf32>
    %c0_194 = arith.constant 0 : index
    %c0_195 = arith.constant 0 : index
    %427 = vector.load %arg19[%c0_194, %c0_195] : memref<8x128xf32, #tpu.memory_space<vmem>>, vector<8x128xf32>
    tpu.vector_store %arg19[%c0_194, %c0_195], %426 {strides = array<i32>} : memref<8x128xf32, #tpu.memory_space<vmem>>, vector<8x128xf32>,
    return
  }
}

</mosaic_0001>

<bundles_post_ra>
// kernel: dual_bert_forward.1
= control target key start
LH: loop header
LB: loop body
LE: loop exit
PB: predicated region body
PF: predicated region fallthrough
CT: control target
= control target key end

     0   :  { %s7290_s0 = inlined_call_operand.vmem [shape: f32[32,128], index: 0, kind: input, shape index: {}]   ;;  %s7291_s1 = inlined_call_operand.hbm [shape: f32[32,128], index: 1, kind: input, shape index: {}]   ;;  %s7292_s2 = inlined_call_operand.hbm [shape: f32[32,128], index: 2, kind: input, shape index: {}]   ;;  %s7293_s3 = inlined_call_operand.vmem [shape: bf16[2,128,384], index: 3, kind: input, shape index: {}]   ;;  %s7294_s4 = inlined_call_operand.vmem [shape: f32[2,32,384], index: 4, kind: input, shape index: {}]   ;;  %s7295_s5 = inlined_call_operand.vmem [shape: bf16[2,128,128], index: 5, kind: input, shape index: {}]   ;;  %s7296_s6 = inlined_call_operand.vmem [shape: f32[2,32,128], index: 6, kind: input, shape index: {}]   ;;  %s7297_s7 = inlined_call_operand.vmem [shape: f32[2,32,128], index: 7, kind: input, shape index: {}]   ;;  %s7298_s8 = inlined_call_operand.vmem [shape: f32[2,32,128], index: 8, kind: input, shape index: {}]   ;;  %s7299_s9 = inlined_call_operand.vmem [shape: bf16[2,128,128], index: 9, kind: input, shape index: {}]   ;;  %s7300_s10 = inlined_call_operand.vmem [shape: f32[2,32,128], index: 10, kind: input, shape index: {}]   ;;  %s7301_s11 = inlined_call_operand.vmem [shape: bf16[2,128,128], index: 11, kind: input, shape index: {}]   ;;  %s7302_s12 = inlined_call_operand.vmem [shape: f32[2,32,128], index: 12, kind: input, shape index: {}]   ;;  %s7303_s13 = inlined_call_operand.vmem [shape: f32[2,32,128], index: 13, kind: input, shape index: {}]   ;;  %s7304_s14 = inlined_call_operand.vmem [shape: f32[2,32,128], index: 14, kind: input, shape index: {}]   ;;  %s7305_s15 = inlined_call_operand.vmem [shape: bf16[128,128], index: 15, kind: input, shape index: {}]   ;;  %s7306_s16 = inlined_call_operand.hbm [shape: f32[8,128], index: 16, kind: input, shape index: {}]   ;;  %s7307_s17 = inlined_call_operand.hbm [shape: bf16[128,128], index: 17, kind: input, shape index: {}]   ;;  %s7308_s18 = inlined_call_operand.hbm [shape: f32[8,128], index: 18, kind: input, shape index: {}]   ;;  %s7309_s19 = inlined_call_operand.vmem [shape: f32[8,128], index: 19, kind: output, shape index: {}]  }
   0x1   :  { %7317 = sst [smem:[#allocation13_spill]] %s7290_s0 }
   0x2   :  { %7318 = sst [smem:[#allocation14_spill]] %s7291_s1 }
   0x3   :  { %7319 = sst [smem:[#allocation15_spill]] %s7292_s2 }
   0x4   :  { %7320 = sst [smem:[#allocation16_spill]] %s7293_s3 }
   0x5   :  { %7321 = sst [smem:[#allocation17_spill]] %s7305_s15 }
   0x6   :  { %7322 = sst [smem:[#allocation18_spill]] %s7309_s19 }
   0x7   :  { %24 = vsyncpa [#allocation3], 0 }
   0x8   :  { %25 = vsyncpa [#allocation5], 0 }
   0x9   :  { %26 = vsyncpa [#allocation8], 0  ;;  %s5684_s0 = smov [#allocation4]   ;;  %s5685_s20 = smov [#allocation7]  }
   0xa   :  { %s46_s30 = sshll.u32 %s5684_s0, 4  ;;  %s94_s21 = sshll.u32 %s5685_s20, 4  ;;  %s47_s30 = int_to_ptr.vmem [resolvable:$true] %s46_s30  ;;  %s5798_s21 = int_to_ptr.vmem [resolvable:$true] %s94_s21 }
   0xb   :  { %s7323_s2 = sld [smem:[#allocation15_spill]] }
  0x11   :  { %s5568_s23 = scalar_lea.hbm %s7323_s2, 512 }
  0x12   :  { %p5569_p0 = scmp.ne.s32.totalorder %s7323_s2, %s5568_s23  ;;  %p5572_p1 = scmp.lt.u32.totalorder %s5568_s23, %s7323_s2 }
  0x14   :  { %p5574_p2 = pnand %p5572_p1, %p5569_p0 }
  0x16   :  { %5577 = shalt.err (!%p5574_p2)
}
  0x17   :  { %s5578_s27 = scalar_lea.vmem %s47_s30, 512  ;;  %p5583_p4 = scmp.lt.s32.totalorder %s47_s30, %s47_s30 }
  0x18   :  { %p5579_p3 = scmp.ne.s32.totalorder %s47_s30, %s5578_s27  ;;  %p5584_p5 = scmp.lt.s32.totalorder %s5578_s27, %s5578_s27 }
  0x1a   :  { %p5585_p6 = por %p5584_p5, %p5583_p4 }
  0x1c   :  { %p5586_p7 = pnand %p5585_p6, %p5579_p3 }
  0x1e   :  { %5589 = shalt.err (!%p5586_p7)
}
  0x1f   :  { %s7314_s28 = smov 128   ;;  %s7315_s29 = smov 8  }
  0x20   :  { %52 = dma.hbm_to_vmem [thread:$0]  %s7323_s2, 512, %s47_s30, [#allocation5], %s7314_s28, %s7314_s28, %s7315_s29  }
  0x21   :  { %s5590_s23 = scalar_lea.hbm %s7307_s17, 1024 }
  0x22   :  { %p5591_p8 = scmp.ne.s32.totalorder %s7307_s17, %s5590_s23  ;;  %p5594_p9 = scmp.lt.u32.totalorder %s5590_s23, %s7307_s17 }
  0x24   :  { %p5596_p10 = pnand %p5594_p9, %p5591_p8 }
  0x26   :  { %5599 = shalt.err (!%p5596_p10)
}
  0x27   :  { %s5600_s27 = scalar_lea.vmem %s5798_s21, 1024  ;;  %p5605_p12 = scmp.lt.s32.totalorder %s5798_s21, %s5798_s21 }
  0x28   :  { %p5601_p11 = scmp.ne.s32.totalorder %s5798_s21, %s5600_s27  ;;  %p5606_p13 = scmp.lt.s32.totalorder %s5600_s27, %s5600_s27 }
  0x2a   :  { %p5607_p0 = por %p5606_p13, %p5605_p12 }
  0x2c   :  { %p5608_p1 = pnand %p5607_p0, %p5601_p11 }
  0x2e   :  { %5611 = shalt.err (!%p5608_p1)
}
  0x2f   :  { %s5688_s30 = smov 64   ;;  %s5689_s2 = smov 4  }
  0x30   :  { %100 = dma.hbm_to_vmem [thread:$0]  %s7307_s17, 1024, %s5798_s21, [#allocation8], %s5688_s30, %s5688_s30, %s5689_s2  }
  0x31   :  { %s5690_s1 = smov [#allocation2]   ;;  %s5691_s23 = smov [#allocation6]  }
  0x32   :  { %s34_s22 = sshll.u32 %s5690_s1, 4  ;;  %s85_s24 = sshll.u32 %s5691_s23, 4  ;;  %s35_s22 = int_to_ptr.vmem [resolvable:$true] %s34_s22  ;;  %s86_s24 = int_to_ptr.vmem [resolvable:$true] %s85_s24 }
  0x33   :  { %s7324_s26 = sld [smem:[#allocation14_spill]] }
  0x39   :  { %s5612_s27 = scalar_lea.hbm %s7324_s26, 512 }
  0x3a   :  { %p5613_p2 = scmp.ne.s32.totalorder %s7324_s26, %s5612_s27  ;;  %p5616_p3 = scmp.lt.u32.totalorder %s5612_s27, %s7324_s26 }
  0x3c   :  { %p5618_p4 = pnand %p5616_p3, %p5613_p2 }
  0x3e   :  { %5621 = shalt.err (!%p5618_p4)
}
  0x3f   :  { %s5622_s17 = scalar_lea.vmem %s35_s22, 512  ;;  %p5627_p6 = scmp.lt.s32.totalorder %s35_s22, %s35_s22 }
  0x40   :  { %p5623_p5 = scmp.ne.s32.totalorder %s35_s22, %s5622_s17  ;;  %p5628_p7 = scmp.lt.s32.totalorder %s5622_s17, %s5622_s17 }
  0x42   :  { %p5629_p8 = por %p5628_p7, %p5627_p6 }
  0x44   :  { %p5630_p9 = pnand %p5629_p8, %p5623_p5 }
  0x46   :  { %5633 = shalt.err (!%p5630_p9)
}
  0x47   :  { %s7325_s21 = smov 8   ;;  %s7326_s30 = smov 128  }
  0x48   :  { %40 = dma.hbm_to_vmem [thread:$0]  %s7324_s26, 512, %s35_s22, [#allocation3], %s7326_s30, %s7326_s30, %s7325_s21  }
  0x49   :  { %s5634_s15 = scalar_lea.hbm %s7306_s16, 128 }
  0x4a   :  { %p5635_p10 = scmp.ne.s32.totalorder %s7306_s16, %s5634_s15  ;;  %p5638_p11 = scmp.lt.u32.totalorder %s5634_s15, %s7306_s16 }
  0x4c   :  { %p5640_p12 = pnand %p5638_p11, %p5635_p10 }
  0x4e   :  { %5643 = shalt.err (!%p5640_p12)
}
  0x4f   :  { %s5644_s25 = scalar_lea.vmem %s86_s24, 128  ;;  %p5649_p0 = scmp.lt.s32.totalorder %s86_s24, %s86_s24 }
  0x50   :  { %p5645_p13 = scmp.ne.s32.totalorder %s86_s24, %s5644_s25  ;;  %p5650_p1 = scmp.lt.s32.totalorder %s5644_s25, %s5644_s25 }
  0x52   :  { %p5651_p2 = por %p5650_p1, %p5649_p0 }
  0x54   :  { %p5652_p3 = pnand %p5651_p2, %p5645_p13 }
  0x56   :  { %5655 = shalt.err (!%p5652_p3)
}
  0x57   :  { %88 = dma.hbm_to_vmem [thread:$0]  %s7306_s16, 128, %s86_s24, [#allocation5]  }
  0x58   :  { %s5692_s26 = smov [#allocation9]   ;;  %s5656_s30 = scalar_lea.hbm %s7308_s18, 128 }
  0x59   :  { %s107_s27 = sshll.u32 %s5692_s26, 4  ;;  %p5657_p4 = scmp.ne.s32.totalorder %s7308_s18, %s5656_s30  ;;  %s108_s27 = int_to_ptr.vmem [resolvable:$true] %s107_s27 }
  0x5a   :  { %p5660_p5 = scmp.lt.u32.totalorder %s5656_s30, %s7308_s18 }
  0x5c   :  { %p5662_p6 = pnand %p5660_p5, %p5657_p4 }
  0x5e   :  { %5665 = shalt.err (!%p5662_p6)
}
  0x5f   :  { %s5666_s15 = scalar_lea.vmem %s108_s27, 128  ;;  %p5671_p8 = scmp.lt.s32.totalorder %s108_s27, %s108_s27 }
  0x60   :  { %p5667_p7 = scmp.ne.s32.totalorder %s108_s27, %s5666_s15  ;;  %p5672_p9 = scmp.lt.s32.totalorder %s5666_s15, %s5666_s15 }
  0x62   :  { %p5673_p10 = por %p5672_p9, %p5671_p8 }
  0x64   :  { %p5674_p11 = pnand %p5673_p10, %p5667_p7 }
  0x66   :  { %5677 = shalt.err (!%p5674_p11)
}
  0x67   :  { %110 = dma.hbm_to_vmem [thread:$0]  %s7308_s18, 128, %s108_s27, [#allocation8]  }
  0x68   :  { %5678 = dma.done.wait [#allocation3], 512  }
  0x69   :  { %5679 = vsyncadd [#allocation3], 4294966784 }
  0x6a   :  { %5680 = dma.done.wait [#allocation5], 640  }
  0x6b   :  { %5681 = vsyncadd [#allocation5], 4294966656 }
  0x6c   :  { %5682 = dma.done.wait [#allocation8], 1152  }
  0x6d   :  { %5683 = vsyncadd [#allocation8], 4294966144  ;;  %s7327_s1 = sld [smem:[#allocation13_spill]]  ;;  %s7328_s3 = sld [smem:[#allocation16_spill]]  ;;  %v5693_v30 = vmov 0   ;;  %vm594_vm15 = vcmask 261120  }
  0x6e   :  { %435 = vmatprep.mubr.bf16.mxu0 %v5693_v30  ;;  %s7345_s17 = sld [smem:[#allocation17_spill]]  ;;  %s7346_s20 = sld [smem:[#allocation18_spill]] }
  0x73   :  { %v5874_v0 = vld [vmem:[%s7327_s1] sm:$0xff]  ;;  %v5879_v1 = vld [vmem:[%s7327_s1 + $0x8] sm:$0xff]  ;;  %v5892_v5 = vld [vmem:[%s7327_s1 + $0x10] sm:$0xff] }
  0x74   :  { %169 = vadd.xlane.f32.xlu0 %v5874_v0  ;;  %v181_v2 = vmul.f32 %v5874_v0, %v5874_v0  ;;  %v5254_v3 = vld [vmem:[%s7328_s3 + $0x4] ss:$12 sps:$4 sm:$0xff]   ;;  %v182_v4 = vmul.f32 %v5879_v1, %v5879_v1  ;;  %v5898_v6 = vld [vmem:[%s7327_s1 + $0x18] sm:$0xff]  ;;  %v183_v7 = vmul.f32 %v5892_v5, %v5892_v5  ;;  %v5256_v9 = vld [vmem:[%s7328_s3] ss:$12 sps:$4 sm:$0xff]  }
  0x75   :  { %403 = vmatprep.subr.bf16.mxu0 %v5254_v3  ;;  %v184_v8 = vmul.f32 %v5898_v6, %v5898_v6  ;;  %v5257_v10 = vld [vmem:[%s7328_s3 + $0x1c] ss:$12 sps:$4 sm:$0xff]   ;;  %v5259_v11 = vld [vmem:[%s7328_s3 + $0x18] ss:$12 sps:$4 sm:$0xff]   ;;  %v5260_v12 = vld [vmem:[%s7328_s3 + $0x34] ss:$12 sps:$4 sm:$0xff]  }
  0x76   :  { %185 = vadd.xlane.f32.xlu1 %v181_v2  ;;  %404 = vmatpush1.bf16.msra.mxu0 %v5256_v9  ;;  %v5262_v13 = vld [vmem:[%s7328_s3 + $0x8] ss:$12 sps:$4 sm:$0xff]   ;;  %v5263_v14 = vld [vmem:[%s7328_s3 + $0x30] ss:$12 sps:$4 sm:$0xff]   ;;  %v5264_v15 = vld [vmem:[%s7328_s3 + $0x4c] ss:$12 sps:$4 sm:$0xff]  }
  0x77   :  { %405 = vmatprep.subr.bf16.mxu0 %v5257_v10  ;;  %4615 = vmatprep.subr.bf16.mxu1 %v5262_v13  ;;  %v5266_v16 = vld [vmem:[%s7328_s3 + $0x20] ss:$12 sps:$4 sm:$0xff]   ;;  %v5267_v17 = vld [vmem:[%s7328_s3 + $0x48] ss:$12 sps:$4 sm:$0xff]   ;;  %v5268_v18 = vld [vmem:[%s7328_s3 + $0x64] ss:$12 sps:$4 sm:$0xff]  }
  0x78   :  { %171 = vadd.xlane.f32.xlu0 %v5879_v1  ;;  %4616 = vmatpush3.bf16.msra.mxu1 %v5262_v13  ;;  %v5270_v19 = vld [vmem:[%s7328_s3 + $0x38] ss:$12 sps:$4 sm:$0xff]   ;;  %v5271_v20 = vld [vmem:[%s7328_s3 + $0x60] ss:$12 sps:$4 sm:$0xff]   ;;  %v5272_v21 = vld [vmem:[%s7328_s3 + $0x7c] ss:$12 sps:$4 sm:$0xff]  }
  0x79   :  { %4617 = vmatprep.subr.bf16.mxu1 %v5266_v16  ;;  %v5274_v22 = vld [vmem:[%s7328_s3 + $0x50] ss:$12 sps:$4 sm:$0xff]   ;;  %v5275_v23 = vld [vmem:[%s7328_s3 + $0x78] ss:$12 sps:$4 sm:$0xff]   ;;  %v5276_v24 = vld [vmem:[%s7328_s3 + $0x94] ss:$12 sps:$4 sm:$0xff]  }
  0x7a   :  { %187 = vadd.xlane.f32.xlu1 %v182_v4  ;;  %406 = vmatpush1.bf16.msra.mxu0 %v5259_v11  ;;  %v5278_v25 = vld [vmem:[%s7328_s3 + $0x68] ss:$12 sps:$4 sm:$0xff]   ;;  %v5279_v26 = vld [vmem:[%s7328_s3 + $0x90] ss:$12 sps:$4 sm:$0xff]   ;;  %v5280_v27 = vld [vmem:[%s7328_s3 + $0xac] ss:$12 sps:$4 sm:$0xff]  }
  0x7b   :  { %407 = vmatprep.subr.bf16.mxu0 %v5260_v12  ;;  %v5282_v28 = vld [vmem:[%s7328_s3 + $0x80] ss:$12 sps:$4 sm:$0xff]   ;;  %v5283_v29 = vld [vmem:[%s7328_s3 + $0xa8] ss:$12 sps:$4 sm:$0xff]   ;;  %v5284_v31 = vld [vmem:[%s7328_s3 + $0x98] ss:$12 sps:$4 sm:$0xff]  }
  0x7c   :  { %173 = vadd.xlane.f32.xlu0 %v5892_v5  ;;  %4618 = vmatpush3.bf16.msra.mxu1 %v5266_v16  ;;  %v5285_v32 = vld [vmem:[%s7328_s3 + $0xb0] ss:$12 sps:$4 sm:$0xff]   ;;  %v161_v2 = vld [vmem:[#allocation2] sm:$0xff]  ;;  %v166_v11 = vld [vmem:[#allocation4 + $0x8] sm:$0xff] }
  0x7d   :  { %4619 = vmatprep.subr.bf16.mxu1 %v5270_v19  ;;  %v165_v10 = vld [vmem:[#allocation4] sm:$0xff]  ;;  %v163_v16 = vld [vmem:[#allocation2 + $0x10] sm:$0xff] }
  0x7e   :  { %175 = vadd.xlane.f32.xlu1 %v5898_v6  ;;  %408 = vmatpush1.bf16.msra.mxu0 %v5263_v14 }
  0x7f   :  { %409 = vmatprep.subr.bf16.mxu0 %v5264_v15 }
  0x80   :  { %189 = vadd.xlane.f32.xlu0 %v183_v7  ;;  %4620 = vmatpush3.bf16.msra.mxu1 %v5270_v19  ;;  %v162_v7 = vld [vmem:[#allocation2 + $0x8] sm:$0xff] }
  0x81   :  { %4621 = vmatprep.subr.bf16.mxu1 %v5274_v22 }
  0x82   :  { %191 = vadd.xlane.f32.xlu1 %v184_v8  ;;  %410 = vmatpush1.bf16.msra.mxu0 %v5267_v17 }
  0x83   :  { %411 = vmatprep.subr.bf16.mxu0 %v5268_v18 }
  0x84   :  { %4622 = vmatpush3.bf16.msra.mxu1 %v5274_v22 }
  0x85   :  { %4623 = vmatprep.subr.bf16.mxu1 %v5278_v25 }
  0x86   :  { %412 = vmatpush1.bf16.msra.mxu0 %v5271_v20  ;;  %v164_v20 = vld [vmem:[#allocation2 + $0x18] sm:$0xff] }
  0x87   :  { %413 = vmatprep.subr.bf16.mxu0 %v5272_v21 }
  0x88   :  { %4624 = vmatpush3.bf16.msra.mxu1 %v5278_v25 }
  0x89   :  { %4625 = vmatprep.subr.bf16.mxu1 %v5282_v28 }
  0x8a   :  { %414 = vmatpush1.bf16.msra.mxu0 %v5275_v23  ;;  %v168_v23 = vld [vmem:[#allocation4 + $0x18] sm:$0xff] }
  0x8b   :  { %415 = vmatprep.subr.bf16.mxu0 %v5276_v24 }
  0x8c   :  { %4626 = vmatpush3.bf16.msra.mxu1 %v5282_v28 }
  0x8d   :  { %4627 = vmatprep.subr.bf16.mxu1 %v5284_v31 }
  0x8e   :  { %416 = vmatpush1.bf16.msra.mxu0 %v5279_v26 }
  0x8f   :  { %417 = vmatprep.subr.bf16.mxu0 %v5280_v27  ;;  %v127_v27 = vlaneseq }
  0x90   :  { %4628 = vmatpush3.bf16.msra.mxu1 %v5284_v31 }
  0x91   :  { %4629 = vmatprep.subr.bf16.mxu1 %v5285_v32  ;;  %v5994_v28 = vand.u32 127, %v127_v27 }
  0x92   :  { %418 = vmatpush1.bf16.msra.mxu0 %v5283_v29 }
  0x93   :  { %v5997_v29 = vshra.s32 %v5994_v28, 3  ;;  %vm149_vm1 = vcmp.lt.s32.totalorder %v5994_v28, 64 }
  0x94   :  { %4630 = vmatpush3.bf16.msra.mxu1 %v5285_v32  ;;  %v263_v32 = vld [vmem:[%s7294_s4] sm:$0xff] }
  0x95   :  { %v6000_v31 = vand.u32 3, %v5997_v29 }
  0x97   :  { %vm148_vm0 = vcmp.eq.s32.totalorder %v6000_v31, 0  ;;  %vm151_vm3 = vcmp.eq.s32.totalorder %v6000_v31, 1  ;;  %vm153_vm7 = vcmp.eq.s32.totalorder %v6000_v31, 2  ;;  %vm155_vm9 = vcmp.eq.s32.totalorder %v6000_v31, 3 }
  0x98   :  { %vm6009_vm2 = vmand %vm148_vm0, %vm149_vm1 }
  0x99   :  { %vm6049_vm4 = vmand %vm151_vm3, %vm149_vm1 }
  0x9a   :  { %vm6058_vm5 = vmpackc.low %vm6049_vm4, %vm6049_vm4 }
  0x9b   :  { %vm6080_vm6 = vmpackc.low %vm6009_vm2, %vm6009_vm2 }
  0x9c   :  { %vm6115_vm8 = vmand %vm153_vm7, %vm149_vm1 }
  0x9d   :  { %vm6133_vm10 = vmand %vm155_vm9, %vm149_vm1 }
  0x9e   :  { %vm6339_vm0 = vmpackc.low %vm6115_vm8, %vm6115_vm8 }
  0x9f   :  { %vm6366_vm1 = vmpackc.low %vm6133_vm10, %vm6133_vm10 }
 0x101   :  { %v170_v33 = vpop.xlane.xlu0 %169 }
 0x102   :  { %v177_v34 = vmul.f32 0.03125, %v170_v33 }
 0x103   :  { %v186_v35 = vpop.xlane.xlu1 %185 }
 0x104   :  { %v197_v36 = vmul.f32 %v177_v34, %v177_v34  ;;  %v193_v37 = vmul.f32 0.03125, %v186_v35  ;;  %v205_v60 = vsub.f32 %v5874_v0, %v177_v34 }
 0x105   :  { %v172_v38 = vpop.xlane.xlu0 %171 }
 0x106   :  { %v201_v39 = vsub.f32 %v193_v37, %v197_v36  ;;  %v178_v40 = vmul.f32 0.03125, %v172_v38  ;;  %v264_v36 = vld [vmem:[%s7294_s4 + $0x8] sm:$0xff]  ;;  %v267_v38 = vld [vmem:[%s7294_s4 + $0x20] sm:$0xff] }
 0x107   :  { %v188_v41 = vpop.xlane.xlu1 %187 }
 0x108   :  { %v209_v42 = vadd.f32 1e-12, %v201_v39  ;;  %v198_v43 = vmul.f32 %v178_v40, %v178_v40  ;;  %v194_v44 = vmul.f32 0.03125, %v188_v41  ;;  %v206_v3 = vsub.f32 %v5879_v1, %v178_v40 }
 0x109   :  { %v174_v45 = vpop.xlane.xlu0 %173 }
 0x10a   :  { %5382 = vrsqrt.f32 %v209_v42  ;;  %v202_v46 = vsub.f32 %v194_v44, %v198_v43  ;;  %v179_v47 = vmul.f32 0.03125, %v174_v45  ;;  %v271_v45 = vld [vmem:[%s7294_s4 + $0x40] sm:$0xff] }
 0x10b   :  { %v176_v48 = vpop.xlane.xlu1 %175 }
 0x10c   :  { %v210_v49 = vadd.f32 1e-12, %v202_v46  ;;  %v199_v50 = vmul.f32 %v179_v47, %v179_v47  ;;  %v180_v51 = vmul.f32 0.03125, %v176_v48  ;;  %v207_v13 = vsub.f32 %v5892_v5, %v179_v47  ;;  %v167_v5 = vld [vmem:[#allocation4 + $0x10] sm:$0xff]  ;;  %v270_v47 = vld [vmem:[%s7294_s4 + $0x38] sm:$0xff] }
 0x10d   :  { %v190_v52 = vpop.xlane.xlu0 %189  ;;  %v274_v48 = vld [vmem:[%s7294_s4 + $0x58] sm:$0xff] }
 0x10e   :  { %5384 = vrsqrt.f32 %v210_v49  ;;  %v195_v53 = vmul.f32 0.03125, %v190_v52  ;;  %v200_v55 = vmul.f32 %v180_v51, %v180_v51  ;;  %v208_v17 = vsub.f32 %v5898_v6, %v180_v51  ;;  %v265_v51 = vld [vmem:[%s7294_s4 + $0x10] sm:$0xff] }
 0x10f   :  { %v192_v54 = vpop.xlane.xlu1 %191  ;;  %v273_v52 = vld [vmem:[%s7294_s4 + $0x50] sm:$0xff] }
 0x110   :  { %v203_v56 = vsub.f32 %v195_v53, %v199_v50  ;;  %v196_v57 = vmul.f32 0.03125, %v192_v54  ;;  %v268_v53 = vld [vmem:[%s7294_s4 + $0x28] sm:$0xff] }
 0x112   :  { %v211_v58 = vadd.f32 1e-12, %v203_v56  ;;  %v204_v59 = vsub.f32 %v196_v57, %v200_v55 }
 0x114   :  { %v5383_v61 = vpop.eup %5382  ;;  %5386 = vrsqrt.f32 %v211_v58  ;;  %v212_v62 = vadd.f32 1e-12, %v204_v59 }
 0x115   :  { %v217_v63 = vmul.f32 %v5383_v61, %v205_v60 }
 0x116   :  { %5388 = vrsqrt.f32 %v212_v62 }
 0x117   :  { %v221_v9 = vmul.f32 %v217_v63, %v161_v2 }
 0x118   :  { %v5385_v4 = vpop.eup %5384 }
 0x119   :  { %v218_v8 = vmul.f32 %v5385_v4, %v206_v3  ;;  %v5979_v14 = vadd.f32 %v221_v9, %v165_v10  ;;  %v266_v9 = vld [vmem:[%s7294_s4 + $0x18] sm:$0xff] }
 0x11b   :  { %v222_v12 = vmul.f32 %v218_v8, %v162_v7 }
 0x11d   :  { %v5981_v0 = vadd.f32 %v222_v12, %v166_v11  ;;  %v269_v11 = vld [vmem:[%s7294_s4 + $0x30] sm:$0xff] }
 0x11e   :  { %v5387_v15 = vpop.eup %5386 }
 0x11f   :  { %v229_v1 = vpack.c.bf16 %v5981_v0, %v5979_v14  ;;  %v219_v18 = vmul.f32 %v5387_v15, %v207_v13  ;;  %v272_v15 = vld [vmem:[%s7294_s4 + $0x48] sm:$0xff] }
 0x120   :  { %v5389_v19 = vpop.eup %5388 }
 0x121   :  { %436 = vmatmul.mubr.bf16.vlgmr.msra.gmra.mrb[0].mxu0 %v229_v1  ;;  %4631 = vmatprep.mubr.bf16.mxu1 %v229_v1  ;;  %v220_v21 = vmul.f32 %v5389_v19, %v208_v17  ;;  %v223_v22 = vmul.f32 %v219_v18, %v163_v16  ;;  %v6149_v19 = vshrl.u32 %v127_v27, 7  ;;  %v5694_v27 = vmov -1e+30  }
 0x122   :  { %445 = vmatprep.mubr.bf16.mxu0 %v5693_v30 }
 0x123   :  { %v224_v24 = vmul.f32 %v220_v21, %v164_v20  ;;  %v5987_v25 = vadd.f32 %v223_v22, %v167_v5  ;;  %v131_v22 = vadd.s32 8, %v6149_v19  ;;  %v132_v31 = vadd.s32 16, %v6149_v19 }
 0x125   :  { %v5989_v26 = vadd.f32 %v224_v24, %v168_v23  ;;  %v135_v23 = vshra.s32 %v131_v22, 3  ;;  %v133_v24 = vadd.s32 24, %v6149_v19 }
 0x127   :  { %v230_v6 = vpack.c.bf16 %v5989_v26, %v5987_v25  ;;  %vm140_vm11 = vcmp.eq.s32.totalorder %v135_v23, %v5997_v29 }
 0x129   :  { %446 = vmatmul.mubr.bf16.gmra.mrb[4].mxu0 %v230_v6  ;;  %4632 = vmatmul.mubr.bf16.vlgmr.msra.gmra.mrb[0].mxu1 %v230_v6  ;;  %v134_v6 = vshra.s32 %v6149_v19, 3 }
 0x12b   :  { %vm139_vm12 = vcmp.eq.s32.totalorder %v134_v6, %v5997_v29 }
 0x1f4   :  { %v437_v33 = vpop.f32.mrb[0].mxu0 }
 0x1f5   :  { %v6013_v35 = vadd.f32 %v437_v33, %v263_v32  ;;  %v439_v37 = vpop.f32.mrb[1].mxu0  ;;  %v137_v32 = vshra.s32 %v133_v24, 3  ;;  %v136_v33 = vshra.s32 %v132_v31, 3 }
 0x1f6   :  { %v441_v39 = vpop.f32.mrb[2].mxu0  ;;  %v440_v41 = vadd.f32 %v439_v37, %v264_v36  ;;  %v6159_v37 = vsel %vm139_vm12, 0.0, %v5694_v27 }
 0x1f7   :  { %v443_v40 = vpop.f32.mrb[3].mxu0  ;;  %4643 = vmatprep.mubr.msk.f32.mxu1 %vm6009_vm2, %v6013_v35  ;;  %v442_v12 = vadd.f32 %v441_v39, %v266_v9  ;;  %vm142_vm13 = vcmp.eq.s32.totalorder %v137_v32, %v5997_v29  ;;  %vm141_vm14 = vcmp.eq.s32.totalorder %v136_v33, %v5997_v29 }
 0x1f8   :  { %v444_v42 = vadd.f32 %v443_v40, %v267_v38 }
 0x1fa   :  { %v6024_v43 = vpack.c.bf16 %v444_v42, %v440_v41  ;;  %v6171_v42 = vsel %vm142_vm13, 0.0, %v5694_v27 }
 0x1fc   :  { %v447_v44 = vpop.f32.mrb[4].mxu0  ;;  %v4633_v46 = vpop.f32.mrb[0].mxu1  ;;  %5051 = vmatprep.subr.bf16.mxu1 %v6024_v43 }
 0x1fd   :  { %v449_v49 = vpop.f32.mrb[5].mxu0  ;;  %v490_v50 = vpop.f32.mrb[1].mxu1  ;;  %5053 = vmatpush3.bf16.xpose.msra.mxu1 %v6024_v43  ;;  %v499_v57 = vadd.f32 %v4633_v46, %v271_v45  ;;  %v448_v13 = vadd.f32 %v447_v44, %v269_v11  ;;  %v6175_v45 = vsel %vm141_vm14, 0.0, %v5694_v27 }
 0x1fe   :  { %v451_v55 = vpop.f32.mrb[6].mxu0  ;;  %v4634_v56 = vpop.f32.mrb[2].mxu1  ;;  %v450_v61 = vadd.f32 %v449_v49, %v270_v47  ;;  %v491_v62 = vadd.f32 %v490_v50, %v265_v51 }
 0x1ff   :  { %v502_v58 = vadd.f32 %v4634_v56, %v274_v48  ;;  %v453_v59 = vpop.f32.mrb[7].mxu0  ;;  %v493_v60 = vpop.f32.mrb[3].mxu1  ;;  %v452_v16 = vadd.f32 %v451_v55, %v272_v15 }
 0x200   :  { %v454_v63 = vadd.f32 %v453_v59, %v273_v52  ;;  %v494_v2 = vadd.f32 %v493_v60, %v268_v53 }
 0x201   :  { %v6053_v3 = vpack.c.bf16 %v502_v58, %v499_v57 }
 0x202   :  { %v5054_v7 = vpack.c.bf16 %v454_v63, %v450_v61  ;;  %v6062_v8 = vpack.c.bf16 %v494_v2, %v491_v62 }
 0x204   :  { %5055 = vmatprep.subr.bf16.mxu1 %v5054_v7  ;;  %5068 = vmatprep.subr.msk.bf16.mxu0 %vm6058_vm5, %v6062_v8 }
 0x205   :  { %5057 = vmatpush3.bf16.xpose.msra.mxu1 %v5054_v7  ;;  %5071 = vmatpush3.bf16.msk.msra.mxu0 %vm6058_vm5, %v6062_v8 }
 0x206   :  { %5059 = vmatprep.subr.bf16.mxu1 %v6024_v43  ;;  %5074 = vmatprep.subr.msk.bf16.mxu0 %vm6058_vm5, %v6053_v3 }
 0x209   :  { %5077 = vmatpush3.bf16.msk.msra.mxu0 %vm6058_vm5, %v6053_v3 }
 0x20a   :  { %5080 = vmatprep.subr.msk.bf16.mxu0 %vm6080_vm6, %v6062_v8 }
 0x20c   :  { %4644 = vmatmul.mubr.msk.f32.vlgmr.msra.gmra.mrb[4].mxu1 %vm6009_vm2, %v442_v12 }
 0x20d   :  { %4646 = vmatprep.mubr.msk.f32.mxu1 %vm6009_vm2, %v448_v13  ;;  %5061 = vmatpush3.bf16.xpose.msra.mxu1 %v6024_v43 }
 0x20e   :  { %5063 = vmatprep.subr.bf16.mxu1 %v5054_v7 }
 0x210   :  { %4647 = vmatmul.mubr.msk.f32.gmra.mrb[6].mxu1 %vm6009_vm2, %v452_v16 }
 0x211   :  { %4657 = vmatprep.mubr.msk.f32.mxu1 %vm6049_vm4, %v6013_v35 }
 0x215   :  { %5065 = vmatpush3.bf16.xpose.msra.mxu1 %v5054_v7 }
 0x216   :  { %5091 = vmatprep.subr.bf16.mxu1 %v6024_v43 }
 0x21c   :  { %4658 = vmatmul.mubr.msk.f32.vlgmr.msra.gmra.mrb[8].mxu1 %vm6049_vm4, %v442_v12 }
 0x21d   :  { %4660 = vmatprep.mubr.msk.f32.mxu1 %vm6049_vm4, %v448_v13  ;;  %5093 = vmatpush3.bf16.xpose.msra.mxu1 %v6024_v43 }
 0x21e   :  { %5095 = vmatprep.subr.bf16.mxu1 %v5054_v7 }
 0x220   :  { %4661 = vmatmul.mubr.msk.f32.gmra.mrb[10].mxu1 %vm6049_vm4, %v452_v16 }
 0x221   :  { %4699 = vmatprep.mubr.msk.f32.mxu1 %vm6115_vm8, %v6013_v35 }
 0x225   :  { %5097 = vmatpush3.bf16.xpose.msra.mxu1 %v5054_v7 }
 0x226   :  { %5111 = vmatprep.subr.bf16.mxu1 %v6024_v43 }
 0x22c   :  { %4700 = vmatmul.mubr.msk.f32.vlgmr.msra.gmra.mrb[12].mxu1 %vm6115_vm8, %v442_v12 }
 0x22d   :  { %4702 = vmatprep.mubr.msk.f32.mxu1 %vm6115_vm8, %v448_v13  ;;  %5113 = vmatpush3.bf16.xpose.msra.mxu1 %v6024_v43 }
 0x22e   :  { %5115 = vmatprep.subr.bf16.mxu1 %v5054_v7 }
 0x230   :  { %4703 = vmatmul.mubr.msk.f32.gmra.mrb[14].mxu1 %vm6115_vm8, %v452_v16 }
 0x231   :  { %4727 = vmatprep.mubr.msk.f32.mxu1 %vm6133_vm10, %v6013_v35  ;;  %v6157_v35 = vsel %vm140_vm11, 0.0, %v5694_v27 }
 0x235   :  { %5117 = vmatpush3.bf16.xpose.msra.mxu1 %v5054_v7 }
 0x23c   :  { %4728 = vmatmul.mubr.msk.f32.vlgmr.msra.gmra.mrb[16].mxu1 %vm6133_vm10, %v442_v12 }
 0x23d   :  { %4730 = vmatprep.mubr.msk.f32.mxu1 %vm6133_vm10, %v448_v13 }
 0x240   :  { %4731 = vmatmul.mubr.msk.f32.gmra.mrb[18].mxu1 %vm6133_vm10, %v452_v16 }
 0x2df   :  { %v4645_v18 = vpop.f32.mrb[4].mxu1 }
 0x2e0   :  { %v575_v20 = vpop.f32.mrb[5].mxu1  ;;  %v6182_v48 = vadd.f32 %v4645_v18, %v6157_v35 }
 0x2e1   :  { %v6187_v50 = vadd.f32 %v575_v20, %v6159_v37 }
 0x2e2   :  { %v598_v53 = vsel %vm594_vm15, %v6182_v48, -inf }
 0x2e3   :  { %v4648_v21 = vpop.f32.mrb[6].mxu1  ;;  %v595_v56 = vsel %vm594_vm15, %v6187_v50, -inf }
 0x2e4   :  { %v585_v5 = vpop.f32.mrb[7].mxu1  ;;  %v6191_v52 = vadd.f32 %v4648_v21, %v6171_v42 }
 0x2e5   :  { %v6196_v55 = vadd.f32 %v585_v5, %v6175_v45 }
 0x2e6   :  { %v604_v57 = vsel %vm594_vm15, %v6191_v52, -inf }
 0x2e7   :  { %v601_v59 = vsel %vm594_vm15, %v6196_v55, -inf }
 0x2ef   :  { %v4659_v36 = vpop.f32.mrb[8].mxu1 }
 0x2f0   :  { %v6163_v38 = vadd.f32 %v4659_v36, %v6157_v35  ;;  %v713_v39 = vpop.f32.mrb[9].mxu1 }
 0x2f1   :  { %v6167_v40 = vadd.f32 %v713_v39, %v6159_v37 }
 0x2f2   :  { %v735_v41 = vsel %vm594_vm15, %v6163_v38, -inf }
 0x2f3   :  { %736 = vmax.xlane.f32.xlu1 %v735_v41  ;;  %v4662_v43 = vpop.f32.mrb[10].mxu1  ;;  %v732_v44 = vsel %vm594_vm15, %v6167_v40, -inf }
 0x2f4   :  { %v6178_v46 = vadd.f32 %v4662_v43, %v6171_v42  ;;  %v723_v29 = vpop.f32.mrb[11].mxu1  ;;  %733 = vmax.xlane.f32.xlu0 %v732_v44 }
 0x2f5   :  { %v724_v47 = vadd.f32 %v723_v29, %v6175_v45 }
 0x2f6   :  { %v741_v49 = vsel %vm594_vm15, %v6178_v46, -inf }
 0x2f7   :  { %742 = vmax.xlane.f32.xlu1 %v741_v49  ;;  %v738_v51 = vsel %vm594_vm15, %v724_v47, -inf }
 0x2f8   :  { %739 = vmax.xlane.f32.xlu0 %v738_v51 }
 0x2fb   :  { %599 = vmax.xlane.f32.xlu1 %v598_v53 }
 0x2fc   :  { %596 = vmax.xlane.f32.xlu0 %v595_v56 }
 0x2ff   :  { %605 = vmax.xlane.f32.xlu1 %v604_v57  ;;  %v4701_v58 = vpop.f32.mrb[12].mxu1 }
 0x300   :  { %v6205_v60 = vadd.f32 %v4701_v58, %v6157_v35  ;;  %v1044_v61 = vpop.f32.mrb[13].mxu1  ;;  %602 = vmax.xlane.f32.xlu0 %v601_v59 }
 0x301   :  { %v6208_v62 = vadd.f32 %v1044_v61, %v6159_v37 }
 0x302   :  { %v1066_v63 = vsel %vm594_vm15, %v6205_v60, -inf }
 0x303   :  { %1067 = vmax.xlane.f32.xlu1 %v1066_v63  ;;  %v4704_v2 = vpop.f32.mrb[14].mxu1  ;;  %v1063_v7 = vsel %vm594_vm15, %v6208_v62, -inf }
 0x304   :  { %v6215_v9 = vadd.f32 %v4704_v2, %v6171_v42  ;;  %v1054_v11 = vpop.f32.mrb[15].mxu1  ;;  %1064 = vmax.xlane.f32.xlu0 %v1063_v7 }
 0x305   :  { %v6218_v12 = vadd.f32 %v1054_v11, %v6175_v45 }
 0x306   :  { %v1072_v13 = vsel %vm594_vm15, %v6215_v9, -inf }
 0x307   :  { %1073 = vmax.xlane.f32.xlu1 %v1072_v13  ;;  %v1069_v15 = vsel %vm594_vm15, %v6218_v12, -inf }
 0x308   :  { %1070 = vmax.xlane.f32.xlu0 %v1069_v15 }
 0x30f   :  { %v4729_v16 = vpop.f32.mrb[16].mxu1 }
 0x310   :  { %v6225_v18 = vadd.f32 %v4729_v16, %v6157_v35  ;;  %v1282_v20 = vpop.f32.mrb[17].mxu1 }
 0x311   :  { %v6228_v21 = vadd.f32 %v1282_v20, %v6159_v37 }
 0x312   :  { %v1304_v22 = vsel %vm594_vm15, %v6225_v18, -inf }
 0x313   :  { %1305 = vmax.xlane.f32.xlu1 %v1304_v22  ;;  %v4732_v5 = vpop.f32.mrb[18].mxu1  ;;  %v1301_v23 = vsel %vm594_vm15, %v6228_v21, -inf }
 0x314   :  { %v6235_v24 = vadd.f32 %v4732_v5, %v6171_v42  ;;  %v1292_v6 = vpop.f32.mrb[19].mxu1  ;;  %1302 = vmax.xlane.f32.xlu0 %v1301_v23 }
 0x315   :  { %v6238_v31 = vadd.f32 %v1292_v6, %v6175_v45 }
 0x316   :  { %v1310_v32 = vsel %vm594_vm15, %v6235_v24, -inf }
 0x317   :  { %1311 = vmax.xlane.f32.xlu1 %v1310_v32  ;;  %v1307_v33 = vsel %vm594_vm15, %v6238_v31, -inf }
 0x318   :  { %1308 = vmax.xlane.f32.xlu0 %v1307_v33 }
 0x380   :  { %v737_v27 = vpop.xlane.xlu1 %736 }
 0x381   :  { %v745_v36 = vsub.f32 %v6163_v38, %v737_v27  ;;  %v734_v39 = vpop.xlane.xlu0 %733 }
 0x382   :  { %v744_v41 = vsub.f32 %v6167_v40, %v734_v39 }
 0x383   :  { %v750_v43 = vmul.f32 1.442695, %v745_v36 }
 0x384   :  { %v748_v44 = vmul.f32 1.442695, %v744_v41  ;;  %v743_v29 = vpop.xlane.xlu1 %742 }
 0x385   :  { %5390 = vpow2.f32 %v750_v43  ;;  %v747_v49 = vsub.f32 %v6178_v46, %v743_v29  ;;  %v740_v51 = vpop.xlane.xlu0 %739 }
 0x386   :  { %5392 = vpow2.f32 %v748_v44  ;;  %v746_v53 = vsub.f32 %v724_v47, %v740_v51 }
 0x387   :  { %v754_v56 = vmul.f32 1.442695, %v747_v49 }
 0x388   :  { %v752_v57 = vmul.f32 1.442695, %v746_v53  ;;  %v600_v58 = vpop.xlane.xlu1 %599 }
 0x389   :  { %5394 = vpow2.f32 %v754_v56  ;;  %v608_v59 = vsub.f32 %v6182_v48, %v600_v58  ;;  %v597_v61 = vpop.xlane.xlu0 %596 }
 0x38a   :  { %5396 = vpow2.f32 %v752_v57  ;;  %v607_v38 = vsub.f32 %v6187_v50, %v597_v61 }
 0x38b   :  { %v613_v40 = vmul.f32 1.442695, %v608_v59 }
 0x38c   :  { %v611_v63 = vmul.f32 1.442695, %v607_v38  ;;  %v606_v2 = vpop.xlane.xlu1 %605 }
 0x38d   :  { %5398 = vpow2.f32 %v613_v40  ;;  %v610_v7 = vsub.f32 %v6191_v52, %v606_v2  ;;  %v603_v46 = vpop.xlane.xlu0 %602 }
 0x38e   :  { %5400 = vpow2.f32 %v611_v63  ;;  %v609_v47 = vsub.f32 %v6196_v55, %v603_v46 }
 0x38f   :  { %v6251_v11 = vpop.eup %5390  ;;  %v617_v13 = vmul.f32 1.442695, %v610_v7 }
 0x390   :  { %v6253_v15 = vpop.eup %5392  ;;  %v615_v48 = vmul.f32 1.442695, %v609_v47  ;;  %v1068_v16 = vpop.xlane.xlu1 %1067  ;;  %v759_v50 = vsel %vm594_vm15, %v6251_v11, 0.0 }
 0x391   :  { %5402 = vpow2.f32 %v617_v13  ;;  %v1076_v20 = vsub.f32 %v6205_v60, %v1068_v16  ;;  %760 = vadd.xlane.f32.xlu1 %v759_v50  ;;  %v1065_v22 = vpop.xlane.xlu0 %1064  ;;  %v756_v52 = vsel %vm594_vm15, %v6253_v15, 0.0 }
 0x392   :  { %5404 = vpow2.f32 %v615_v48  ;;  %v1075_v55 = vsub.f32 %v6208_v62, %v1065_v22  ;;  %757 = vadd.xlane.f32.xlu0 %v756_v52 }
 0x393   :  { %v6261_v5 = vpop.eup %5394  ;;  %v1081_v23 = vmul.f32 1.442695, %v1076_v20 }
 0x394   :  { %v6263_v6 = vpop.eup %5396  ;;  %v1079_v32 = vmul.f32 1.442695, %v1075_v55  ;;  %v1074_v33 = vpop.xlane.xlu1 %1073  ;;  %v765_v27 = vsel %vm594_vm15, %v6261_v5, 0.0 }
 0x395   :  { %5406 = vpow2.f32 %v1081_v23  ;;  %v1078_v60 = vsub.f32 %v6215_v9, %v1074_v33  ;;  %766 = vadd.xlane.f32.xlu1 %v765_v27  ;;  %v1071_v36 = vpop.xlane.xlu0 %1070  ;;  %v762_v39 = vsel %vm594_vm15, %v6263_v6, 0.0 }
 0x396   :  { %5408 = vpow2.f32 %v1079_v32  ;;  %v1077_v62 = vsub.f32 %v6218_v12, %v1071_v36  ;;  %763 = vadd.xlane.f32.xlu0 %v762_v39 }
 0x397   :  { %v6271_v41 = vpop.eup %5398  ;;  %v1085_v43 = vmul.f32 1.442695, %v1078_v60 }
 0x398   :  { %v6273_v44 = vpop.eup %5400  ;;  %v1083_v29 = vmul.f32 1.442695, %v1077_v62  ;;  %v622_v49 = vsel %vm594_vm15, %v6271_v41, 0.0 }
 0x399   :  { %5410 = vpow2.f32 %v1085_v43  ;;  %623 = vadd.xlane.f32.xlu1 %v622_v49  ;;  %v619_v9 = vsel %vm594_vm15, %v6273_v44, 0.0 }
 0x39a   :  { %5412 = vpow2.f32 %v1083_v29  ;;  %620 = vadd.xlane.f32.xlu0 %v619_v9 }
 0x39b   :  { %v6279_v51 = vpop.eup %5402 }
 0x39c   :  { %v6281_v12 = vpop.eup %5404  ;;  %v628_v53 = vsel %vm594_vm15, %v6279_v51, 0.0 }
 0x39d   :  { %629 = vadd.xlane.f32.xlu1 %v628_v53  ;;  %v625_v56 = vsel %vm594_vm15, %v6281_v12, 0.0 }
 0x39e   :  { %626 = vadd.xlane.f32.xlu0 %v625_v56 }
 0x39f   :  { %v6287_v57 = vpop.eup %5406 }
 0x3a0   :  { %v6289_v58 = vpop.eup %5408  ;;  %v1306_v59 = vpop.xlane.xlu1 %1305  ;;  %v1090_v61 = vsel %vm594_vm15, %v6287_v57, 0.0 }
 0x3a1   :  { %v1314_v38 = vsub.f32 %v6225_v18, %v1306_v59  ;;  %1091 = vadd.xlane.f32.xlu1 %v1090_v61  ;;  %v1303_v40 = vpop.xlane.xlu0 %1302  ;;  %v1087_v63 = vsel %vm594_vm15, %v6289_v58, 0.0 }
 0x3a2   :  { %v1313_v2 = vsub.f32 %v6228_v21, %v1303_v40  ;;  %1088 = vadd.xlane.f32.xlu0 %v1087_v63 }
 0x3a3   :  { %v6297_v7 = vpop.eup %5410  ;;  %v1319_v46 = vmul.f32 1.442695, %v1314_v38 }
 0x3a4   :  { %v6299_v47 = vpop.eup %5412  ;;  %v1317_v13 = vmul.f32 1.442695, %v1313_v2  ;;  %v1312_v48 = vpop.xlane.xlu1 %1311  ;;  %v1096_v16 = vsel %vm594_vm15, %v6297_v7, 0.0 }
 0x3a5   :  { %5414 = vpow2.f32 %v1319_v46  ;;  %v1316_v18 = vsub.f32 %v6235_v24, %v1312_v48  ;;  %1097 = vadd.xlane.f32.xlu1 %v1096_v16  ;;  %v1309_v50 = vpop.xlane.xlu0 %1308  ;;  %v1093_v20 = vsel %vm594_vm15, %v6299_v47, 0.0 }
 0x3a6   :  { %5416 = vpow2.f32 %v1317_v13  ;;  %v1315_v21 = vsub.f32 %v6238_v31, %v1309_v50  ;;  %1094 = vadd.xlane.f32.xlu0 %v1093_v20 }
 0x3a7   :  { %v1323_v22 = vmul.f32 1.442695, %v1316_v18 }
 0x3a8   :  { %v1321_v52 = vmul.f32 1.442695, %v1315_v21 }
 0x3a9   :  { %5418 = vpow2.f32 %v1323_v22 }
 0x3aa   :  { %5420 = vpow2.f32 %v1321_v52 }
 0x3af   :  { %v6307_v55 = vpop.eup %5414 }
 0x3b0   :  { %v6309_v23 = vpop.eup %5416  ;;  %v1328_v24 = vsel %vm594_vm15, %v6307_v55, 0.0 }
 0x3b1   :  { %1329 = vadd.xlane.f32.xlu1 %v1328_v24  ;;  %v1325_v32 = vsel %vm594_vm15, %v6309_v23, 0.0 }
 0x3b2   :  { %1326 = vadd.xlane.f32.xlu0 %v1325_v32 }
 0x3b3   :  { %v6315_v33 = vpop.eup %5418 }
 0x3b4   :  { %v6317_v31 = vpop.eup %5420  ;;  %v1334_v27 = vsel %vm594_vm15, %v6315_v33, 0.0 }
 0x3b5   :  { %1335 = vadd.xlane.f32.xlu1 %v1334_v27  ;;  %v1331_v60 = vsel %vm594_vm15, %v6317_v31, 0.0 }
 0x3b6   :  { %1332 = vadd.xlane.f32.xlu0 %v1331_v60 }
 0x41e   :  { %v761_v36 = vpop.xlane.xlu1 %760 }
 0x41f   :  { %5422 = vrcp.f32 %v761_v36  ;;  %v758_v39 = vpop.xlane.xlu0 %757 }
 0x420   :  { %5424 = vrcp.f32 %v758_v39  ;;  %v5286_v39 = vld [vmem:[%s7295_s5] sm:$0xff]  }
 0x422   :  { %v767_v62 = vpop.xlane.xlu1 %766 }
 0x423   :  { %5426 = vrcp.f32 %v767_v62  ;;  %v764_v43 = vpop.xlane.xlu0 %763 }
 0x424   :  { %5428 = vrcp.f32 %v764_v43 }
 0x426   :  { %v624_v29 = vpop.xlane.xlu1 %623 }
 0x427   :  { %5430 = vrcp.f32 %v624_v29  ;;  %v621_v49 = vpop.xlane.xlu0 %620 }
 0x428   :  { %5432 = vrcp.f32 %v621_v49  ;;  %v5287_v49 = vld [vmem:[%s7295_s5 + $0x8] sm:$0xff]  }
 0x429   :  { %v5423_v9 = vpop.eup %5422 }
 0x42a   :  { %v5425_v53 = vpop.eup %5424  ;;  %v630_v56 = vpop.xlane.xlu1 %629  ;;  %v773_v38 = vmul.f32 %v5423_v9, %v6251_v11 }
 0x42b   :  { %5434 = vrcp.f32 %v630_v56  ;;  %v627_v59 = vpop.xlane.xlu0 %626  ;;  %v772_v61 = vmul.f32 %v5425_v53, %v6253_v15 }
 0x42c   :  { %5436 = vrcp.f32 %v627_v59  ;;  %v5292_v59 = vld [vmem:[%s7295_s5 + $0x30] sm:$0xff]  }
 0x42d   :  { %v5427_v40 = vpop.eup %5426  ;;  %4671 = vmatprep.mubr.msk.f32.mxu0 %vm594_vm15, %v772_v61  ;;  %v5293_v61 = vld [vmem:[%s7295_s5 + $0x38] sm:$0xff]  }
 0x42e   :  { %v5429_v63 = vpop.eup %5428  ;;  %v1092_v2 = vpop.xlane.xlu1 %1091  ;;  %4672 = vmatmul.mubr.msk.f32.vlgmr.msra.gmra.mrb[8].mxu0 %vm594_vm15, %v773_v38  ;;  %v775_v11 = vmul.f32 %v5427_v40, %v6261_v5 }
 0x42f   :  { %5438 = vrcp.f32 %v1092_v2  ;;  %5083 = vmatpush3.bf16.msk.msra.mxu0 %vm6080_vm6, %v6062_v8  ;;  %v1089_v46 = vpop.xlane.xlu0 %1088  ;;  %v774_v13 = vmul.f32 %v5429_v63, %v6263_v6 }
 0x430   :  { %5086 = vmatprep.subr.msk.bf16.mxu0 %vm6080_vm6, %v6053_v3  ;;  %5440 = vrcp.f32 %v1089_v46 }
 0x431   :  { %v5431_v15 = vpop.eup %5430  ;;  %4674 = vmatprep.mubr.msk.f32.mxu0 %vm594_vm15, %v774_v13 }
 0x432   :  { %v5433_v16 = vpop.eup %5432  ;;  %v1098_v18 = vpop.xlane.xlu1 %1097  ;;  %4675 = vmatmul.mubr.msk.f32.gmra.mrb[10].mxu0 %vm594_vm15, %v775_v11  ;;  %v636_v50 = vmul.f32 %v5431_v15, %v6271_v41  ;;  %v1470_v11 = vld [vmem:[%s7296_s6 + $0x10] sm:$0xff] }
 0x433   :  { %5442 = vrcp.f32 %v1098_v18  ;;  %5089 = vmatpush3.bf16.msk.msra.mxu0 %vm6080_vm6, %v6053_v3  ;;  %v1095_v5 = vpop.xlane.xlu0 %1094  ;;  %v635_v6 = vmul.f32 %v5433_v16, %v6273_v44  ;;  %v1468_v16 = vld [vmem:[%s7296_s6] sm:$0xff]  ;;  %v1471_v18 = vld [vmem:[%s7296_s6 + $0x18] sm:$0xff] }
 0x434   :  { %5100 = vmatprep.subr.msk.bf16.mxu0 %vm6339_vm0, %v6062_v8  ;;  %5444 = vrcp.f32 %v1095_v5 }
 0x435   :  { %v5435_v20 = vpop.eup %5434  ;;  %4685 = vmatprep.mubr.msk.f32.mxu0 %vm594_vm15, %v635_v6 }
 0x436   :  { %v5437_v21 = vpop.eup %5436  ;;  %4686 = vmatmul.mubr.msk.f32.vlgmr.msra.gmra.mrb[8].mxu0 %vm594_vm15, %v636_v50  ;;  %v638_v41 = vmul.f32 %v5435_v20, %v6279_v51  ;;  %v1469_v20 = vld [vmem:[%s7296_s6 + $0x8] sm:$0xff] }
 0x437   :  { %5103 = vmatpush3.bf16.msk.msra.mxu0 %vm6339_vm0, %v6062_v8  ;;  %v637_v22 = vmul.f32 %v5437_v21, %v6281_v12 }
 0x438   :  { %5106 = vmatprep.subr.msk.bf16.mxu0 %vm6339_vm0, %v6053_v3 }
 0x439   :  { %v5439_v44 = vpop.eup %5438  ;;  %4688 = vmatprep.mubr.msk.f32.mxu0 %vm594_vm15, %v637_v22 }
 0x43a   :  { %v5441_v24 = vpop.eup %5440  ;;  %4689 = vmatmul.mubr.msk.f32.gmra.mrb[10].mxu0 %vm594_vm15, %v638_v41  ;;  %v1104_v51 = vmul.f32 %v5439_v44, %v6287_v57 }
 0x43b   :  { %5109 = vmatpush3.bf16.msk.msra.mxu0 %vm6339_vm0, %v6053_v3  ;;  %v1103_v12 = vmul.f32 %v5441_v24, %v6289_v58 }
 0x43c   :  { %5120 = vmatprep.subr.msk.bf16.mxu0 %vm6366_vm1, %v6062_v8 }
 0x43d   :  { %v5443_v32 = vpop.eup %5442  ;;  %4713 = vmatprep.mubr.msk.f32.mxu0 %vm594_vm15, %v1103_v12 }
 0x43e   :  { %v5445_v27 = vpop.eup %5444  ;;  %v1330_v60 = vpop.xlane.xlu1 %1329  ;;  %4714 = vmatmul.mubr.msk.f32.vlgmr.msra.gmra.mrb[8].mxu0 %vm594_vm15, %v1104_v51  ;;  %v1106_v57 = vmul.f32 %v5443_v32, %v6297_v7 }
 0x43f   :  { %5446 = vrcp.f32 %v1330_v60  ;;  %5123 = vmatpush3.bf16.msk.msra.mxu0 %vm6366_vm1, %v6062_v8  ;;  %v1327_v36 = vpop.xlane.xlu0 %1326  ;;  %v1105_v58 = vmul.f32 %v5445_v27, %v6299_v47  ;;  %v5294_v27 = vld [vmem:[%s7299_s9] sm:$0xff]   ;;  %v5295_v60 = vld [vmem:[%s7299_s9 + $0x8] sm:$0xff]  }
 0x440   :  { %5126 = vmatprep.subr.msk.bf16.mxu0 %vm6366_vm1, %v6053_v3  ;;  %5448 = vrcp.f32 %v1327_v36  ;;  %4767 = vmatprep.subr.bf16.mxu1 %v5294_v27  ;;  %v5296_v36 = vld [vmem:[%s7299_s9 + $0x10] sm:$0xff]  }
 0x441   :  { %4716 = vmatprep.mubr.msk.f32.mxu0 %vm594_vm15, %v1105_v58  ;;  %4768 = vmatpush3.bf16.msra.mxu1 %v5294_v27  ;;  %v5297_v58 = vld [vmem:[%s7299_s9 + $0x18] sm:$0xff]  }
 0x442   :  { %v1336_v62 = vpop.xlane.xlu1 %1335  ;;  %4717 = vmatmul.mubr.msk.f32.gmra.mrb[10].mxu0 %vm594_vm15, %v1106_v57  ;;  %4769 = vmatprep.subr.bf16.mxu1 %v5295_v60  ;;  %v5298_v57 = vld [vmem:[%s7299_s9 + $0x20] sm:$0xff]  }
 0x443   :  { %5450 = vrcp.f32 %v1336_v62  ;;  %5129 = vmatpush3.bf16.msk.msra.mxu0 %vm6366_vm1, %v6053_v3  ;;  %v1333_v8 = vpop.xlane.xlu0 %1332  ;;  %v5300_v62 = vld [vmem:[%s7299_s9 + $0x30] sm:$0xff]  }
 0x444   :  { %5452 = vrcp.f32 %v1333_v8  ;;  %4747 = vmatprep.subr.bf16.mxu0 %v5286_v39  ;;  %v5301_v8 = vld [vmem:[%s7299_s9 + $0x38] sm:$0xff]  }
 0x445   :  { %4770 = vmatpush3.bf16.msra.mxu1 %v5295_v60 }
 0x446   :  { %4771 = vmatprep.subr.bf16.mxu1 %v5296_v36 }
 0x449   :  { %v5447_v47 = vpop.eup %5446  ;;  %4772 = vmatpush3.bf16.msra.mxu1 %v5296_v36  ;;  %v1578_v36 = vld [vmem:[%s7298_s8 + $0x8] sm:$0xff] }
 0x44a   :  { %v5449_v43 = vpop.eup %5448  ;;  %v1342_v29 = vmul.f32 %v5447_v47, %v6307_v55  ;;  %v5288_v55 = vld [vmem:[%s7295_s5 + $0x10] sm:$0xff]   ;;  %4773 = vmatprep.subr.bf16.mxu1 %v5297_v58 }
 0x44b   :  { %v1341_v7 = vmul.f32 %v5449_v43, %v6309_v23  ;;  %v5289_v23 = vld [vmem:[%s7295_s5 + $0x18] sm:$0xff]  }
 0x44d   :  { %v5451_v9 = vpop.eup %5450  ;;  %4741 = vmatprep.mubr.msk.f32.mxu0 %vm594_vm15, %v1341_v7  ;;  %4774 = vmatpush3.bf16.msra.mxu1 %v5297_v58 }
 0x44e   :  { %v5453_v53 = vpop.eup %5452  ;;  %4742 = vmatmul.mubr.msk.f32.vlgmr.msra.gmra.mrb[8].mxu0 %vm594_vm15, %v1342_v29  ;;  %v1344_v56 = vmul.f32 %v5451_v9, %v6315_v33  ;;  %v5290_v33 = vld [vmem:[%s7295_s5 + $0x20] sm:$0xff]   ;;  %4775 = vmatprep.subr.bf16.mxu1 %v5298_v57 }
 0x44f   :  { %v1343_v3 = vmul.f32 %v5453_v53, %v6317_v31  ;;  %4748 = vmatpush3.bf16.msra.mxu0 %v5286_v39  ;;  %v5291_v31 = vld [vmem:[%s7295_s5 + $0x28] sm:$0xff]  }
 0x450   :  { %4749 = vmatprep.subr.bf16.mxu0 %v5287_v49  ;;  %v5299_v39 = vld [vmem:[%s7299_s9 + $0x28] sm:$0xff]  }
 0x451   :  { %4744 = vmatprep.mubr.msk.f32.mxu0 %vm594_vm15, %v1343_v3  ;;  %4776 = vmatpush3.bf16.msra.mxu1 %v5298_v57 }
 0x452   :  { %4745 = vmatmul.mubr.msk.f32.gmra.mrb[10].mxu0 %vm594_vm15, %v1344_v56  ;;  %4777 = vmatprep.subr.bf16.mxu1 %v5299_v39 }
 0x453   :  { %4750 = vmatpush3.bf16.msra.mxu0 %v5287_v49 }
 0x454   :  { %4751 = vmatprep.subr.bf16.mxu0 %v5288_v55 }
 0x455   :  { %4778 = vmatpush3.bf16.msra.mxu1 %v5299_v39 }
 0x456   :  { %4779 = vmatprep.subr.bf16.mxu1 %v5300_v62 }
 0x457   :  { %4752 = vmatpush3.bf16.msra.mxu0 %v5288_v55 }
 0x458   :  { %4753 = vmatprep.subr.bf16.mxu0 %v5289_v23 }
 0x459   :  { %4780 = vmatpush3.bf16.msra.mxu1 %v5300_v62  ;;  %v1576_v62 = vld [vmem:[%s7297_s7 + $0x18] sm:$0xff] }
 0x45a   :  { %4781 = vmatprep.subr.bf16.mxu1 %v5301_v8 }
 0x45b   :  { %4754 = vmatpush3.bf16.msra.mxu0 %v5289_v23 }
 0x45c   :  { %4755 = vmatprep.subr.bf16.mxu0 %v5290_v33 }
 0x45d   :  { %4782 = vmatpush3.bf16.msra.mxu1 %v5301_v8 }
 0x45f   :  { %4756 = vmatpush3.bf16.msra.mxu0 %v5290_v33 }
 0x460   :  { %4757 = vmatprep.subr.bf16.mxu0 %v5291_v31 }
 0x463   :  { %4758 = vmatpush3.bf16.msra.mxu0 %v5291_v31 }
 0x464   :  { %4759 = vmatprep.subr.bf16.mxu0 %v5292_v59 }
 0x467   :  { %4760 = vmatpush3.bf16.msra.mxu0 %v5292_v59 }
 0x468   :  { %4761 = vmatprep.subr.bf16.mxu0 %v5293_v61 }
 0x46b   :  { %4762 = vmatpush3.bf16.msra.mxu0 %v5293_v61 }
 0x521   :  { %v4743_v38 = vpop.f32.mrb[8].mxu0 }
 0x522   :  { %v1427_v40 = vpop.f32.mrb[9].mxu0 }
 0x523   :  { %v1450_v63 = vpack.c.bf16 %v4743_v38, %v1427_v40 }
 0x525   :  { %v4746_v2 = vpop.f32.mrb[10].mxu0  ;;  %4763 = vmatprep.mubr.bf16.mxu0 %v1450_v63 }
 0x526   :  { %v1437_v46 = vpop.f32.mrb[11].mxu0 }
 0x527   :  { %v1451_v13 = vpack.c.bf16 %v4746_v2, %v1437_v46 }
 0x529   :  { %4764 = vmatmul.mubr.bf16.vlgmr.msra.gmra.mrb[12].mxu0 %v1451_v13 }
 0x5fc   :  { %v4765_v15 = vpop.f32.mrb[12].mxu0 }
 0x5fd   :  { %v1563_v5 = vadd.f32 %v4765_v15, %v1470_v11  ;;  %v1554_v6 = vpop.f32.mrb[13].mxu0 }
 0x5fe   :  { %v4766_v50 = vpop.f32.mrb[14].mxu0  ;;  %v1555_v22 = vadd.f32 %v1554_v6, %v1468_v16 }
 0x5ff   :  { %v6439_v21 = vadd.f32 %v1563_v5, %v5987_v25  ;;  %v1566_v41 = vadd.f32 %v4766_v50, %v1471_v18  ;;  %v1557_v44 = vpop.f32.mrb[15].mxu0 }
 0x600   :  { %v1558_v12 = vadd.f32 %v1557_v44, %v1469_v20  ;;  %v6446_v51 = vadd.f32 %v1555_v22, %v5979_v14 }
 0x601   :  { %v6442_v24 = vadd.f32 %v1566_v41, %v5989_v26  ;;  %1585 = vadd.xlane.f32.xlu0 %v6439_v21  ;;  %v1595_v14 = vmul.f32 %v6439_v21, %v6439_v21  ;;  %v1573_v41 = vld [vmem:[%s7297_s7] sm:$0xff] }
 0x602   :  { %v6450_v32 = vadd.f32 %v1558_v12, %v5981_v0  ;;  %v1593_v25 = vmul.f32 %v6446_v51, %v6446_v51 }
 0x603   :  { %1587 = vadd.xlane.f32.xlu1 %v6442_v24  ;;  %v1596_v0 = vmul.f32 %v6442_v24, %v6442_v24 }
 0x604   :  { %v1594_v26 = vmul.f32 %v6450_v32, %v6450_v32 }
 0x605   :  { %1581 = vadd.xlane.f32.xlu0 %v6446_v51 }
 0x607   :  { %1583 = vadd.xlane.f32.xlu1 %v6450_v32 }
 0x609   :  { %1597 = vadd.xlane.f32.xlu0 %v1593_v25 }
 0x60b   :  { %1599 = vadd.xlane.f32.xlu1 %v1594_v26  ;;  %v1574_v26 = vld [vmem:[%s7297_s7 + $0x8] sm:$0xff] }
 0x60d   :  { %1601 = vadd.xlane.f32.xlu0 %v1595_v14 }
 0x60f   :  { %1603 = vadd.xlane.f32.xlu1 %v1596_v0 }
 0x68e   :  { %v1586_v47 = vpop.xlane.xlu0 %1585 }
 0x68f   :  { %v1591_v3 = vmul.f32 0.03125, %v1586_v47 }
 0x690   :  { %v1588_v43 = vpop.xlane.xlu1 %1587 }
 0x691   :  { %v1592_v23 = vmul.f32 0.03125, %v1588_v43  ;;  %v1611_v40 = vmul.f32 %v1591_v3, %v1591_v3  ;;  %v1619_v14 = vsub.f32 %v6439_v21, %v1591_v3 }
 0x692   :  { %v1582_v7 = vpop.xlane.xlu0 %1581 }
 0x693   :  { %v1589_v29 = vmul.f32 0.03125, %v1582_v7  ;;  %v1612_v13 = vmul.f32 %v1592_v23, %v1592_v23  ;;  %v1620_v58 = vsub.f32 %v6442_v24, %v1592_v23  ;;  %v1580_v24 = vld [vmem:[%s7298_s8 + $0x18] sm:$0xff]  ;;  %v5303_v23 = vld [vmem:[%s7301_s11 + $0x8] sm:$0xff]  }
 0x694   :  { %v1584_v49 = vpop.xlane.xlu1 %1583 }
 0x695   :  { %v1590_v9 = vmul.f32 0.03125, %v1584_v49  ;;  %v1609_v56 = vmul.f32 %v1589_v29, %v1589_v29  ;;  %v1617_v20 = vsub.f32 %v6446_v51, %v1589_v29  ;;  %v1577_v51 = vld [vmem:[%s7298_s8] sm:$0xff]  ;;  %v1579_v29 = vld [vmem:[%s7298_s8 + $0x10] sm:$0xff] }
 0x696   :  { %v1598_v53 = vpop.xlane.xlu0 %1597 }
 0x697   :  { %v1605_v55 = vmul.f32 0.03125, %v1598_v53  ;;  %v1610_v31 = vmul.f32 %v1590_v9, %v1590_v9  ;;  %v1618_v44 = vsub.f32 %v6450_v32, %v1590_v9  ;;  %v1575_v32 = vld [vmem:[%s7297_s7 + $0x10] sm:$0xff] }
 0x698   :  { %v1600_v33 = vpop.xlane.xlu1 %1599 }
 0x699   :  { %v1613_v59 = vsub.f32 %v1605_v55, %v1609_v56  ;;  %v1606_v61 = vmul.f32 0.03125, %v1600_v33  ;;  %v5302_v55 = vld [vmem:[%s7301_s11] sm:$0xff]   ;;  %v5304_v33 = vld [vmem:[%s7301_s11 + $0x10] sm:$0xff]  }
 0x69a   :  { %v1602_v38 = vpop.xlane.xlu0 %1601  ;;  %4787 = vmatprep.subr.bf16.mxu0 %v5302_v55 }
 0x69b   :  { %v1621_v63 = vadd.f32 1e-12, %v1613_v59  ;;  %v1614_v2 = vsub.f32 %v1606_v61, %v1610_v31  ;;  %v1607_v46 = vmul.f32 0.03125, %v1602_v38  ;;  %4788 = vmatpush3.bf16.msra.mxu0 %v5302_v55  ;;  %v5305_v31 = vld [vmem:[%s7301_s11 + $0x18] sm:$0xff]   ;;  %v5306_v59 = vld [vmem:[%s7301_s11 + $0x20] sm:$0xff]   ;;  %v5307_v61 = vld [vmem:[%s7301_s11 + $0x28] sm:$0xff]  }
 0x69c   :  { %v1604_v11 = vpop.xlane.xlu1 %1603  ;;  %4789 = vmatprep.subr.bf16.mxu0 %v5303_v23  ;;  %v5308_v38 = vld [vmem:[%s7301_s11 + $0x30] sm:$0xff]  }
 0x69d   :  { %5454 = vrsqrt.f32 %v1621_v63  ;;  %v1622_v15 = vadd.f32 1e-12, %v1614_v2  ;;  %v1615_v16 = vsub.f32 %v1607_v46, %v1611_v40  ;;  %v1608_v18 = vmul.f32 0.03125, %v1604_v11  ;;  %v5309_v40 = vld [vmem:[%s7301_s11 + $0x38] sm:$0xff]   ;;  %v1661_v63 = vld [vmem:[%s7300_s10 + $0x10] sm:$0xff]  ;;  %v1659_v2 = vld [vmem:[%s7300_s10] sm:$0xff] }
 0x69f   :  { %5456 = vrsqrt.f32 %v1622_v15  ;;  %v1623_v5 = vadd.f32 1e-12, %v1615_v16  ;;  %v1616_v6 = vsub.f32 %v1608_v18, %v1612_v13  ;;  %4790 = vmatpush3.bf16.msra.mxu0 %v5303_v23  ;;  %v1662_v13 = vld [vmem:[%s7300_s10 + $0x18] sm:$0xff]  ;;  %v1660_v16 = vld [vmem:[%s7300_s10 + $0x8] sm:$0xff] }
 0x6a0   :  { %4791 = vmatprep.subr.bf16.mxu0 %v5304_v33 }
 0x6a1   :  { %5458 = vrsqrt.f32 %v1623_v5  ;;  %v1624_v50 = vadd.f32 1e-12, %v1616_v6 }
 0x6a3   :  { %5460 = vrsqrt.f32 %v1624_v50  ;;  %4792 = vmatpush3.bf16.msra.mxu0 %v5304_v33 }
 0x6a4   :  { %4793 = vmatprep.subr.bf16.mxu0 %v5305_v31 }
 0x6a7   :  { %v5455_v22 = vpop.eup %5454  ;;  %4794 = vmatpush3.bf16.msra.mxu0 %v5305_v31 }
 0x6a8   :  { %v1629_v12 = vmul.f32 %v5455_v22, %v1617_v20  ;;  %4795 = vmatprep.subr.bf16.mxu0 %v5306_v59 }
 0x6a9   :  { %v5457_v25 = vpop.eup %5456 }
 0x6aa   :  { %v1630_v0 = vmul.f32 %v5457_v25, %v1618_v44  ;;  %v1633_v27 = vmul.f32 %v1629_v12, %v1573_v41 }
 0x6ab   :  { %v5459_v60 = vpop.eup %5458  ;;  %4796 = vmatpush3.bf16.msra.mxu0 %v5306_v59 }
 0x6ac   :  { %v1631_v57 = vmul.f32 %v5459_v60, %v1619_v14  ;;  %v1634_v39 = vmul.f32 %v1630_v0, %v1574_v26  ;;  %v6508_v47 = vadd.f32 %v1633_v27, %v1577_v51  ;;  %4797 = vmatprep.subr.bf16.mxu0 %v5307_v61 }
 0x6ad   :  { %v5461_v21 = vpop.eup %5460 }
 0x6ae   :  { %v1632_v8 = vmul.f32 %v5461_v21, %v1620_v58  ;;  %v6510_v43 = vadd.f32 %v1634_v39, %v1578_v36  ;;  %v1635_v7 = vmul.f32 %v1631_v57, %v1575_v32 }
 0x6af   :  { %4798 = vmatpush3.bf16.msra.mxu0 %v5307_v61 }
 0x6b0   :  { %v1641_v49 = vpack.c.bf16 %v6510_v43, %v6508_v47  ;;  %v1636_v9 = vmul.f32 %v1632_v8, %v1576_v62  ;;  %v6520_v53 = vadd.f32 %v1635_v7, %v1579_v29  ;;  %4799 = vmatprep.subr.bf16.mxu0 %v5308_v38 }
 0x6b2   :  { %4783 = vmatprep.mubr.bf16.mxu1 %v1641_v49  ;;  %v6522_v3 = vadd.f32 %v1636_v9, %v1580_v24 }
 0x6b3   :  { %4800 = vmatpush3.bf16.msra.mxu0 %v5308_v38 }
 0x6b4   :  { %v1642_v56 = vpack.c.bf16 %v6522_v3, %v6520_v53  ;;  %4801 = vmatprep.subr.bf16.mxu0 %v5309_v40 }
 0x6b6   :  { %4784 = vmatmul.mubr.bf16.vlgmr.msra.gmra.mrb[20].mxu1 %v1642_v56 }
 0x6b7   :  { %2195 = vmatprep.mubr.bf16.mxu1 %v5693_v30  ;;  %4802 = vmatpush3.bf16.msra.mxu0 %v5309_v40 }
 0x789   :  { %v4785_v46 = vpop.f32.mrb[20].mxu1 }
 0x78a   :  { %v1754_v11 = vadd.f32 %v4785_v46, %v1661_v63  ;;  %v1745_v15 = vpop.f32.mrb[21].mxu1 }
 0x78b   :  { %v1746_v18 = vadd.f32 %v1745_v15, %v1659_v2  ;;  %v4786_v5 = vpop.f32.mrb[22].mxu1 }
 0x78c   :  { %v1762_v6 = vmul.f32 %v1754_v11, %v1754_v11  ;;  %v1757_v50 = vadd.f32 %v4786_v5, %v1662_v13  ;;  %v1748_v20 = vpop.f32.mrb[23].mxu1  ;;  %v5312_v5 = vld [vmem:[%s7328_s3 + $0xc4] ss:$12 sps:$4 sm:$0xff]  }
 0x78d   :  { %v1760_v22 = vmul.f32 %v1746_v18, %v1746_v18  ;;  %v1749_v41 = vadd.f32 %v1748_v20, %v1660_v16  ;;  %v5310_v16 = vld [vmem:[%s7328_s3 + $0xc0] ss:$12 sps:$4 sm:$0xff]   ;;  %2163 = vmatprep.subr.bf16.mxu1 %v5312_v5 }
 0x78e   :  { %v1766_v44 = vmul.f32 %v1762_v6, %v1754_v11  ;;  %v1763_v12 = vmul.f32 %v1757_v50, %v1757_v50  ;;  %2164 = vmatpush1.bf16.msra.mxu1 %v5310_v16 }
 0x78f   :  { %v1764_v25 = vmul.f32 %v1760_v22, %v1746_v18  ;;  %v1761_v26 = vmul.f32 %v1749_v41, %v1749_v41 }
 0x790   :  { %v1770_v14 = vmul.f32 0.044715, %v1766_v44  ;;  %v1767_v0 = vmul.f32 %v1763_v12, %v1757_v50 }
 0x791   :  { %v1768_v27 = vmul.f32 0.044715, %v1764_v25  ;;  %v1765_v60 = vmul.f32 %v1761_v26, %v1749_v41  ;;  %v1816_v25 = vld [vmem:[%s7302_s12 + $0x10] sm:$0xff] }
 0x792   :  { %v1774_v51 = vadd.f32 %v1770_v14, %v1754_v11  ;;  %v1771_v36 = vmul.f32 0.044715, %v1767_v0  ;;  %v1817_v14 = vld [vmem:[%s7302_s12 + $0x18] sm:$0xff] }
 0x793   :  { %v1772_v32 = vadd.f32 %v1768_v27, %v1746_v18  ;;  %v1769_v58 = vmul.f32 0.044715, %v1765_v60 }
 0x794   :  { %v1778_v57 = vmul.f32 0.7978846, %v1774_v51  ;;  %v1775_v39 = vadd.f32 %v1771_v36, %v1757_v50 }
 0x795   :  { %v1776_v21 = vmul.f32 0.7978846, %v1772_v32  ;;  %v1773_v62 = vadd.f32 %v1769_v58, %v1749_v41  ;;  %v5318_v58 = vld [vmem:[%s7328_s3 + $0xf4] ss:$12 sps:$4 sm:$0xff]  }
 0x796   :  { %5462 = vtanh.f32 %v1778_v57  ;;  %v1779_v8 = vmul.f32 0.7978846, %v1775_v39  ;;  %v5319_v57 = vld [vmem:[%s7328_s3 + $0xc8] ss:$12 sps:$4 sm:$0xff]   ;;  %v5316_v39 = vld [vmem:[%s7328_s3 + $0xf0] ss:$12 sps:$4 sm:$0xff]  }
 0x797   :  { %5464 = vtanh.f32 %v1776_v21  ;;  %v1777_v7 = vmul.f32 0.7978846, %v1773_v62  ;;  %4807 = vmatprep.subr.bf16.mxu0 %v5319_v57  ;;  %v5322_v21 = vld [vmem:[%s7328_s3 + $0x10c] ss:$12 sps:$4 sm:$0xff]  }
 0x798   :  { %5466 = vtanh.f32 %v1779_v8  ;;  %v5323_v62 = vld [vmem:[%s7328_s3 + $0xe0] ss:$12 sps:$4 sm:$0xff]   ;;  %v5320_v8 = vld [vmem:[%s7328_s3 + $0x108] ss:$12 sps:$4 sm:$0xff]  }
 0x799   :  { %5468 = vtanh.f32 %v1777_v7  ;;  %v5326_v7 = vld [vmem:[%s7328_s3 + $0x124] ss:$12 sps:$4 sm:$0xff]  }
 0x7a0   :  { %v5463_v29 = vpop.eup %5462 }
 0x7a1   :  { %v5465_v24 = vpop.eup %5464  ;;  %v1786_v49 = vadd.f32 1.0, %v5463_v29  ;;  %v5327_v29 = vld [vmem:[%s7328_s3 + $0xf8] ss:$12 sps:$4 sm:$0xff]  }
 0x7a2   :  { %v5467_v9 = vpop.eup %5466  ;;  %v1784_v56 = vadd.f32 1.0, %v5465_v24  ;;  %v5324_v24 = vld [vmem:[%s7328_s3 + $0x120] ss:$12 sps:$4 sm:$0xff]  }
 0x7a3   :  { %v5469_v55 = vpop.eup %5468  ;;  %v1790_v23 = vmul.f32 0.5, %v1786_v49  ;;  %v1787_v33 = vadd.f32 1.0, %v5467_v9  ;;  %v5330_v49 = vld [vmem:[%s7328_s3 + $0x13c] ss:$12 sps:$4 sm:$0xff]  }
 0x7a4   :  { %v1785_v31 = vadd.f32 1.0, %v5469_v55  ;;  %v1788_v59 = vmul.f32 0.5, %v1784_v56  ;;  %v5331_v9 = vld [vmem:[%s7328_s3 + $0x110] ss:$12 sps:$4 sm:$0xff]   ;;  %v5328_v56 = vld [vmem:[%s7328_s3 + $0x138] ss:$12 sps:$4 sm:$0xff]  }
 0x7a5   :  { %v1791_v61 = vmul.f32 0.5, %v1787_v33  ;;  %v1794_v40 = vmul.f32 %v1790_v23, %v1754_v11  ;;  %v1814_v11 = vld [vmem:[%s7302_s12] sm:$0xff]  ;;  %v5335_v23 = vld [vmem:[%s7328_s3 + $0x128] ss:$12 sps:$4 sm:$0xff]   ;;  %v5332_v33 = vld [vmem:[%s7328_s3 + $0x150] ss:$12 sps:$4 sm:$0xff]  }
 0x7a6   :  { %v1789_v38 = vmul.f32 0.5, %v1785_v31  ;;  %v1792_v2 = vmul.f32 %v1788_v59, %v1746_v18  ;;  %v5334_v55 = vld [vmem:[%s7328_s3 + $0x154] ss:$12 sps:$4 sm:$0xff]   ;;  %v5338_v31 = vld [vmem:[%s7328_s3 + $0x16c] ss:$12 sps:$4 sm:$0xff]  }
 0x7a7   :  { %v1795_v63 = vmul.f32 %v1791_v61, %v1757_v50  ;;  %v1815_v50 = vld [vmem:[%s7302_s12 + $0x8] sm:$0xff] }
 0x7a8   :  { %v1793_v46 = vmul.f32 %v1789_v38, %v1749_v41  ;;  %v5339_v59 = vld [vmem:[%s7328_s3 + $0x140] ss:$12 sps:$4 sm:$0xff]   ;;  %v5336_v61 = vld [vmem:[%s7328_s3 + $0x168] ss:$12 sps:$4 sm:$0xff]   ;;  %v5340_v38 = vld [vmem:[%s7328_s3 + $0x158] ss:$12 sps:$4 sm:$0xff]  }
 0x7a9   :  { %v1797_v13 = vpack.c.bf16 %v1795_v63, %v1794_v40  ;;  %v5341_v40 = vld [vmem:[%s7328_s3 + $0x170] ss:$12 sps:$4 sm:$0xff]  }
 0x7aa   :  { %v1796_v15 = vpack.c.bf16 %v1793_v46, %v1792_v2 }
 0x7ac   :  { %4803 = vmatprep.mubr.bf16.mxu0 %v1796_v15 }
 0x7ad   :  { %4804 = vmatmul.mubr.bf16.vlgmr.msra.gmra.mrb[16].mxu0 %v1797_v13 }
 0x7ae   :  { %4808 = vmatpush3.bf16.msra.mxu0 %v5319_v57 }
 0x7af   :  { %4809 = vmatprep.subr.bf16.mxu0 %v5323_v62 }
 0x7b2   :  { %4810 = vmatpush3.bf16.msra.mxu0 %v5323_v62 }
 0x7b3   :  { %4811 = vmatprep.subr.bf16.mxu0 %v5327_v29 }
 0x7b6   :  { %4812 = vmatpush3.bf16.msra.mxu0 %v5327_v29 }
 0x7b7   :  { %4813 = vmatprep.subr.bf16.mxu0 %v5331_v9 }
 0x7ba   :  { %4814 = vmatpush3.bf16.msra.mxu0 %v5331_v9 }
 0x7bb   :  { %4815 = vmatprep.subr.bf16.mxu0 %v5335_v23 }
 0x7be   :  { %4816 = vmatpush3.bf16.msra.mxu0 %v5335_v23 }
 0x7bf   :  { %4817 = vmatprep.subr.bf16.mxu0 %v5339_v59 }
 0x7c2   :  { %4818 = vmatpush3.bf16.msra.mxu0 %v5339_v59 }
 0x7c3   :  { %4819 = vmatprep.subr.bf16.mxu0 %v5340_v38 }
 0x7c6   :  { %4820 = vmatpush3.bf16.msra.mxu0 %v5340_v38 }
 0x7c7   :  { %4821 = vmatprep.subr.bf16.mxu0 %v5341_v40 }
 0x7ca   :  { %4822 = vmatpush3.bf16.msra.mxu0 %v5341_v40 }
 0x880   :  { %v4805_v18 = vpop.f32.mrb[16].mxu0 }
 0x881   :  { %v1900_v6 = vpop.f32.mrb[17].mxu0  ;;  %v1909_v0 = vadd.f32 %v4805_v18, %v1816_v25 }
 0x882   :  { %v1901_v20 = vadd.f32 %v1900_v6, %v1814_v11  ;;  %v4806_v22 = vpop.f32.mrb[18].mxu0 }
 0x883   :  { %v1903_v41 = vpop.f32.mrb[19].mxu0  ;;  %v1912_v27 = vadd.f32 %v4806_v22, %v1817_v14 }
 0x884   :  { %v6576_v44 = vadd.f32 %v1901_v20, %v6508_v47  ;;  %v1904_v12 = vadd.f32 %v1903_v41, %v1815_v50 }
 0x885   :  { %v6597_v51 = vadd.f32 %v1912_v27, %v6522_v3  ;;  %v5313_v3 = vld [vmem:[%s7328_s3 + $0xd8] ss:$12 sps:$4 sm:$0xff]  }
 0x886   :  { %v6582_v26 = vadd.f32 %v1904_v12, %v6510_v43  ;;  %1927 = vadd.xlane.f32.xlu0 %v6576_v44  ;;  %v1939_v47 = vmul.f32 %v6576_v44, %v6576_v44  ;;  %v6594_v43 = vadd.f32 %v1909_v0, %v6520_v53  ;;  %v5315_v53 = vld [vmem:[%s7328_s3 + $0xdc] ss:$12 sps:$4 sm:$0xff]  }
 0x887   :  { %v1942_v32 = vmul.f32 %v6597_v51, %v6597_v51  ;;  %2165 = vmatprep.subr.bf16.mxu1 %v5315_v53 }
 0x888   :  { %1929 = vadd.xlane.f32.xlu1 %v6582_v26  ;;  %v1940_v60 = vmul.f32 %v6582_v26, %v6582_v26  ;;  %v1941_v36 = vmul.f32 %v6594_v43, %v6594_v43  ;;  %2166 = vmatpush1.bf16.msra.mxu1 %v5313_v3 }
 0x889   :  { %2167 = vmatprep.subr.bf16.mxu1 %v5318_v58 }
 0x88a   :  { %1943 = vadd.xlane.f32.xlu0 %v1939_v47 }
 0x88c   :  { %1945 = vadd.xlane.f32.xlu1 %v1940_v60  ;;  %2168 = vmatpush1.bf16.msra.mxu1 %v5316_v39 }
 0x88d   :  { %2169 = vmatprep.subr.bf16.mxu1 %v5322_v21 }
 0x88e   :  { %1931 = vadd.xlane.f32.xlu0 %v6594_v43 }
 0x890   :  { %1933 = vadd.xlane.f32.xlu1 %v6597_v51  ;;  %2170 = vmatpush1.bf16.msra.mxu1 %v5320_v8  ;;  %v1919_v8 = vld [vmem:[%s7303_s13] sm:$0xff] }
 0x891   :  { %2171 = vmatprep.subr.bf16.mxu1 %v5326_v7 }
 0x892   :  { %1947 = vadd.xlane.f32.xlu0 %v1941_v36 }
 0x894   :  { %1949 = vadd.xlane.f32.xlu1 %v1942_v32  ;;  %2172 = vmatpush1.bf16.msra.mxu1 %v5324_v24 }
 0x895   :  { %2173 = vmatprep.subr.bf16.mxu1 %v5330_v49  ;;  %v1920_v49 = vld [vmem:[%s7303_s13 + $0x8] sm:$0xff] }
 0x898   :  { %2174 = vmatpush1.bf16.msra.mxu1 %v5328_v56 }
 0x899   :  { %2175 = vmatprep.subr.bf16.mxu1 %v5334_v55  ;;  %v1924_v55 = vld [vmem:[%s7304_s14 + $0x8] sm:$0xff] }
 0x89c   :  { %2176 = vmatpush1.bf16.msra.mxu1 %v5332_v33 }
 0x89d   :  { %2177 = vmatprep.subr.bf16.mxu1 %v5338_v31 }
 0x8a0   :  { %2178 = vmatpush1.bf16.msra.mxu1 %v5336_v61  ;;  %v1921_v61 = vld [vmem:[%s7303_s13 + $0x10] sm:$0xff] }
 0x913   :  { %v1928_v63 = vpop.xlane.xlu0 %1927 }
 0x914   :  { %v1935_v2 = vmul.f32 0.03125, %v1928_v63 }
 0x915   :  { %v1930_v46 = vpop.xlane.xlu1 %1929 }
 0x916   :  { %v1936_v13 = vmul.f32 0.03125, %v1930_v46  ;;  %v1955_v16 = vmul.f32 %v1935_v2, %v1935_v2  ;;  %v1963_v21 = vsub.f32 %v6576_v44, %v1935_v2  ;;  %v1923_v44 = vld [vmem:[%s7304_s14] sm:$0xff] }
 0x917   :  { %v1944_v15 = vpop.xlane.xlu0 %1943 }
 0x918   :  { %v1951_v5 = vmul.f32 0.03125, %v1944_v15  ;;  %v1956_v18 = vmul.f32 %v1936_v13, %v1936_v13  ;;  %v1964_v7 = vsub.f32 %v6582_v26, %v1936_v13  ;;  %v1925_v15 = vld [vmem:[%s7304_s14 + $0x10] sm:$0xff] }
 0x919   :  { %v1946_v11 = vpop.xlane.xlu1 %1945 }
 0x91a   :  { %v1959_v6 = vsub.f32 %v1951_v5, %v1955_v16  ;;  %v1952_v50 = vmul.f32 0.03125, %v1946_v11 }
 0x91b   :  { %v1932_v20 = vpop.xlane.xlu0 %1931 }
 0x91c   :  { %v1967_v22 = vadd.f32 1e-12, %v1959_v6  ;;  %v1960_v41 = vsub.f32 %v1952_v50, %v1956_v18  ;;  %v1937_v12 = vmul.f32 0.03125, %v1932_v20  ;;  %v4184_v20 = vld [vmem:[%s7294_s4 + $0x68] sm:$0xff] }
 0x91d   :  { %v1934_v25 = vpop.xlane.xlu1 %1933 }
 0x91e   :  { %5470 = vrsqrt.f32 %v1967_v22  ;;  %v1968_v14 = vadd.f32 1e-12, %v1960_v41  ;;  %v1938_v0 = vmul.f32 0.03125, %v1934_v25  ;;  %v1957_v27 = vmul.f32 %v1937_v12, %v1937_v12  ;;  %v4187_v41 = vld [vmem:[%s7294_s4 + $0x80] sm:$0xff] }
 0x91f   :  { %v1948_v47 = vpop.xlane.xlu0 %1947  ;;  %v1965_v33 = vsub.f32 %v6594_v43, %v1937_v12  ;;  %v1922_v43 = vld [vmem:[%s7303_s13 + $0x18] sm:$0xff] }
 0x920   :  { %5472 = vrsqrt.f32 %v1968_v14  ;;  %v1953_v60 = vmul.f32 0.03125, %v1948_v47  ;;  %v1958_v32 = vmul.f32 %v1938_v0, %v1938_v0  ;;  %v1966_v38 = vsub.f32 %v6597_v51, %v1938_v0  ;;  %v1926_v51 = vld [vmem:[%s7304_s14 + $0x18] sm:$0xff] }
 0x921   :  { %v1950_v36 = vpop.xlane.xlu1 %1949 }
 0x922   :  { %v1961_v53 = vsub.f32 %v1953_v60, %v1957_v27  ;;  %v1954_v3 = vmul.f32 0.03125, %v1950_v36  ;;  %v4191_v60 = vld [vmem:[%s7294_s4 + $0xa0] sm:$0xff] }
 0x924   :  { %v1969_v58 = vadd.f32 1e-12, %v1961_v53  ;;  %v1962_v57 = vsub.f32 %v1954_v3, %v1958_v32  ;;  %v4190_v32 = vld [vmem:[%s7294_s4 + $0x98] sm:$0xff] }
 0x925   :  { %v4194_v53 = vld [vmem:[%s7294_s4 + $0xb8] sm:$0xff] }
 0x926   :  { %5474 = vrsqrt.f32 %v1969_v58  ;;  %v1970_v39 = vadd.f32 1e-12, %v1962_v57  ;;  %v4185_v57 = vld [vmem:[%s7294_s4 + $0x70] sm:$0xff] }
 0x928   :  { %v5471_v62 = vpop.eup %5470  ;;  %5476 = vrsqrt.f32 %v1970_v39  ;;  %v4193_v39 = vld [vmem:[%s7294_s4 + $0xb0] sm:$0xff] }
 0x929   :  { %v1975_v29 = vmul.f32 %v5471_v62, %v1963_v21  ;;  %v4188_v21 = vld [vmem:[%s7294_s4 + $0x88] sm:$0xff] }
 0x92a   :  { %v5473_v24 = vpop.eup %5472 }
 0x92b   :  { %v1976_v9 = vmul.f32 %v5473_v24, %v1964_v7  ;;  %v1979_v56 = vmul.f32 %v1975_v29, %v1919_v8 }
 0x92d   :  { %v1980_v23 = vmul.f32 %v1976_v9, %v1920_v49  ;;  %v6686_v26 = vadd.f32 %v1979_v56, %v1923_v44 }
 0x92f   :  { %v6688_v31 = vadd.f32 %v1980_v23, %v1924_v55 }
 0x930   :  { %v5475_v59 = vpop.eup %5474 }
 0x931   :  { %v1987_v40 = vpack.c.bf16 %v6688_v31, %v6686_v26  ;;  %v1977_v63 = vmul.f32 %v5475_v59, %v1965_v33 }
 0x932   :  { %v5477_v2 = vpop.eup %5476 }
 0x933   :  { %2196 = vmatmul.mubr.bf16.vlgmr.msra.gmra.mrb[24].mxu1 %v1987_v40  ;;  %4823 = vmatprep.mubr.bf16.mxu0 %v1987_v40  ;;  %v1978_v46 = vmul.f32 %v5477_v2, %v1966_v38  ;;  %v1981_v13 = vmul.f32 %v1977_v63, %v1921_v61  ;;  %v4186_v61 = vld [vmem:[%s7294_s4 + $0x78] sm:$0xff]  ;;  %v4189_v38 = vld [vmem:[%s7294_s4 + $0x90] sm:$0xff]  ;;  %v4192_v2 = vld [vmem:[%s7294_s4 + $0xa8] sm:$0xff] }
 0x934   :  { %2205 = vmatprep.mubr.bf16.mxu1 %v5693_v30  ;;  %v4183_v30 = vld [vmem:[%s7294_s4 + $0x60] sm:$0xff] }
 0x935   :  { %v1982_v16 = vmul.f32 %v1978_v46, %v1922_v43  ;;  %v6706_v5 = vadd.f32 %v1981_v13, %v1925_v15 }
 0x937   :  { %v6708_v11 = vadd.f32 %v1982_v16, %v1926_v51 }
 0x939   :  { %v1988_v18 = vpack.c.bf16 %v6708_v11, %v6706_v5 }
 0x93b   :  { %2206 = vmatmul.mubr.bf16.gmra.mrb[28].mxu1 %v1988_v18  ;;  %4824 = vmatmul.mubr.bf16.vlgmr.msra.gmra.mrb[20].mxu0 %v1988_v18 }
 0xa06   :  { %v2197_v6 = vpop.f32.mrb[24].mxu1 }
 0xa07   :  { %v6715_v50 = vadd.f32 %v4183_v30, %v2197_v6  ;;  %v2199_v22 = vpop.f32.mrb[25].mxu1 }
 0xa08   :  { %v2201_v12 = vpop.f32.mrb[26].mxu1  ;;  %v2200_v14 = vadd.f32 %v4184_v20, %v2199_v22 }
 0xa09   :  { %v2203_v25 = vpop.f32.mrb[27].mxu1  ;;  %4835 = vmatprep.mubr.msk.f32.mxu1 %vm6009_vm2, %v6715_v50  ;;  %v2202_v40 = vadd.f32 %v4186_v61, %v2201_v12 }
 0xa0a   :  { %v2204_v0 = vadd.f32 %v4187_v41, %v2203_v25 }
 0xa0c   :  { %v5130_v47 = vpack.c.bf16 %v2204_v0, %v2200_v14 }
 0xa0e   :  { %v2207_v27 = vpop.f32.mrb[28].mxu1  ;;  %v4825_v36 = vpop.f32.mrb[20].mxu0  ;;  %5131 = vmatprep.subr.bf16.mxu1 %v5130_v47 }
 0xa0f   :  { %v2209_v3 = vpop.f32.mrb[29].mxu1  ;;  %v2250_v58 = vpop.f32.mrb[21].mxu0  ;;  %5133 = vmatpush3.bf16.xpose.msra.mxu1 %v5130_v47  ;;  %v2259_v7 = vadd.f32 %v4825_v36, %v4191_v60  ;;  %v2208_v63 = vadd.f32 %v4189_v38, %v2207_v27 }
 0xa10   :  { %v2211_v62 = vpop.f32.mrb[30].mxu1  ;;  %v4826_v8 = vpop.f32.mrb[22].mxu0  ;;  %v2210_v9 = vadd.f32 %v4190_v32, %v2209_v3  ;;  %v2251_v56 = vadd.f32 %v4185_v57, %v2250_v58 }
 0xa11   :  { %v2262_v29 = vadd.f32 %v4826_v8, %v4194_v53  ;;  %v2213_v24 = vpop.f32.mrb[31].mxu1  ;;  %v2253_v49 = vpop.f32.mrb[23].mxu0  ;;  %v2212_v43 = vadd.f32 %v4192_v2, %v2211_v62 }
 0xa12   :  { %v2214_v44 = vadd.f32 %v4193_v39, %v2213_v24  ;;  %v2254_v55 = vadd.f32 %v4188_v21, %v2253_v49 }
 0xa13   :  { %v6744_v23 = vpack.c.bf16 %v2262_v29, %v2259_v7 }
 0xa14   :  { %v5134_v33 = vpack.c.bf16 %v2214_v44, %v2210_v9  ;;  %v6746_v59 = vpack.c.bf16 %v2254_v55, %v2251_v56 }
 0xa16   :  { %5135 = vmatprep.subr.bf16.mxu1 %v5134_v33  ;;  %5148 = vmatprep.subr.msk.bf16.mxu0 %vm6058_vm5, %v6746_v59 }
 0xa17   :  { %5137 = vmatpush3.bf16.xpose.msra.mxu1 %v5134_v33  ;;  %5151 = vmatpush3.bf16.msk.msra.mxu0 %vm6058_vm5, %v6746_v59 }
 0xa18   :  { %5139 = vmatprep.subr.bf16.mxu1 %v5130_v47  ;;  %5154 = vmatprep.subr.msk.bf16.mxu0 %vm6058_vm5, %v6744_v23 }
 0xa1b   :  { %5157 = vmatpush3.bf16.msk.msra.mxu0 %vm6058_vm5, %v6744_v23 }
 0xa1c   :  { %5160 = vmatprep.subr.msk.bf16.mxu0 %vm6080_vm6, %v6746_v59 }
 0xa1e   :  { %4836 = vmatmul.mubr.msk.f32.vlgmr.msra.gmra.mrb[32].mxu1 %vm6009_vm2, %v2202_v40 }
 0xa1f   :  { %4838 = vmatprep.mubr.msk.f32.mxu1 %vm6009_vm2, %v2208_v63  ;;  %5141 = vmatpush3.bf16.xpose.msra.mxu1 %v5130_v47 }
 0xa20   :  { %5143 = vmatprep.subr.bf16.mxu1 %v5134_v33 }
 0xa22   :  { %4839 = vmatmul.mubr.msk.f32.gmra.mrb[34].mxu1 %vm6009_vm2, %v2212_v43  ;;  %vm5696_vm2 = vmmov 0  }
 0xa23   :  { %4849 = vmatprep.mubr.msk.f32.mxu1 %vm6049_vm4, %v6715_v50 }
 0xa27   :  { %5145 = vmatpush3.bf16.xpose.msra.mxu1 %v5134_v33 }
 0xa28   :  { %5171 = vmatprep.subr.bf16.mxu1 %v5130_v47 }
 0xa2e   :  { %4850 = vmatmul.mubr.msk.f32.vlgmr.msra.gmra.mrb[36].mxu1 %vm6049_vm4, %v2202_v40 }
 0xa2f   :  { %4852 = vmatprep.mubr.msk.f32.mxu1 %vm6049_vm4, %v2208_v63  ;;  %5173 = vmatpush3.bf16.xpose.msra.mxu1 %v5130_v47 }
 0xa30   :  { %5175 = vmatprep.subr.bf16.mxu1 %v5134_v33 }
 0xa32   :  { %4853 = vmatmul.mubr.msk.f32.gmra.mrb[38].mxu1 %vm6049_vm4, %v2212_v43  ;;  %vm3758_vm4 = vcmp.lt.s32.totalorder %v6149_v19, 4 }
 0xa33   :  { %4891 = vmatprep.mubr.msk.f32.mxu1 %vm6115_vm8, %v6715_v50 }
 0xa37   :  { %5177 = vmatpush3.bf16.xpose.msra.mxu1 %v5134_v33 }
 0xa38   :  { %5191 = vmatprep.subr.bf16.mxu1 %v5130_v47 }
 0xa3e   :  { %4892 = vmatmul.mubr.msk.f32.vlgmr.msra.gmra.mrb[40].mxu1 %vm6115_vm8, %v2202_v40 }
 0xa3f   :  { %4894 = vmatprep.mubr.msk.f32.mxu1 %vm6115_vm8, %v2208_v63  ;;  %5193 = vmatpush3.bf16.xpose.msra.mxu1 %v5130_v47 }
 0xa40   :  { %5195 = vmatprep.subr.bf16.mxu1 %v5134_v33 }
 0xa42   :  { %4895 = vmatmul.mubr.msk.f32.gmra.mrb[42].mxu1 %vm6115_vm8, %v2212_v43 }
 0xa43   :  { %4919 = vmatprep.mubr.msk.f32.mxu1 %vm6133_vm10, %v6715_v50 }
 0xa47   :  { %5197 = vmatpush3.bf16.xpose.msra.mxu1 %v5134_v33 }
 0xa4e   :  { %4920 = vmatmul.mubr.msk.f32.vlgmr.msra.gmra.mrb[44].mxu1 %vm6133_vm10, %v2202_v40 }
 0xa4f   :  { %4922 = vmatprep.mubr.msk.f32.mxu1 %vm6133_vm10, %v2208_v63 }
 0xa52   :  { %4923 = vmatmul.mubr.msk.f32.gmra.mrb[46].mxu1 %vm6133_vm10, %v2212_v43 }
 0xaf1   :  { %v4837_v34 = vpop.f32.mrb[32].mxu1 }
 0xaf2   :  { %v2335_v54 = vpop.f32.mrb[33].mxu1  ;;  %v6817_v20 = vadd.f32 %v4837_v34, %v6157_v35 }
 0xaf3   :  { %v6822_v41 = vadd.f32 %v2335_v54, %v6159_v37 }
 0xaf4   :  { %v2357_v14 = vsel %vm594_vm15, %v6817_v20, -inf }
 0xaf5   :  { %v4840_v4 = vpop.f32.mrb[34].mxu1  ;;  %v2354_v47 = vsel %vm594_vm15, %v6822_v41, -inf }
 0xaf6   :  { %v2345_v46 = vpop.f32.mrb[35].mxu1  ;;  %v6826_v25 = vadd.f32 %v4840_v4, %v6171_v42 }
 0xaf7   :  { %v6831_v0 = vadd.f32 %v2345_v46, %v6175_v45 }
 0xaf8   :  { %v2363_v27 = vsel %vm594_vm15, %v6826_v25, -inf }
 0xaf9   :  { %v2360_v36 = vsel %vm594_vm15, %v6831_v0, -inf }
 0xb01   :  { %v4851_v17 = vpop.f32.mrb[36].mxu1 }
 0xb02   :  { %v6806_v13 = vadd.f32 %v4851_v17, %v6157_v35  ;;  %v2472_v15 = vpop.f32.mrb[37].mxu1 }
 0xb03   :  { %v2473_v51 = vadd.f32 %v2472_v15, %v6159_v37 }
 0xb04   :  { %v2494_v16 = vsel %vm594_vm15, %v6806_v13, -inf }
 0xb05   :  { %2495 = vmax.xlane.f32.xlu1 %v2494_v16  ;;  %v4854_v18 = vpop.f32.mrb[38].mxu1  ;;  %v2491_v30 = vsel %vm594_vm15, %v2473_v51, -inf }
 0xb06   :  { %v6813_v1 = vadd.f32 %v4854_v18, %v6171_v42  ;;  %v2482_v6 = vpop.f32.mrb[39].mxu1  ;;  %2492 = vmax.xlane.f32.xlu0 %v2491_v30 }
 0xb07   :  { %v2483_v50 = vadd.f32 %v2482_v6, %v6175_v45 }
 0xb08   :  { %v2500_v22 = vsel %vm594_vm15, %v6813_v1, -inf }
 0xb09   :  { %2501 = vmax.xlane.f32.xlu1 %v2500_v22  ;;  %v2497_v12 = vsel %vm594_vm15, %v2483_v50, -inf }
 0xb0a   :  { %2498 = vmax.xlane.f32.xlu0 %v2497_v12 }
 0xb0d   :  { %2358 = vmax.xlane.f32.xlu1 %v2357_v14 }
 0xb0e   :  { %2355 = vmax.xlane.f32.xlu0 %v2354_v47 }
 0xb11   :  { %2364 = vmax.xlane.f32.xlu1 %v2363_v27  ;;  %v4893_v60 = vpop.f32.mrb[40].mxu1 }
 0xb12   :  { %v6840_v32 = vadd.f32 %v4893_v60, %v6157_v35  ;;  %v2803_v53 = vpop.f32.mrb[41].mxu1  ;;  %2361 = vmax.xlane.f32.xlu0 %v2360_v36 }
 0xb13   :  { %v6843_v3 = vadd.f32 %v2803_v53, %v6159_v37 }
 0xb14   :  { %v2825_v58 = vsel %vm594_vm15, %v6840_v32, -inf }
 0xb15   :  { %2826 = vmax.xlane.f32.xlu1 %v2825_v58  ;;  %v4896_v57 = vpop.f32.mrb[42].mxu1  ;;  %v2822_v39 = vsel %vm594_vm15, %v6843_v3, -inf }
 0xb16   :  { %v6850_v21 = vadd.f32 %v4896_v57, %v6171_v42  ;;  %v2813_v62 = vpop.f32.mrb[43].mxu1  ;;  %2823 = vmax.xlane.f32.xlu0 %v2822_v39 }
 0xb17   :  { %v6853_v8 = vadd.f32 %v2813_v62, %v6175_v45 }
 0xb18   :  { %v2831_v7 = vsel %vm594_vm15, %v6850_v21, -inf }
 0xb19   :  { %2832 = vmax.xlane.f32.xlu1 %v2831_v7  ;;  %v2828_v29 = vsel %vm594_vm15, %v6853_v8, -inf }
 0xb1a   :  { %2829 = vmax.xlane.f32.xlu0 %v2828_v29 }
 0xb21   :  { %v4921_v24 = vpop.f32.mrb[44].mxu1 }
 0xb22   :  { %v6860_v49 = vadd.f32 %v4921_v24, %v6157_v35  ;;  %v3041_v9 = vpop.f32.mrb[45].mxu1 }
 0xb23   :  { %v6863_v56 = vadd.f32 %v3041_v9, %v6159_v37 }
 0xb24   :  { %v3063_v44 = vsel %vm594_vm15, %v6860_v49, -inf }
 0xb25   :  { %3064 = vmax.xlane.f32.xlu1 %v3063_v44  ;;  %v4924_v55 = vpop.f32.mrb[46].mxu1  ;;  %v3060_v33 = vsel %vm594_vm15, %v6863_v56, -inf }
 0xb26   :  { %v6870_v61 = vadd.f32 %v4924_v55, %v6171_v42  ;;  %v3051_v38 = vpop.f32.mrb[47].mxu1  ;;  %3061 = vmax.xlane.f32.xlu0 %v3060_v33 }
 0xb27   :  { %v6873_v35 = vadd.f32 %v3051_v38, %v6175_v45 }
 0xb28   :  { %v3069_v37 = vsel %vm594_vm15, %v6870_v61, -inf }
 0xb29   :  { %3070 = vmax.xlane.f32.xlu1 %v3069_v37  ;;  %v3066_v40 = vsel %vm594_vm15, %v6873_v35, -inf }
 0xb2a   :  { %3067 = vmax.xlane.f32.xlu0 %v3066_v40 }
 0xb92   :  { %v2496_v63 = vpop.xlane.xlu1 %2495 }
 0xb93   :  { %v2504_v2 = vsub.f32 %v6806_v13, %v2496_v63  ;;  %v2493_v43 = vpop.xlane.xlu0 %2492 }
 0xb94   :  { %v2503_v34 = vsub.f32 %v2473_v51, %v2493_v43 }
 0xb95   :  { %v2509_v42 = vmul.f32 1.442695, %v2504_v2 }
 0xb96   :  { %v2507_v54 = vmul.f32 1.442695, %v2503_v34  ;;  %v2502_v4 = vpop.xlane.xlu1 %2501 }
 0xb97   :  { %5478 = vpow2.f32 %v2509_v42  ;;  %v2506_v45 = vsub.f32 %v6813_v1, %v2502_v4  ;;  %v2499_v46 = vpop.xlane.xlu0 %2498 }
 0xb98   :  { %5480 = vpow2.f32 %v2507_v54  ;;  %v2505_v17 = vsub.f32 %v2483_v50, %v2499_v46 }
 0xb99   :  { %v2513_v15 = vmul.f32 1.442695, %v2506_v45 }
 0xb9a   :  { %v2511_v16 = vmul.f32 1.442695, %v2505_v17  ;;  %v2359_v18 = vpop.xlane.xlu1 %2358 }
 0xb9b   :  { %5482 = vpow2.f32 %v2513_v15  ;;  %v2367_v30 = vsub.f32 %v6817_v20, %v2359_v18  ;;  %v2356_v6 = vpop.xlane.xlu0 %2355 }
 0xb9c   :  { %5484 = vpow2.f32 %v2511_v16  ;;  %v2366_v13 = vsub.f32 %v6822_v41, %v2356_v6 }
 0xb9d   :  { %v2372_v51 = vmul.f32 1.442695, %v2367_v30 }
 0xb9e   :  { %v2370_v22 = vmul.f32 1.442695, %v2366_v13  ;;  %v2365_v12 = vpop.xlane.xlu1 %2364 }
 0xb9f   :  { %5486 = vpow2.f32 %v2372_v51  ;;  %v2369_v14 = vsub.f32 %v6826_v25, %v2365_v12  ;;  %v2362_v1 = vpop.xlane.xlu0 %2361 }
 0xba0   :  { %5488 = vpow2.f32 %v2370_v22  ;;  %v2368_v50 = vsub.f32 %v6831_v0, %v2362_v1 }
 0xba1   :  { %v6885_v47 = vpop.eup %5478  ;;  %v2376_v27 = vmul.f32 1.442695, %v2369_v14 }
 0xba2   :  { %v6887_v60 = vpop.eup %5480  ;;  %v2374_v20 = vmul.f32 1.442695, %v2368_v50  ;;  %v2827_v36 = vpop.xlane.xlu1 %2826  ;;  %v2518_v41 = vsel %vm594_vm15, %v6885_v47, 0.0 }
 0xba3   :  { %5490 = vpow2.f32 %v2376_v27  ;;  %v2835_v53 = vsub.f32 %v6840_v32, %v2827_v36  ;;  %2519 = vadd.xlane.f32.xlu1 %v2518_v41  ;;  %v2824_v58 = vpop.xlane.xlu0 %2823  ;;  %v2515_v25 = vsel %vm594_vm15, %v6887_v60, 0.0 }
 0xba4   :  { %5492 = vpow2.f32 %v2374_v20  ;;  %v2834_v0 = vsub.f32 %v6843_v3, %v2824_v58  ;;  %2516 = vadd.xlane.f32.xlu0 %v2515_v25 }
 0xba5   :  { %v6895_v57 = vpop.eup %5482  ;;  %v2840_v39 = vmul.f32 1.442695, %v2835_v53 }
 0xba6   :  { %v6897_v62 = vpop.eup %5484  ;;  %v2838_v7 = vmul.f32 1.442695, %v2834_v0  ;;  %v2833_v29 = vpop.xlane.xlu1 %2832  ;;  %v2524_v24 = vsel %vm594_vm15, %v6895_v57, 0.0 }
 0xba7   :  { %5494 = vpow2.f32 %v2840_v39  ;;  %v2837_v32 = vsub.f32 %v6850_v21, %v2833_v29  ;;  %2525 = vadd.xlane.f32.xlu1 %v2524_v24  ;;  %v2830_v9 = vpop.xlane.xlu0 %2829  ;;  %v2521_v44 = vsel %vm594_vm15, %v6897_v62, 0.0 }
 0xba8   :  { %5496 = vpow2.f32 %v2838_v7  ;;  %v2836_v3 = vsub.f32 %v6853_v8, %v2830_v9  ;;  %2522 = vadd.xlane.f32.xlu0 %v2521_v44 }
 0xba9   :  { %v6905_v55 = vpop.eup %5486  ;;  %v2844_v33 = vmul.f32 1.442695, %v2837_v32 }
 0xbaa   :  { %v6907_v38 = vpop.eup %5488  ;;  %v2842_v37 = vmul.f32 1.442695, %v2836_v3  ;;  %v2381_v40 = vsel %vm594_vm15, %v6905_v55, 0.0 }
 0xbab   :  { %5498 = vpow2.f32 %v2844_v33  ;;  %2382 = vadd.xlane.f32.xlu1 %v2381_v40  ;;  %v2378_v21 = vsel %vm594_vm15, %v6907_v38, 0.0 }
 0xbac   :  { %5500 = vpow2.f32 %v2842_v37  ;;  %2379 = vadd.xlane.f32.xlu0 %v2378_v21 }
 0xbad   :  { %v6913_v63 = vpop.eup %5490 }
 0xbae   :  { %v6915_v8 = vpop.eup %5492  ;;  %v2387_v2 = vsel %vm594_vm15, %v6913_v63, 0.0 }
 0xbaf   :  { %2388 = vadd.xlane.f32.xlu1 %v2387_v2  ;;  %v2384_v43 = vsel %vm594_vm15, %v6915_v8, 0.0 }
 0xbb0   :  { %2385 = vadd.xlane.f32.xlu0 %v2384_v43 }
 0xbb1   :  { %v6921_v34 = vpop.eup %5494 }
 0xbb2   :  { %v6923_v42 = vpop.eup %5496  ;;  %v3065_v54 = vpop.xlane.xlu1 %3064  ;;  %v2849_v4 = vsel %vm594_vm15, %v6921_v34, 0.0 }
 0xbb3   :  { %v3073_v45 = vsub.f32 %v6860_v49, %v3065_v54  ;;  %2850 = vadd.xlane.f32.xlu1 %v2849_v4  ;;  %v3062_v46 = vpop.xlane.xlu0 %3061  ;;  %v2846_v17 = vsel %vm594_vm15, %v6923_v42, 0.0 }
 0xbb4   :  { %v3072_v15 = vsub.f32 %v6863_v56, %v3062_v46  ;;  %2847 = vadd.xlane.f32.xlu0 %v2846_v17 }
 0xbb5   :  { %v6931_v16 = vpop.eup %5498  ;;  %v3078_v18 = vmul.f32 1.442695, %v3073_v45 }
 0xbb6   :  { %v6933_v30 = vpop.eup %5500  ;;  %v3076_v6 = vmul.f32 1.442695, %v3072_v15  ;;  %v3071_v13 = vpop.xlane.xlu1 %3070  ;;  %v2855_v51 = vsel %vm594_vm15, %v6931_v16, 0.0 }
 0xbb7   :  { %5502 = vpow2.f32 %v3078_v18  ;;  %v3075_v49 = vsub.f32 %v6870_v61, %v3071_v13  ;;  %2856 = vadd.xlane.f32.xlu1 %v2855_v51  ;;  %v3068_v22 = vpop.xlane.xlu0 %3067  ;;  %v2852_v12 = vsel %vm594_vm15, %v6933_v30, 0.0  ;;  %v5342_v51 = vld [vmem:[%s7295_s5 + $0x40] sm:$0xff]  }
 0xbb8   :  { %5504 = vpow2.f32 %v3076_v6  ;;  %v3074_v56 = vsub.f32 %v6873_v35, %v3068_v22  ;;  %2853 = vadd.xlane.f32.xlu0 %v2852_v12 }
 0xbb9   :  { %v3082_v14 = vmul.f32 1.442695, %v3075_v49 }
 0xbba   :  { %v3080_v1 = vmul.f32 1.442695, %v3074_v56  ;;  %v5343_v56 = vld [vmem:[%s7295_s5 + $0x48] sm:$0xff]  }
 0xbbb   :  { %5506 = vpow2.f32 %v3082_v14 }
 0xbbc   :  { %5508 = vpow2.f32 %v3080_v1 }
 0xbc1   :  { %v6941_v50 = vpop.eup %5502 }
 0xbc2   :  { %v6943_v27 = vpop.eup %5504  ;;  %v3087_v61 = vsel %vm594_vm15, %v6941_v50, 0.0 }
 0xbc3   :  { %3088 = vadd.xlane.f32.xlu1 %v3087_v61  ;;  %v3084_v20 = vsel %vm594_vm15, %v6943_v27, 0.0  ;;  %v5346_v61 = vld [vmem:[%s7295_s5 + $0x60] sm:$0xff]  }
 0xbc4   :  { %3085 = vadd.xlane.f32.xlu0 %v3084_v20  ;;  %v5347_v20 = vld [vmem:[%s7295_s5 + $0x68] sm:$0xff]  }
 0xbc5   :  { %v6949_v36 = vpop.eup %5506 }
 0xbc6   :  { %v6951_v35 = vpop.eup %5508  ;;  %v3093_v41 = vsel %vm594_vm15, %v6949_v36, 0.0 }
 0xbc7   :  { %3094 = vadd.xlane.f32.xlu1 %v3093_v41  ;;  %v3090_v53 = vsel %vm594_vm15, %v6951_v35, 0.0 }
 0xbc8   :  { %3091 = vadd.xlane.f32.xlu0 %v3090_v53 }
 0xc30   :  { %v2520_v58 = vpop.xlane.xlu1 %2519 }
 0xc31   :  { %5510 = vrcp.f32 %v2520_v58  ;;  %v2517_v25 = vpop.xlane.xlu0 %2516 }
 0xc32   :  { %5512 = vrcp.f32 %v2517_v25 }
 0xc34   :  { %v2526_v0 = vpop.xlane.xlu1 %2525 }
 0xc35   :  { %5514 = vrcp.f32 %v2526_v0  ;;  %v2523_v39 = vpop.xlane.xlu0 %2522 }
 0xc36   :  { %5516 = vrcp.f32 %v2523_v39 }
 0xc38   :  { %v2383_v7 = vpop.xlane.xlu1 %2382 }
 0xc39   :  { %5518 = vrcp.f32 %v2383_v7  ;;  %v2380_v29 = vpop.xlane.xlu0 %2379  ;;  %v4285_v7 = vld [vmem:[%s7296_s6 + $0x30] sm:$0xff] }
 0xc3a   :  { %5520 = vrcp.f32 %v2380_v29 }
 0xc3b   :  { %v5511_v24 = vpop.eup %5510 }
 0xc3c   :  { %v5513_v32 = vpop.eup %5512  ;;  %v2389_v9 = vpop.xlane.xlu1 %2388  ;;  %v2532_v33 = vmul.f32 %v5511_v24, %v6885_v47  ;;  %v4283_v24 = vld [vmem:[%s7296_s6 + $0x20] sm:$0xff] }
 0xc3d   :  { %5522 = vrcp.f32 %v2389_v9  ;;  %v2386_v44 = vpop.xlane.xlu0 %2385  ;;  %v2531_v3 = vmul.f32 %v5513_v32, %v6887_v60  ;;  %v4286_v32 = vld [vmem:[%s7296_s6 + $0x38] sm:$0xff] }
 0xc3e   :  { %5524 = vrcp.f32 %v2386_v44 }
 0xc3f   :  { %v5515_v37 = vpop.eup %5514  ;;  %4863 = vmatprep.mubr.msk.f32.mxu0 %vm594_vm15, %v2531_v3 }
 0xc40   :  { %v5517_v40 = vpop.eup %5516  ;;  %v2851_v21 = vpop.xlane.xlu1 %2850  ;;  %4864 = vmatmul.mubr.msk.f32.vlgmr.msra.gmra.mrb[24].mxu0 %vm594_vm15, %v2532_v33  ;;  %v2534_v47 = vmul.f32 %v5515_v37, %v6895_v57  ;;  %v4284_v33 = vld [vmem:[%s7296_s6 + $0x28] sm:$0xff] }
 0xc41   :  { %5526 = vrcp.f32 %v2851_v21  ;;  %5163 = vmatpush3.bf16.msk.msra.mxu0 %vm6080_vm6, %v6746_v59  ;;  %v2848_v2 = vpop.xlane.xlu0 %2847  ;;  %v2533_v43 = vmul.f32 %v5517_v40, %v6897_v62 }
 0xc42   :  { %5166 = vmatprep.subr.msk.bf16.mxu0 %vm6080_vm6, %v6744_v23  ;;  %5528 = vrcp.f32 %v2848_v2 }
 0xc43   :  { %v5519_v60 = vpop.eup %5518  ;;  %4866 = vmatprep.mubr.msk.f32.mxu0 %vm594_vm15, %v2533_v43 }
 0xc44   :  { %v5521_v54 = vpop.eup %5520  ;;  %v2857_v4 = vpop.xlane.xlu1 %2856  ;;  %4867 = vmatmul.mubr.msk.f32.gmra.mrb[26].mxu0 %vm594_vm15, %v2534_v47  ;;  %v2395_v46 = vmul.f32 %v5519_v60, %v6905_v55 }
 0xc45   :  { %5530 = vrcp.f32 %v2857_v4  ;;  %5169 = vmatpush3.bf16.msk.msra.mxu0 %vm6080_vm6, %v6744_v23  ;;  %v2854_v62 = vpop.xlane.xlu0 %2853  ;;  %v2394_v45 = vmul.f32 %v5521_v54, %v6907_v38  ;;  %v5350_v4 = vld [vmem:[%s7299_s9 + $0x40] sm:$0xff]  }
 0xc46   :  { %5180 = vmatprep.subr.msk.bf16.mxu0 %vm6339_vm0, %v6746_v59  ;;  %5532 = vrcp.f32 %v2854_v62  ;;  %4959 = vmatprep.subr.bf16.mxu1 %v5350_v4  ;;  %v5351_v62 = vld [vmem:[%s7299_s9 + $0x48] sm:$0xff]  }
 0xc47   :  { %v5523_v57 = vpop.eup %5522  ;;  %4877 = vmatprep.mubr.msk.f32.mxu0 %vm594_vm15, %v2394_v45  ;;  %4960 = vmatpush3.bf16.msra.mxu1 %v5350_v4  ;;  %v5352_v45 = vld [vmem:[%s7299_s9 + $0x50] sm:$0xff]  }
 0xc48   :  { %v5525_v17 = vpop.eup %5524  ;;  %4878 = vmatmul.mubr.msk.f32.vlgmr.msra.gmra.mrb[24].mxu0 %vm594_vm15, %v2395_v46  ;;  %v2397_v55 = vmul.f32 %v5523_v57, %v6913_v63  ;;  %4961 = vmatprep.subr.bf16.mxu1 %v5351_v62  ;;  %v5353_v46 = vld [vmem:[%s7299_s9 + $0x58] sm:$0xff]   ;;  %v5354_v57 = vld [vmem:[%s7299_s9 + $0x60] sm:$0xff]  }
 0xc49   :  { %5183 = vmatpush3.bf16.msk.msra.mxu0 %vm6339_vm0, %v6746_v59  ;;  %v2396_v10 = vmul.f32 %v5525_v17, %v6915_v8  ;;  %v5355_v17 = vld [vmem:[%s7299_s9 + $0x68] sm:$0xff]  }
 0xc4a   :  { %5186 = vmatprep.subr.msk.bf16.mxu0 %vm6339_vm0, %v6744_v23 }
 0xc4b   :  { %v5527_v38 = vpop.eup %5526  ;;  %4880 = vmatprep.mubr.msk.f32.mxu0 %vm594_vm15, %v2396_v10  ;;  %4962 = vmatpush3.bf16.msra.mxu1 %v5351_v62  ;;  %v5356_v10 = vld [vmem:[%s7299_s9 + $0x70] sm:$0xff]  }
 0xc4c   :  { %v5529_v15 = vpop.eup %5528  ;;  %4881 = vmatmul.mubr.msk.f32.gmra.mrb[26].mxu0 %vm594_vm15, %v2397_v55  ;;  %v2863_v8 = vmul.f32 %v5527_v38, %v6921_v34  ;;  %4963 = vmatprep.subr.bf16.mxu1 %v5352_v45  ;;  %v5357_v55 = vld [vmem:[%s7299_s9 + $0x78] sm:$0xff]  }
 0xc4d   :  { %5189 = vmatpush3.bf16.msk.msra.mxu0 %vm6339_vm0, %v6744_v23  ;;  %v2862_v18 = vmul.f32 %v5529_v15, %v6923_v42 }
 0xc4e   :  { %5200 = vmatprep.subr.msk.bf16.mxu0 %vm6366_vm1, %v6746_v59 }
 0xc4f   :  { %v5531_v6 = vpop.eup %5530  ;;  %4905 = vmatprep.mubr.msk.f32.mxu0 %vm594_vm15, %v2862_v18  ;;  %4964 = vmatpush3.bf16.msra.mxu1 %v5352_v45 }
 0xc50   :  { %v5533_v63 = vpop.eup %5532  ;;  %v3089_v13 = vpop.xlane.xlu1 %3088  ;;  %4906 = vmatmul.mubr.msk.f32.vlgmr.msra.gmra.mrb[24].mxu0 %vm594_vm15, %v2863_v8  ;;  %v2865_v34 = vmul.f32 %v5531_v6, %v6931_v16  ;;  %4965 = vmatprep.subr.bf16.mxu1 %v5353_v46 }
 0xc51   :  { %5534 = vrcp.f32 %v3089_v13  ;;  %5203 = vmatpush3.bf16.msk.msra.mxu0 %vm6366_vm1, %v6746_v59  ;;  %v3086_v48 = vpop.xlane.xlu0 %3085  ;;  %v2864_v42 = vmul.f32 %v5533_v63, %v6933_v30 }
 0xc52   :  { %5206 = vmatprep.subr.msk.bf16.mxu0 %vm6366_vm1, %v6744_v23  ;;  %5536 = vrcp.f32 %v3086_v48 }
 0xc53   :  { %4908 = vmatprep.mubr.msk.f32.mxu0 %vm594_vm15, %v2864_v42  ;;  %4966 = vmatpush3.bf16.msra.mxu1 %v5353_v46 }
 0xc54   :  { %v3095_v49 = vpop.xlane.xlu1 %3094  ;;  %4909 = vmatmul.mubr.msk.f32.gmra.mrb[26].mxu0 %vm594_vm15, %v2865_v34  ;;  %4967 = vmatprep.subr.bf16.mxu1 %v5354_v57 }
 0xc55   :  { %5538 = vrcp.f32 %v3095_v49  ;;  %5209 = vmatpush3.bf16.msk.msra.mxu0 %vm6366_vm1, %v6744_v23  ;;  %v3092_v59 = vpop.xlane.xlu0 %3091 }
 0xc56   :  { %5540 = vrcp.f32 %v3092_v59  ;;  %4939 = vmatprep.subr.bf16.mxu0 %v5342_v51 }
 0xc57   :  { %4968 = vmatpush3.bf16.msra.mxu1 %v5354_v57  ;;  %v5358_v57 = vld [vmem:[%s7301_s11 + $0x40] sm:$0xff]  }
 0xc58   :  { %4969 = vmatprep.subr.bf16.mxu1 %v5355_v17 }
 0xc5b   :  { %v5535_v30 = vpop.eup %5534  ;;  %4970 = vmatpush3.bf16.msra.mxu1 %v5355_v17  ;;  %v5359_v17 = vld [vmem:[%s7301_s11 + $0x48] sm:$0xff]  }
 0xc5c   :  { %v5537_v22 = vpop.eup %5536  ;;  %v3101_v12 = vmul.f32 %v5535_v30, %v6941_v50  ;;  %v5344_v50 = vld [vmem:[%s7295_s5 + $0x50] sm:$0xff]   ;;  %4971 = vmatprep.subr.bf16.mxu1 %v5356_v10 }
 0xc5d   :  { %v3100_v16 = vmul.f32 %v5537_v22, %v6943_v27  ;;  %v5345_v27 = vld [vmem:[%s7295_s5 + $0x58] sm:$0xff]  }
 0xc5f   :  { %v5539_v14 = vpop.eup %5538  ;;  %4933 = vmatprep.mubr.msk.f32.mxu0 %vm594_vm15, %v3100_v16  ;;  %4972 = vmatpush3.bf16.msra.mxu1 %v5356_v10  ;;  %v5360_v10 = vld [vmem:[%s7301_s11 + $0x50] sm:$0xff]  }
 0xc60   :  { %v5541_v1 = vpop.eup %5540  ;;  %4934 = vmatmul.mubr.msk.f32.vlgmr.msra.gmra.mrb[24].mxu0 %vm594_vm15, %v3101_v12  ;;  %v3103_v23 = vmul.f32 %v5539_v14, %v6949_v36  ;;  %v5348_v36 = vld [vmem:[%s7295_s5 + $0x70] sm:$0xff]   ;;  %4973 = vmatprep.subr.bf16.mxu1 %v5357_v55 }
 0xc61   :  { %v3102_v52 = vmul.f32 %v5541_v1, %v6951_v35  ;;  %4940 = vmatpush3.bf16.msra.mxu0 %v5342_v51  ;;  %v5349_v35 = vld [vmem:[%s7295_s5 + $0x78] sm:$0xff]  }
 0xc62   :  { %4941 = vmatprep.subr.bf16.mxu0 %v5343_v56 }
 0xc63   :  { %4936 = vmatprep.mubr.msk.f32.mxu0 %vm594_vm15, %v3102_v52  ;;  %4974 = vmatpush3.bf16.msra.mxu1 %v5357_v55  ;;  %v5361_v55 = vld [vmem:[%s7301_s11 + $0x58] sm:$0xff]  }
 0xc64   :  { %4937 = vmatmul.mubr.msk.f32.gmra.mrb[26].mxu0 %vm594_vm15, %v3103_v23 }
 0xc65   :  { %4942 = vmatpush3.bf16.msra.mxu0 %v5343_v56 }
 0xc66   :  { %4943 = vmatprep.subr.bf16.mxu0 %v5344_v50 }
 0xc69   :  { %4944 = vmatpush3.bf16.msra.mxu0 %v5344_v50 }
 0xc6a   :  { %4945 = vmatprep.subr.bf16.mxu0 %v5345_v27 }
 0xc6d   :  { %4946 = vmatpush3.bf16.msra.mxu0 %v5345_v27 }
 0xc6e   :  { %4947 = vmatprep.subr.bf16.mxu0 %v5346_v61 }
 0xc71   :  { %4948 = vmatpush3.bf16.msra.mxu0 %v5346_v61 }
 0xc72   :  { %4949 = vmatprep.subr.bf16.mxu0 %v5347_v20 }
 0xc75   :  { %4950 = vmatpush3.bf16.msra.mxu0 %v5347_v20 }
 0xc76   :  { %4951 = vmatprep.subr.bf16.mxu0 %v5348_v36 }
 0xc79   :  { %4952 = vmatpush3.bf16.msra.mxu0 %v5348_v36 }
 0xc7a   :  { %4953 = vmatprep.subr.bf16.mxu0 %v5349_v35 }
 0xc7d   :  { %4954 = vmatpush3.bf16.msra.mxu0 %v5349_v35 }
 0xc7e   :  { %4979 = vmatprep.subr.bf16.mxu0 %v5358_v57 }
 0xd33   :  { %v4935_v41 = vpop.f32.mrb[24].mxu0 }
 0xd34   :  { %v3186_v53 = vpop.f32.mrb[25].mxu0 }
 0xd35   :  { %v3209_v58 = vpack.c.bf16 %v4935_v41, %v3186_v53 }
 0xd37   :  { %v4938_v25 = vpop.f32.mrb[26].mxu0  ;;  %4955 = vmatprep.mubr.bf16.mxu0 %v3209_v58  ;;  %v4295_v58 = vld [vmem:[%s7297_s7 + $0x20] sm:$0xff] }
 0xd38   :  { %v3196_v0 = vpop.f32.mrb[27].mxu0 }
 0xd39   :  { %v3210_v39 = vpack.c.bf16 %v4938_v25, %v3196_v0 }
 0xd3b   :  { %4956 = vmatmul.mubr.bf16.vlgmr.msra.gmra.mrb[28].mxu0 %v3210_v39 }
 0xd3c   :  { %4980 = vmatpush3.bf16.msra.mxu0 %v5358_v57  ;;  %v4349_v57 = vld [vmem:[%s7302_s12 + $0x30] sm:$0xff] }
 0xd3d   :  { %4981 = vmatprep.subr.bf16.mxu0 %v5359_v17 }
 0xd40   :  { %4982 = vmatpush3.bf16.msra.mxu0 %v5359_v17 }
 0xd41   :  { %4983 = vmatprep.subr.bf16.mxu0 %v5360_v10 }
 0xd44   :  { %4984 = vmatpush3.bf16.msra.mxu0 %v5360_v10  ;;  %v4347_v10 = vld [vmem:[%s7302_s12 + $0x20] sm:$0xff] }
 0xd45   :  { %4985 = vmatprep.subr.bf16.mxu0 %v5361_v55 }
 0xd48   :  { %4986 = vmatpush3.bf16.msra.mxu0 %v5361_v55  ;;  %v4350_v55 = vld [vmem:[%s7302_s12 + $0x38] sm:$0xff] }
 0xe0e   :  { %v4957_v29 = vpop.f32.mrb[28].mxu0 }
 0xe0f   :  { %v3324_v9 = vadd.f32 %v4957_v29, %v4285_v7  ;;  %v3315_v44 = vpop.f32.mrb[29].mxu0  ;;  %v4296_v7 = vld [vmem:[%s7297_s7 + $0x28] sm:$0xff] }
 0xe10   :  { %v4958_v3 = vpop.f32.mrb[30].mxu0  ;;  %v3316_v40 = vadd.f32 %v4283_v24, %v3315_v44  ;;  %v4299_v44 = vld [vmem:[%s7298_s8 + $0x20] sm:$0xff] }
 0xe11   :  { %v7059_v37 = vadd.f32 %v3324_v9, %v6706_v5  ;;  %v3327_v21 = vadd.f32 %v4958_v3, %v4286_v32  ;;  %v3318_v2 = vpop.f32.mrb[31].mxu0  ;;  %v4300_v3 = vld [vmem:[%s7298_s8 + $0x28] sm:$0xff] }
 0xe12   :  { %v3319_v47 = vadd.f32 %v4284_v33, %v3318_v2  ;;  %v7066_v60 = vadd.f32 %v3316_v40, %v6686_v26  ;;  %v4297_v33 = vld [vmem:[%s7297_s7 + $0x30] sm:$0xff] }
 0xe13   :  { %v7062_v43 = vadd.f32 %v3327_v21, %v6708_v11  ;;  %3348 = vadd.xlane.f32.xlu0 %v7059_v37  ;;  %v3358_v26 = vmul.f32 %v7059_v37, %v7059_v37 }
 0xe14   :  { %v7070_v54 = vadd.f32 %v3319_v47, %v6688_v31  ;;  %v3356_v5 = vmul.f32 %v7066_v60, %v7066_v60  ;;  %v4298_v47 = vld [vmem:[%s7297_s7 + $0x38] sm:$0xff] }
 0xe15   :  { %3350 = vadd.xlane.f32.xlu1 %v7062_v43  ;;  %v3359_v31 = vmul.f32 %v7062_v43, %v7062_v43 }
 0xe16   :  { %v3357_v11 = vmul.f32 %v7070_v54, %v7070_v54 }
 0xe17   :  { %3344 = vadd.xlane.f32.xlu0 %v7066_v60 }
 0xe19   :  { %3346 = vadd.xlane.f32.xlu1 %v7070_v54 }
 0xe1b   :  { %3360 = vadd.xlane.f32.xlu0 %v3356_v5 }
 0xe1d   :  { %3362 = vadd.xlane.f32.xlu1 %v3357_v11 }
 0xe1f   :  { %3364 = vadd.xlane.f32.xlu0 %v3358_v26  ;;  %v4301_v26 = vld [vmem:[%s7298_s8 + $0x30] sm:$0xff] }
 0xe21   :  { %3366 = vadd.xlane.f32.xlu1 %v3359_v31 }
 0xea0   :  { %v3349_v38 = vpop.xlane.xlu0 %3348 }
 0xea1   :  { %v3354_v48 = vmul.f32 0.03125, %v3349_v38  ;;  %v5362_v38 = vld [vmem:[%s7301_s11 + $0x60] sm:$0xff]  }
 0xea2   :  { %v3351_v15 = vpop.xlane.xlu1 %3350  ;;  %4987 = vmatprep.subr.bf16.mxu0 %v5362_v38 }
 0xea3   :  { %v3355_v51 = vmul.f32 0.03125, %v3351_v15  ;;  %v3374_v12 = vmul.f32 %v3354_v48, %v3354_v48  ;;  %v3382_v29 = vsub.f32 %v7059_v37, %v3354_v48  ;;  %4988 = vmatpush3.bf16.msra.mxu0 %v5362_v38  ;;  %v5363_v15 = vld [vmem:[%s7301_s11 + $0x68] sm:$0xff]   ;;  %v4322_v48 = vld [vmem:[%s7300_s10 + $0x38] sm:$0xff] }
 0xea4   :  { %v3345_v18 = vpop.xlane.xlu0 %3344  ;;  %4989 = vmatprep.subr.bf16.mxu0 %v5363_v15 }
 0xea5   :  { %v3352_v8 = vmul.f32 0.03125, %v3345_v18  ;;  %v3375_v52 = vmul.f32 %v3355_v51, %v3355_v51  ;;  %v3383_v40 = vsub.f32 %v7062_v43, %v3355_v51  ;;  %v4302_v43 = vld [vmem:[%s7298_s8 + $0x38] sm:$0xff]  ;;  %v5364_v18 = vld [vmem:[%s7301_s11 + $0x70] sm:$0xff]   ;;  %v4320_v51 = vld [vmem:[%s7300_s10 + $0x28] sm:$0xff] }
 0xea6   :  { %v3347_v6 = vpop.xlane.xlu1 %3346 }
 0xea7   :  { %v3353_v63 = vmul.f32 0.03125, %v3347_v6  ;;  %v3372_v42 = vmul.f32 %v3352_v8, %v3352_v8  ;;  %v3380_v41 = vsub.f32 %v7066_v60, %v3352_v8  ;;  %4990 = vmatpush3.bf16.msra.mxu0 %v5363_v15  ;;  %v5365_v8 = vld [vmem:[%s7301_s11 + $0x78] sm:$0xff]   ;;  %v4321_v6 = vld [vmem:[%s7300_s10 + $0x30] sm:$0xff] }
 0xea8   :  { %v3361_v13 = vpop.xlane.xlu0 %3360  ;;  %4991 = vmatprep.subr.bf16.mxu0 %v5364_v18 }
 0xea9   :  { %v3368_v34 = vmul.f32 0.03125, %v3361_v13  ;;  %v3373_v59 = vmul.f32 %v3353_v63, %v3353_v63  ;;  %v3381_v25 = vsub.f32 %v7070_v54, %v3353_v63  ;;  %v4319_v63 = vld [vmem:[%s7300_s10 + $0x20] sm:$0xff] }
 0xeaa   :  { %v3363_v49 = vpop.xlane.xlu1 %3362 }
 0xeab   :  { %v3376_v30 = vsub.f32 %v3368_v34, %v3372_v42  ;;  %v3369_v22 = vmul.f32 0.03125, %v3363_v49  ;;  %4992 = vmatpush3.bf16.msra.mxu0 %v5364_v18 }
 0xeac   :  { %v3365_v16 = vpop.xlane.xlu0 %3364  ;;  %4993 = vmatprep.subr.bf16.mxu0 %v5365_v8 }
 0xead   :  { %v3384_v56 = vadd.f32 1e-12, %v3376_v30  ;;  %v3377_v14 = vsub.f32 %v3369_v22, %v3373_v59  ;;  %v3370_v1 = vmul.f32 0.03125, %v3365_v16 }
 0xeae   :  { %v3367_v23 = vpop.xlane.xlu1 %3366 }
 0xeaf   :  { %5542 = vrsqrt.f32 %v3384_v56  ;;  %v3385_v50 = vadd.f32 1e-12, %v3377_v14  ;;  %v3378_v27 = vsub.f32 %v3370_v1, %v3374_v12  ;;  %v3371_v61 = vmul.f32 0.03125, %v3367_v23  ;;  %4994 = vmatpush3.bf16.msra.mxu0 %v5365_v8  ;;  %v4348_v8 = vld [vmem:[%s7302_s12 + $0x28] sm:$0xff] }
 0xeb1   :  { %5544 = vrsqrt.f32 %v3385_v50  ;;  %v3386_v20 = vadd.f32 1e-12, %v3378_v27  ;;  %v3379_v36 = vsub.f32 %v3371_v61, %v3375_v52 }
 0xeb3   :  { %5546 = vrsqrt.f32 %v3386_v20  ;;  %v3387_v35 = vadd.f32 1e-12, %v3379_v36 }
 0xeb5   :  { %5548 = vrsqrt.f32 %v3387_v35 }
 0xeb9   :  { %v5543_v53 = vpop.eup %5542 }
 0xeba   :  { %v3392_v0 = vmul.f32 %v5543_v53, %v3380_v41 }
 0xebb   :  { %v5545_v39 = vpop.eup %5544 }
 0xebc   :  { %v3393_v24 = vmul.f32 %v5545_v39, %v3381_v25  ;;  %v3396_v32 = vmul.f32 %v4295_v58, %v3392_v0 }
 0xebd   :  { %v5547_v9 = vpop.eup %5546 }
 0xebe   :  { %v3394_v21 = vmul.f32 %v5547_v9, %v3382_v29  ;;  %v3397_v2 = vmul.f32 %v4296_v7, %v3393_v24  ;;  %v7128_v54 = vadd.f32 %v4299_v44, %v3396_v32 }
 0xebf   :  { %v5549_v37 = vpop.eup %5548 }
 0xec0   :  { %v3395_v60 = vmul.f32 %v5549_v37, %v3383_v40  ;;  %v7130_v5 = vadd.f32 %v4300_v3, %v3397_v2  ;;  %v3398_v11 = vmul.f32 %v4297_v33, %v3394_v21 }
 0xec2   :  { %v3404_v31 = vpack.c.bf16 %v7130_v5, %v7128_v54  ;;  %v3399_v4 = vmul.f32 %v4298_v47, %v3395_v60  ;;  %v7140_v62 = vadd.f32 %v4301_v26, %v3398_v11 }
 0xec4   :  { %4975 = vmatprep.mubr.bf16.mxu1 %v3404_v31  ;;  %v7142_v45 = vadd.f32 %v4302_v43, %v3399_v4 }
 0xec6   :  { %v3405_v46 = vpack.c.bf16 %v7142_v45, %v7140_v62 }
 0xec8   :  { %4976 = vmatmul.mubr.bf16.vlgmr.msra.gmra.mrb[48].mxu1 %v3405_v46 }
 0xf9b   :  { %v4977_v13 = vpop.f32.mrb[48].mxu1 }
 0xf9c   :  { %v3519_v42 = vadd.f32 %v4977_v13, %v4321_v6  ;;  %v3510_v34 = vpop.f32.mrb[49].mxu1 }
 0xf9d   :  { %v3511_v49 = vadd.f32 %v4319_v63, %v3510_v34  ;;  %v4978_v59 = vpop.f32.mrb[50].mxu1 }
 0xf9e   :  { %v3527_v30 = vmul.f32 %v3519_v42, %v3519_v42  ;;  %v3522_v22 = vadd.f32 %v4978_v59, %v4322_v48  ;;  %v3513_v16 = vpop.f32.mrb[51].mxu1 }
 0xf9f   :  { %v3525_v12 = vmul.f32 %v3511_v49, %v3511_v49  ;;  %v3514_v56 = vadd.f32 %v4320_v51, %v3513_v16 }
 0xfa0   :  { %v3531_v14 = vmul.f32 %v3527_v30, %v3519_v42  ;;  %v3528_v1 = vmul.f32 %v3522_v22, %v3522_v22 }
 0xfa1   :  { %v3529_v52 = vmul.f32 %v3525_v12, %v3511_v49  ;;  %v3526_v23 = vmul.f32 %v3514_v56, %v3514_v56 }
 0xfa2   :  { %v3535_v50 = vmul.f32 0.044715, %v3531_v14  ;;  %v3532_v27 = vmul.f32 %v3528_v1, %v3522_v22 }
 0xfa3   :  { %v3533_v61 = vmul.f32 0.044715, %v3529_v52  ;;  %v3530_v20 = vmul.f32 %v3526_v23, %v3514_v56 }
 0xfa4   :  { %v3539_v36 = vadd.f32 %v3535_v50, %v3519_v42  ;;  %v3536_v35 = vmul.f32 0.044715, %v3532_v27 }
 0xfa5   :  { %v3537_v41 = vadd.f32 %v3533_v61, %v3511_v49  ;;  %v3534_v53 = vmul.f32 0.044715, %v3530_v20 }
 0xfa6   :  { %v3543_v58 = vmul.f32 0.7978846, %v3539_v36  ;;  %v3540_v25 = vadd.f32 %v3536_v35, %v3522_v22 }
 0xfa7   :  { %v3541_v0 = vmul.f32 0.7978846, %v3537_v41  ;;  %v3538_v39 = vadd.f32 %v3534_v53, %v3514_v56 }
 0xfa8   :  { %5550 = vtanh.f32 %v3543_v58  ;;  %v3544_v7 = vmul.f32 0.7978846, %v3540_v25 }
 0xfa9   :  { %5552 = vtanh.f32 %v3541_v0  ;;  %v3542_v29 = vmul.f32 0.7978846, %v3538_v39 }
 0xfaa   :  { %5554 = vtanh.f32 %v3544_v7 }
 0xfab   :  { %5556 = vtanh.f32 %v3542_v29 }
 0xfb2   :  { %v5551_v24 = vpop.eup %5550 }
 0xfb3   :  { %v5553_v32 = vpop.eup %5552  ;;  %v3551_v9 = vadd.f32 1.0, %v5551_v24 }
 0xfb4   :  { %v5555_v44 = vpop.eup %5554  ;;  %v3549_v3 = vadd.f32 1.0, %v5553_v32 }
 0xfb5   :  { %v5557_v33 = vpop.eup %5556  ;;  %v3555_v40 = vmul.f32 0.5, %v3551_v9  ;;  %v3552_v21 = vadd.f32 1.0, %v5555_v44 }
 0xfb6   :  { %v3550_v2 = vadd.f32 1.0, %v5557_v33  ;;  %v3553_v37 = vmul.f32 0.5, %v3549_v3 }
 0xfb7   :  { %v3556_v47 = vmul.f32 0.5, %v3552_v21  ;;  %v3559_v11 = vmul.f32 %v3555_v40, %v3519_v42 }
 0xfb8   :  { %v3554_v60 = vmul.f32 0.5, %v3550_v2  ;;  %v3557_v43 = vmul.f32 %v3553_v37, %v3511_v49  ;;  %v4359_v2 = vld [vmem:[%s7303_s13 + $0x20] sm:$0xff] }
 0xfb9   :  { %v3560_v26 = vmul.f32 %v3556_v47, %v3522_v22  ;;  %v5695_v22 = vmov 0.0|0.0  }
 0xfba   :  { %v3558_v31 = vmul.f32 %v3554_v60, %v3514_v56  ;;  %5210 = vmatprep.subr.bf16.mxu1 %v5695_v22 }
 0xfbb   :  { %v3562_v4 = vpack.c.bf16 %v3560_v26, %v3559_v11  ;;  %v4360_v11 = vld [vmem:[%s7303_s13 + $0x28] sm:$0xff] }
 0xfbc   :  { %v3561_v46 = vpack.c.bf16 %v3558_v31, %v3557_v43 }
 0xfbe   :  { %4995 = vmatprep.mubr.bf16.mxu0 %v3561_v46  ;;  %v4363_v46 = vld [vmem:[%s7304_s14 + $0x20] sm:$0xff] }
 0xfbf   :  { %4996 = vmatmul.mubr.bf16.vlgmr.msra.gmra.mrb[32].mxu0 %v3562_v4 }
0x1092   :  { %v4997_v17 = vpop.f32.mrb[32].mxu0 }
0x1093   :  { %v3676_v38 = vadd.f32 %v4997_v17, %v4349_v57  ;;  %v3667_v15 = vpop.f32.mrb[33].mxu0  ;;  %v4364_v57 = vld [vmem:[%s7304_s14 + $0x28] sm:$0xff]  ;;  %v4361_v17 = vld [vmem:[%s7303_s13 + $0x30] sm:$0xff] }
0x1094   :  { %v4998_v18 = vpop.f32.mrb[34].mxu0  ;;  %v3668_v63 = vadd.f32 %v4347_v10, %v3667_v15  ;;  %v3756_v15 = vmul.u32 8, %v6149_v19  ;;  %v5368_v19 = vld [vmem:[%s7345_s17 + $0x10] sm:$0xff]  }
0x1095   :  { %v7195_v6 = vadd.f32 %v3676_v38, %v7140_v62  ;;  %v3679_v13 = vadd.f32 %v4998_v18, %v4350_v55  ;;  %v3670_v48 = vpop.f32.mrb[35].mxu0 }
0x1096   :  { %v3671_v34 = vadd.f32 %v4348_v8, %v3670_v48  ;;  %v3682_v51 = vadd.f32 %v3668_v63, %v7128_v54  ;;  %v5697_v54 = vmov 0.0   ;;  %v4362_v8 = vld [vmem:[%s7303_s13 + $0x38] sm:$0xff]  ;;  %vm3757_vm3 = vcmp.eq.s32.totalorder %v5994_v28, %v3756_v15  ;;  %v5367_v28 = vld [vmem:[%s7345_s17 + $0x8] sm:$0xff]  }
0x1097   :  { %v7198_v42 = vadd.f32 %v3679_v13, %v7142_v45  ;;  %3700 = vadd.xlane.f32.xlu0 %v7195_v6  ;;  %v3710_v30 = vmul.f32 %v7195_v6, %v7195_v6  ;;  %5007 = vmatprep.mubr.msk.f32.mxu1 %vm5696_vm2, %v5697_v54  ;;  %vm3759_vm5 = vmand %vm3757_vm3, %vm3758_vm4 }
0x1098   :  { %v3683_v49 = vadd.f32 %v3671_v34, %v7130_v5  ;;  %v3708_v59 = vmul.f32 %v3682_v51, %v3682_v51  ;;  %5030 = vmatprep.subr.bf16.mxu0 %v5697_v54  ;;  %5046 = vmatprep.mubr.msk.bf16.mxu0 %vm5696_vm2, %v5697_v54  ;;  %v4365_v34 = vld [vmem:[%s7304_s14 + $0x30] sm:$0xff] }
0x1099   :  { %3702 = vadd.xlane.f32.xlu1 %v7198_v42  ;;  %v3711_v45 = vmul.f32 %v7198_v42, %v7198_v42 }
0x109a   :  { %v3709_v62 = vmul.f32 %v3683_v49, %v3683_v49 }
0x109b   :  { %3696 = vadd.xlane.f32.xlu0 %v3682_v51 }
0x109d   :  { %3698 = vadd.xlane.f32.xlu1 %v3683_v49 }
0x109f   :  { %3712 = vadd.xlane.f32.xlu0 %v3708_v59 }
0x10a1   :  { %3714 = vadd.xlane.f32.xlu1 %v3709_v62 }
0x10a3   :  { %3716 = vadd.xlane.f32.xlu0 %v3710_v30 }
0x10a5   :  { %3718 = vadd.xlane.f32.xlu1 %v3711_v45  ;;  %v3760_v45 = vsel %vm3759_vm5, 1.0, %v5697_v54 }
0x1124   :  { %v3701_v5 = vpop.xlane.xlu0 %3700 }
0x1125   :  { %v3706_v23 = vmul.f32 0.03125, %v3701_v5  ;;  %v5366_v5 = vld [vmem:[%s7345_s17] sm:$0xff]  }
0x1126   :  { %v3703_v16 = vpop.xlane.xlu1 %3702 }
0x1127   :  { %v3707_v61 = vmul.f32 0.03125, %v3703_v16  ;;  %v3726_v58 = vmul.f32 %v3706_v23, %v3706_v23  ;;  %v3734_v26 = vsub.f32 %v7195_v6, %v3706_v23  ;;  %v5370_v16 = vld [vmem:[%s7345_s17 + $0x20] sm:$0xff]   ;;  %v5376_v23 = vld [vmem:[#allocation7 + $0x10] sm:$0xff]  }
0x1128   :  { %v3697_v12 = vpop.xlane.xlu0 %3696 }
0x1129   :  { %v3704_v56 = vmul.f32 0.03125, %v3697_v12  ;;  %v3727_v7 = vmul.f32 %v3707_v61, %v3707_v61  ;;  %v3735_v10 = vsub.f32 %v7198_v42, %v3707_v61  ;;  %v4366_v42 = vld [vmem:[%s7304_s14 + $0x38] sm:$0xff]  ;;  %v5371_v12 = vld [vmem:[%s7345_s17 + $0x28] sm:$0xff]  }
0x112a   :  { %v3699_v14 = vpop.xlane.xlu1 %3698 }
0x112b   :  { %v3705_v1 = vmul.f32 0.03125, %v3699_v14  ;;  %v3724_v50 = vmul.f32 %v3704_v56, %v3704_v56  ;;  %v3732_v40 = vsub.f32 %v3682_v51, %v3704_v56  ;;  %v5372_v56 = vld [vmem:[%s7345_s17 + $0x30] sm:$0xff]   ;;  %v5373_v14 = vld [vmem:[%s7345_s17 + $0x38] sm:$0xff]  }
0x112c   :  { %v3713_v52 = vpop.xlane.xlu0 %3712 }
0x112d   :  { %v3720_v27 = vmul.f32 0.03125, %v3713_v52  ;;  %v3725_v36 = vmul.f32 %v3705_v1, %v3705_v1  ;;  %v3733_v37 = vsub.f32 %v3683_v49, %v3705_v1  ;;  %v5374_v1 = vld [vmem:[#allocation7] sm:$0xff]   ;;  %v5375_v52 = vld [vmem:[#allocation7 + $0x8] sm:$0xff]  }
0x112e   :  { %v3715_v20 = vpop.xlane.xlu1 %3714  ;;  %5031 = vmatpush3.bf16.msra.mxu0 %v5374_v1 }
0x112f   :  { %v3728_v35 = vsub.f32 %v3720_v27, %v3724_v50  ;;  %v3721_v41 = vmul.f32 0.03125, %v3715_v20  ;;  %5032 = vmatprep.subr.bf16.mxu0 %v5697_v54  ;;  %v5377_v50 = vld [vmem:[#allocation7 + $0x18] sm:$0xff]  }
0x1130   :  { %v3717_v53 = vpop.xlane.xlu0 %3716 }
0x1131   :  { %v3736_v25 = vadd.f32 1e-12, %v3728_v35  ;;  %v3729_v0 = vsub.f32 %v3721_v41, %v3725_v36  ;;  %v3722_v39 = vmul.f32 0.03125, %v3717_v53  ;;  %v5378_v36 = vld [vmem:[#allocation7 + $0x20] sm:$0xff]   ;;  %v5379_v35 = vld [vmem:[#allocation7 + $0x28] sm:$0xff]   ;;  %v5380_v41 = vld [vmem:[#allocation7 + $0x30] sm:$0xff]  }
0x1132   :  { %v3719_v29 = vpop.xlane.xlu1 %3718  ;;  %5033 = vmatpush3.bf16.msra.mxu0 %v5375_v52  ;;  %v5381_v53 = vld [vmem:[#allocation7 + $0x38] sm:$0xff]  }
0x1133   :  { %5558 = vrsqrt.f32 %v3736_v25  ;;  %v3737_v24 = vadd.f32 1e-12, %v3729_v0  ;;  %v3730_v32 = vsub.f32 %v3722_v39, %v3726_v58  ;;  %v3723_v9 = vmul.f32 0.03125, %v3719_v29  ;;  %5034 = vmatprep.subr.bf16.mxu0 %v5697_v54  ;;  %v3851_v58 = vld [vmem:[#allocation6] sm:$0xff] }
0x1135   :  { %5560 = vrsqrt.f32 %v3737_v24  ;;  %v3738_v44 = vadd.f32 1e-12, %v3730_v32  ;;  %v3731_v3 = vsub.f32 %v3723_v9, %v3727_v7  ;;  %v3958_v9 = vld [vmem:[#allocation9] sm:$0xff] }
0x1136   :  { %5035 = vmatpush3.bf16.msra.mxu0 %v5376_v23 }
0x1137   :  { %5562 = vrsqrt.f32 %v3738_v44  ;;  %v3739_v33 = vadd.f32 1e-12, %v3731_v3  ;;  %5036 = vmatprep.subr.bf16.mxu0 %v5697_v54 }
0x1139   :  { %5564 = vrsqrt.f32 %v3739_v33 }
0x113a   :  { %5037 = vmatpush3.bf16.msra.mxu0 %v5377_v50 }
0x113b   :  { %5038 = vmatprep.subr.bf16.mxu0 %v5697_v54 }
0x113d   :  { %v5559_v21 = vpop.eup %5558 }
0x113e   :  { %v3744_v47 = vmul.f32 %v5559_v21, %v3732_v40  ;;  %5039 = vmatpush3.bf16.msra.mxu0 %v5378_v36 }
0x113f   :  { %v5561_v60 = vpop.eup %5560  ;;  %5040 = vmatprep.subr.bf16.mxu0 %v5697_v54 }
0x1140   :  { %v3745_v43 = vmul.f32 %v5561_v60, %v3733_v37  ;;  %v3748_v31 = vmul.f32 %v4359_v2, %v3744_v47 }
0x1141   :  { %v5563_v4 = vpop.eup %5562 }
0x1142   :  { %v3749_v55 = vmul.f32 %v4360_v11, %v3745_v43  ;;  %v3746_v38 = vmul.f32 %v5563_v4, %v3734_v26  ;;  %v3752_v6 = vadd.f32 %v4363_v46, %v3748_v31  ;;  %5041 = vmatpush3.bf16.msra.mxu0 %v5379_v35 }
0x1143   :  { %v5565_v18 = vpop.eup %5564  ;;  %5042 = vmatprep.subr.bf16.mxu0 %v5697_v54 }
0x1144   :  { %v3753_v63 = vadd.f32 %v4364_v57, %v3749_v55  ;;  %v3747_v13 = vmul.f32 %v5565_v18, %v3735_v10  ;;  %v3750_v48 = vmul.f32 %v4361_v17, %v3746_v38 }
0x1146   :  { %v5211_v51 = vpack.c.bf16 %v3753_v63, %v3752_v6  ;;  %v3751_v49 = vmul.f32 %v4362_v8, %v3747_v13  ;;  %v3754_v59 = vadd.f32 %v4365_v34, %v3750_v48  ;;  %5043 = vmatpush3.bf16.msra.mxu0 %v5380_v41 }
0x1147   :  { %5044 = vmatprep.subr.bf16.mxu0 %v5697_v54 }
0x1148   :  { %5212 = vmatpush3.bf16.msra.mxu1 %v5211_v51  ;;  %v3755_v62 = vadd.f32 %v4366_v42, %v3751_v49 }
0x1149   :  { %5213 = vmatprep.subr.bf16.mxu1 %v5695_v22  ;;  %v5369_v22 = vld [vmem:[%s7345_s17 + $0x18] sm:$0xff]  }
0x114a   :  { %v5214_v30 = vpack.c.bf16 %v3755_v62, %v3754_v59  ;;  %5045 = vmatpush3.bf16.msra.mxu0 %v5381_v53 }
0x114c   :  { %5215 = vmatpush3.bf16.msra.mxu1 %v5214_v30 }
0x114d   :  { %5010 = vmatprep.subr.bf16.mxu1 %v5697_v54 }
0x114f   :  { %5008 = vmatmul.mubr.msk.f32.vlgmr.msra.gmra.mrb[52].mxu1 %vm594_vm15, %v3760_v45 }
0x1150   :  { %5011 = vmatpush3.bf16.msra.mxu1 %v5366_v5  ;;  %5026 = vmatprep.mubr.msk.bf16.mxu1 %vm5696_vm2, %v5697_v54 }
0x1151   :  { %5012 = vmatprep.subr.bf16.mxu1 %v5697_v54 }
0x1154   :  { %5013 = vmatpush3.bf16.msra.mxu1 %v5367_v28 }
0x1155   :  { %5014 = vmatprep.subr.bf16.mxu1 %v5697_v54 }
0x1158   :  { %5015 = vmatpush3.bf16.msra.mxu1 %v5368_v19 }
0x1159   :  { %5016 = vmatprep.subr.bf16.mxu1 %v5697_v54 }
0x115c   :  { %5017 = vmatpush3.bf16.msra.mxu1 %v5369_v22 }
0x115d   :  { %5018 = vmatprep.subr.bf16.mxu1 %v5697_v54 }
0x1160   :  { %5019 = vmatpush3.bf16.msra.mxu1 %v5370_v16 }
0x1161   :  { %5020 = vmatprep.subr.bf16.mxu1 %v5697_v54 }
0x1164   :  { %5021 = vmatpush3.bf16.msra.mxu1 %v5371_v12 }
0x1165   :  { %5022 = vmatprep.subr.bf16.mxu1 %v5697_v54 }
0x1168   :  { %5023 = vmatpush3.bf16.msra.mxu1 %v5372_v56 }
0x1169   :  { %5024 = vmatprep.subr.bf16.mxu1 %v5697_v54 }
0x116c   :  { %5025 = vmatpush3.bf16.msra.mxu1 %v5373_v14 }
0x1222   :  { %v3830_v27 = vpop.f32.mrb[52].mxu1 }
0x1223   :  { %v3834_v61 = vpack.c.bf16 %v3830_v27, %v3830_v27  ;;  %v5009_v20 = vpop.f32.mrb[53].mxu1 }
0x1225   :  { %5027 = vmatmul.mubr.bf16.vlgmr.msra.gmra.mrb[56].mxu1 %v3834_v61 }
0x12f8   :  { %v3934_v25 = vpop.f32.mrb[56].mxu1 }
0x12f9   :  { %v3935_v0 = vadd.f32 %v3934_v25, %v3851_v58  ;;  %v5028_v39 = vpop.f32.mrb[57].mxu1 }
0x12fa   :  { %v3937_v7 = vpop.f32.mrb[58].mxu1 }
0x12fb   :  { %5566 = vtanh.f32 %v3935_v0  ;;  %v5029_v29 = vpop.f32.mrb[59].mxu1 }
0x1305   :  { %v5567_v24 = vpop.eup %5566 }
0x1306   :  { %v3941_v32 = vpack.c.bf16 %v5567_v24, %v5567_v24 }
0x1308   :  { %5047 = vmatmul.mubr.bf16.vlgmr.msra.gmra.mrb[36].mxu0 %v3941_v32 }
0x13db   :  { %v4041_v44 = vpop.f32.mrb[36].mxu0 }
0x13dc   :  { %v4042_v3 = vadd.f32 %v4041_v44, %v3958_v9  ;;  %v5048_v33 = vpop.f32.mrb[37].mxu0 }
0x13dd   :  { %v4044_v40 = vpop.f32.mrb[38].mxu0 }
0x13de   :  { %4047 = vst [vmem:[%s7346_s20] sm:$0xff] %v4042_v3  ;;  %v5049_v54 = vpop.f32.mrb[39].mxu0 }
0x13df   :  { %4052 = vsyncpa [#allocation3], 1 }
0x13e0   :  { %4053 = vsyncpa [#allocation5], 1 }
0x13e1   :  { %4054 = vsyncpa [#allocation8], 1 }

</bundles_post_ra>
